<compile_context>
chip_gen: v7x
topology: tpu7x:2x2x1
jax: 0.10.0
libtpu: 0.0.40
codegen_flags: <defaults>
</compile_context>

<pallas_src>
import functools

import jax
import jax.numpy as jnp
from jax import lax
from jax.experimental import pallas as pl
from jax.experimental.pallas import tpu as pltpu


def _encoder_kernel(mask_ref, x_ref, wlr_ref, w1_ref, w2_ref, vec_ref, o_ref,
                    *, num_heads, ff_dim, weights_resident):
    R, H = o_ref.shape
    C = H // num_heads
    F = ff_dim

    l = pl.program_id(1)
    wi = l if weights_resident else 0

    # The output block is revisited across the layer axis, so it doubles as the
    # layer-resident activation buffer: seed it with x at layer 0, afterwards
    # read the previous layer's result back from it.
    @pl.when(l == 0)
    def _():
        o_ref[...] = x_ref[...]

    x = o_ref[...]                         # (R, H) f32 activations
    xb = x.astype(jnp.bfloat16)

    # --- packed per-layer vectors: one slab, sliced in registers -------------
    vec = vec_ref[wi]                      # (9, W) f32
    blr = vec[0:1, :2 * H]                 # [bl | br]
    att = vec[1:2, :H]                     # attention vector, heads*C flattened
    gb  = vec[2:3, :H]                     # GAT output bias
    g1  = vec[3:4, :H]
    be1 = vec[4:5, :H]
    b1  = vec[5:6, :F]
    b2  = vec[6:7, :H]
    g2  = vec[7:8, :H]
    be2 = vec[8:9, :H]

    # --- GATv2: fused source|target projection (one MXU matmul) --------------
    proj = jnp.dot(xb, wlr_ref[wi], preferred_element_type=jnp.float32) + blr
    xl = proj[:, :H]                       # lin_l(x): source / message features
    xr = proj[:, H:]                       # lin_r(x): target features
    xlb = xl.astype(jnp.bfloat16)

    xlT = xl.T                             # (H, R) — one transpose per layer
    scaled_r = xr * att                    # (R, H)
    scaled_lT = (xl * att).T               # (H, R)

    mask = mask_ref[0] != 0                # (R, R) block-diagonal adjacency^T
    neg_big = jnp.float32(-1e30)

    # hoist (0.4 * a_c) scalars out of the (R,R) channel loop
    a4 = [[jnp.float32(0.4) * vec[1:2, h * C + c:h * C + c + 1]
           for c in range(C)] for h in range(num_heads)]

    heads_out = []
    for h in range(num_heads):
        sl = slice(h * C, (h + 1) * C)

        # LeakyReLU(e; 0.2) = 0.6*e + 0.4*|e| :
        #   linear part -> rank-1 per-target + per-source contributions,
        #   only the |.| part needs per-channel work on the (R,R) tile.
        r_lin = jnp.sum(scaled_r[:, sl], axis=-1, keepdims=True)      # (R, 1)
        l_lin = jnp.sum(scaled_lT[sl, :], axis=0, keepdims=True)      # (1, R)
        acc = jnp.float32(0.6) * (r_lin + l_lin)                      # (R, R)
        for c in range(C):
            e = xr[:, h * C + c:h * C + c + 1] + xlT[h * C + c:h * C + c + 1, :]
            acc = acc + a4[h][c] * jnp.abs(e)

        # masked softmax over source nodes (targets with no in-edges -> alpha=0,
        # matching PyG sum-aggregation over an empty neighbour set)
        logits = jnp.where(mask, acc, neg_big)
        m = jnp.max(logits, axis=-1, keepdims=True)
        p = jnp.where(mask, jnp.exp(logits - m), 0.0)
        denom = jnp.sum(p, axis=-1, keepdims=True)
        inv = pl.reciprocal(jnp.where(denom > 0.0, denom, 1.0), approx=True)
        alpha = p * inv                                               # (R, R)

        heads_out.append(jnp.dot(alpha.astype(jnp.bfloat16), xlb[:, sl],
                                 preferred_element_type=jnp.float32))  # (R, C)

    gat = jnp.concatenate(heads_out, axis=-1) + gb                     # (R, H)

    # --- transformer tail: y = LN2( gat + FFN(LN1(gat)) ) — matches reference -
    def layer_norm(v, gamma, beta):
        mu = jnp.mean(v, axis=-1, keepdims=True)
        var = jnp.mean(jnp.square(v - mu), axis=-1, keepdims=True)
        return (v - mu) * lax.rsqrt(var + 1e-5) * gamma + beta

    h1 = layer_norm(gat, g1, be1)
    ff = jnp.dot(h1.astype(jnp.bfloat16), w1_ref[wi],
                 preferred_element_type=jnp.float32) + b1
    ff = ff * jax.nn.sigmoid(ff)                                       # SiLU (EUP)
    ff = jnp.dot(ff.astype(jnp.bfloat16), w2_ref[wi],
                 preferred_element_type=jnp.float32) + b2

    o_ref[...] = layer_norm(gat + ff, g2, be2)   # becomes next layer's input


def _choose_block_batch(B, N, target_rows=128):
    """Pack graphs so the packed row count R = Bblk*N fills the 128 lanes of the
    (R,R) attention tiles without blowing up the O(R^2 * H) scoring cost."""
    divs = [d for d in range(1, B + 1) if B % d == 0]
    ok = [d for d in divs if (d * N) % 8 == 0 or d == B] or [B]
    fit = [d for d in ok if d * N <= target_rows]
    d = max(fit) if fit else min(ok)
    return d, B // d


def make_encoder_call(B, N, H, num_heads, num_layers, ff_mult=4):
    F = ff_mult * H
    W = max(2 * H, F)
    L = num_layers
    Bblk, NB = _choose_block_batch(B, N)
    R = Bblk * N

    # Keep the whole per-layer weight stack resident in VMEM when it comfortably
    # fits (avoids re-DMAing weights NB*L times with the layer axis innermost);
    # otherwise stream one layer's weights per grid step.
    w_all = L * (H * 2 * H + H * F + F * H) * 2          # bf16 matrices
    v_all = L * 9 * W * 4                                # packed f32 vectors
    weights_resident = 2 * (w_all + v_all) <= 12 * 1024 * 1024

    if weights_resident:
        def wspec(shape):
            return pl.BlockSpec(shape, lambda b, l: (0,) * len(shape))
        wlr_spec = wspec((L, H, 2 * H))
        w1_spec = wspec((L, H, F))
        w2_spec = wspec((L, F, H))
        vec_spec = wspec((L, 9, W))
    else:
        def wspec(shape):
            return pl.BlockSpec((1,) + shape,
                                lambda b, l: (l,) + (0,) * len(shape))
        wlr_spec = wspec((H, 2 * H))
        w1_spec = wspec((H, F))
        w2_spec = wspec((F, H))
        vec_spec = wspec((9, W))

    in_specs = [
        pl.BlockSpec((1, R, R), lambda b, l: (b, 0, 0)),   # block-diag mask (int8)
        pl.BlockSpec((R, H), lambda b, l: (b, 0)),         # x (rows flattened)
        wlr_spec, w1_spec, w2_spec, vec_spec,
    ]

    # explicit VMEM budget (double-buffered blocks + dominant live temporaries)
    w_blk = (w_all + v_all) if weights_resident else (w_all + v_all) // L
    est = (2 * 2 * R * H * 4          # x in + activation out (double buffered)
           + 2 * R * R                # int8 mask
           + 2 * w_blk                # weight buffers
           + 4 * R * R * 4            # live (R,R) f32 scoring temporaries
           + 2 * R * F * 4            # FFN hidden temporaries
           + 4 * R * H * 4)           # proj / gat / LN temporaries
    vmem_limit = int(min(max(32 * 2 ** 20, 1.5 * est), 96 * 2 ** 20))

    kernel = functools.partial(_encoder_kernel, num_heads=num_heads, ff_dim=F,
                               weights_resident=weights_resident)

    return pl.pallas_call(
        kernel,
        out_shape=jax.ShapeDtypeStruct((B * N, H), jnp.float32),
        grid_spec=pltpu.PrefetchScalarGridSpec(
            num_scalar_prefetch=0,
            grid=(NB, num_layers),                 # layer axis innermost
            in_specs=in_specs,
            out_specs=pl.BlockSpec((R, H), lambda b, l: (b, 0)),
        ),
        compiler_params=pltpu.CompilerParams(
            dimension_semantics=("parallel", "arbitrary"),
            vmem_limit_bytes=vmem_limit),
    )


def init_layer_params(key, H, num_heads, ff_mult=4):
    C = H // num_heads
    F = ff_mult * H
    ks = jax.random.split(key, 5)
    s = lambda fan_in: 1.0 / jnp.sqrt(fan_in)
    return dict(
        wl=jax.random.normal(ks[0], (H, H), jnp.float32) * s(H),
        bl=jnp.zeros((H,), jnp.float32),
        wr=jax.random.normal(ks[1], (H, H), jnp.float32) * s(H),
        br=jnp.zeros((H,), jnp.float32),
        att=jax.random.normal(ks[2], (num_heads, C), jnp.float32) * s(C),
        gb=jnp.zeros((H,), jnp.float32),
        g1=jnp.ones((H,), jnp.float32),
        be1=jnp.zeros((H,), jnp.float32),
        w1=jax.random.normal(ks[3], (H, F), jnp.float32) * s(H),
        b1=jnp.zeros((F,), jnp.float32),
        w2=jax.random.normal(ks[4], (F, H), jnp.float32) * s(F),
        b2=jnp.zeros((H,), jnp.float32),
        g2=jnp.ones((H,), jnp.float32),
        be2=jnp.zeros((H,), jnp.float32),
    )


def graph_transformer_encoder(x, adj, params_list, num_heads, ff_mult=4):
    """x: (B, N, H) float32, adj: (B, N, N) adjacency (any numeric dtype)."""
    B, N, H = x.shape
    L = len(params_list)
    F = ff_mult * H
    W = max(2 * H, F)
    Bblk, NB = _choose_block_batch(B, N)
    R = Bblk * N

    # adjT[b, t, s] = adj[b, s, t] != 0 : target t attends over its in-neighbours s
    # (edge_index = nonzero(adj) = [src, tgt] in the reference).  Graphs of one
    # batch block are packed block-diagonally so attention over the packed rows
    # is exactly the flattened PyG batched graph.
    adjT = (jnp.transpose(adj, (0, 2, 1)) != 0).reshape(NB, Bblk, N, N)
    eye = jnp.eye(Bblk, dtype=jnp.bool_)
    mask = (adjT[:, :, :, None, :] & eye[None, :, None, :, None]).reshape(NB, R, R)
    mask = mask.astype(jnp.int8)

    xf = x.reshape(B * N, H).astype(jnp.float32)

    def stack(name):
        return jnp.stack([jnp.asarray(p[name], jnp.float32) for p in params_list])

    wlr = jnp.concatenate([stack("wl"), stack("wr")], axis=-1).astype(jnp.bfloat16)
    w1 = stack("w1").astype(jnp.bfloat16)
    w2 = stack("w2").astype(jnp.bfloat16)

    def row(v):                       # (L, k) -> (L, 1, W), zero-padded lane axis
        v = v.reshape(L, -1)
        return jnp.pad(v, ((0, 0), (0, W - v.shape[-1])))[:, None, :]

    vecs = jnp.concatenate([
        row(jnp.concatenate([stack("bl"), stack("br")], axis=-1)),   # 0: [bl|br]
        row(stack("att")),                                           # 1: att
        row(stack("gb")),                                            # 2
        row(stack("g1")), row(stack("be1")),                         # 3, 4
        row(stack("b1")), row(stack("b2")),                          # 5, 6
        row(stack("g2")), row(stack("be2")),                         # 7, 8
    ], axis=1)                                                       # (L, 9, W)

    call = make_encoder_call(B, N, H, num_heads, L, ff_mult=ff_mult)
    return call(mask, xf, wlr, w1, w2, vecs).reshape(B, N, H)


if __name__ == "__main__":
    B, N, H = 2, 16, 32
    num_heads, num_layers = 4, 2

    key = jax.random.PRNGKey(0)
    kx, kadj, kp = jax.random.split(key, 3)

    x = jax.random.normal(kx, (B, N, H), jnp.float32)
    adj = (jax.random.uniform(kadj, (B, N, N)) < 0.3).astype(jnp.float32)

    params_list = [init_layer_params(k, H, num_heads)
                   for k in jax.random.split(kp, num_layers)]

    out = graph_transformer_encoder(x, adj, params_list, num_heads)
    out = jax.block_until_ready(out)

    assert out.shape == (B, N, H)
    assert bool(jnp.all(jnp.isfinite(out)))
    print("KERNEL_OK")
</pallas_src>

<mosaic_0001>
module attributes {stable_mosaic.version = 11 : i64} {
  func.func @_encoder_kernel(%arg0: i32, %arg1: i32, %arg2: memref<1x32x32xi8, #tpu.memory_space<vmem>>, %arg3: memref<32x32xf32, #tpu.memory_space<vmem>>, %arg4: memref<2x32x64xbf16, #tpu.memory_space<vmem>>, %arg5: memref<2x32x128xbf16, #tpu.memory_space<vmem>>, %arg6: memref<2x128x32xbf16, #tpu.memory_space<vmem>>, %arg7: memref<2x9x128xf32, #tpu.memory_space<vmem>>, %arg8: memref<32x32xf32, #tpu.memory_space<vmem>>) attributes {dimension_semantics = [#tpu.dimension_semantics<parallel>, #tpu.dimension_semantics<arbitrary>], iteration_bounds = array<i64: 1, 2>, scalar_prefetch = 0 : i64, scratch_operands = 0 : i64, tpu.core_type = #tpu.core_type<tc>, window_params = [{transform_indices = @transform_0, window_bounds = array<i64: 1, 32, 32>}, {transform_indices = @transform_1, window_bounds = array<i64: 32, 32>}, {pipeline_mode = #tpu.pipeline_mode<synchronous>, transform_indices = @transform_2, window_bounds = array<i64: 2, 32, 64>}, {pipeline_mode = #tpu.pipeline_mode<synchronous>, transform_indices = @transform_3, window_bounds = array<i64: 2, 32, 128>}, {pipeline_mode = #tpu.pipeline_mode<synchronous>, transform_indices = @transform_4, window_bounds = array<i64: 2, 128, 32>}, {pipeline_mode = #tpu.pipeline_mode<synchronous>, transform_indices = @transform_5, window_bounds = array<i64: 2, 9, 128>}, {transform_indices = @transform_6, window_bounds = array<i64: 32, 32>}]} {
    %c0_i32 = arith.constant 0 : i32
    %0 = arith.cmpi eq, %arg1, %c0_i32 : i32
    %1 = arith.extui %0 : i1 to i32
    %c0_i32_0 = arith.constant 0 : i32
    %2 = arith.cmpi ne, %1, %c0_i32_0 : i32
    scf.if %2 {
      %c0_100 = arith.constant 0 : index
      %c0_101 = arith.constant 0 : index
      %617 = vector.load %arg3[%c0_100, %c0_101] : memref<32x32xf32, #tpu.memory_space<vmem>>, vector<32x32xf32>
      %c0_102 = arith.constant 0 : index
      %c0_103 = arith.constant 0 : index
      %618 = vector.load %arg8[%c0_102, %c0_103] : memref<32x32xf32, #tpu.memory_space<vmem>>, vector<32x32xf32>
      tpu.vector_store %arg8[%c0_102, %c0_103], %617 {strides = array<i32>} : memref<32x32xf32, #tpu.memory_space<vmem>>, vector<32x32xf32>,
    } else {
    }
    %c0 = arith.constant 0 : index
    %c0_1 = arith.constant 0 : index
    %3 = vector.load %arg8[%c0, %c0_1] : memref<32x32xf32, #tpu.memory_space<vmem>>, vector<32x32xf32>
    %4 = arith.truncf %3 : vector<32x32xf32> to vector<32x32xbf16>
    %5 = arith.index_cast %arg1 : i32 to index
    %c0_2 = arith.constant 0 : index
    %c0_3 = arith.constant 0 : index
    %6 = vector.load %arg7[%5, %c0_2, %c0_3] : memref<2x9x128xf32, #tpu.memory_space<vmem>>, vector<1x9x128xf32>
    %7 = vector.shape_cast %6 : vector<1x9x128xf32> to vector<9x128xf32>
    %8 = vector.extract_strided_slice %7 {offsets = [0, 0], sizes = [1, 64], strides = [1, 1]} : vector<9x128xf32> to vector<1x64xf32>
    %9 = vector.extract_strided_slice %7 {offsets = [1, 0], sizes = [1, 32], strides = [1, 1]} : vector<9x128xf32> to vector<1x32xf32>
    %10 = vector.extract_strided_slice %7 {offsets = [2, 0], sizes = [1, 32], strides = [1, 1]} : vector<9x128xf32> to vector<1x32xf32>
    %11 = vector.extract_strided_slice %7 {offsets = [3, 0], sizes = [1, 32], strides = [1, 1]} : vector<9x128xf32> to vector<1x32xf32>
    %12 = vector.extract_strided_slice %7 {offsets = [4, 0], sizes = [1, 32], strides = [1, 1]} : vector<9x128xf32> to vector<1x32xf32>
    %13 = vector.extract_strided_slice %7 {offsets = [5, 0], sizes = [1, 128], strides = [1, 1]} : vector<9x128xf32> to vector<1x128xf32>
    %14 = vector.extract_strided_slice %7 {offsets = [6, 0], sizes = [1, 32], strides = [1, 1]} : vector<9x128xf32> to vector<1x32xf32>
    %15 = vector.extract_strided_slice %7 {offsets = [7, 0], sizes = [1, 32], strides = [1, 1]} : vector<9x128xf32> to vector<1x32xf32>
    %16 = vector.extract_strided_slice %7 {offsets = [8, 0], sizes = [1, 32], strides = [1, 1]} : vector<9x128xf32> to vector<1x32xf32>
    %17 = arith.index_cast %arg1 : i32 to index
    %c0_4 = arith.constant 0 : index
    %c0_5 = arith.constant 0 : index
    %18 = vector.load %arg4[%17, %c0_4, %c0_5] : memref<2x32x64xbf16, #tpu.memory_space<vmem>>, vector<1x32x64xbf16>
    %19 = vector.shape_cast %18 : vector<1x32x64xbf16> to vector<32x64xbf16>
    %cst = arith.constant dense<0.000000e+00> : vector<32x64xf32>
    %20 = tpu.matmul %4, %19, %cst {dimension_numbers = #tpu.dot_dimension_numbers<[1], [0], [0], [1], [0, 0, 1, 1], [], []>} : vector<32x32xbf16>, vector<32x64xbf16>, vector<32x64xf32> -> vector<32x64xf32>
    %21 = vector.broadcast %8 : vector<1x64xf32> to vector<32x64xf32>
    %22 = arith.addf %20, %21 : vector<32x64xf32>
    %23 = vector.extract_strided_slice %22 {offsets = [0, 0], sizes = [32, 32], strides = [1, 1]} : vector<32x64xf32> to vector<32x32xf32>
    %24 = vector.extract_strided_slice %22 {offsets = [0, 32], sizes = [32, 32], strides = [1, 1]} : vector<32x64xf32> to vector<32x32xf32>
    %25 = arith.truncf %23 : vector<32x32xf32> to vector<32x32xbf16>
    %26 = tpu.transpose %23, [1, 0] : vector<32x32xf32> -> vector<32x32xf32>
    %27 = vector.broadcast %9 : vector<1x32xf32> to vector<32x32xf32>
    %28 = arith.mulf %24, %27 : vector<32x32xf32>
    %29 = vector.broadcast %9 : vector<1x32xf32> to vector<32x32xf32>
    %30 = arith.mulf %23, %29 : vector<32x32xf32>
    %31 = tpu.transpose %30, [1, 0] : vector<32x32xf32> -> vector<32x32xf32>
    %c0_6 = arith.constant 0 : index
    %c0_7 = arith.constant 0 : index
    %c0_8 = arith.constant 0 : index
    %32 = vector.load %arg2[%c0_6, %c0_7, %c0_8] : memref<1x32x32xi8, #tpu.memory_space<vmem>>, vector<1x32x32xi8>
    %33 = vector.shape_cast %32 : vector<1x32x32xi8> to vector<32x32xi8>
    %c0_i8 = arith.constant 0 : i8
    %34 = vector.broadcast %c0_i8 : i8 to vector<32x32xi8>
    %35 = arith.cmpi ne, %33, %34 : vector<32x32xi8>
    %36 = vector.extract_strided_slice %7 {offsets = [1, 0], sizes = [1, 1], strides = [1, 1]} : vector<9x128xf32> to vector<1x1xf32>
    %cst_9 = arith.constant 4.000000e-01 : f32
    %37 = vector.broadcast %cst_9 : f32 to vector<1x1xf32>
    %38 = arith.mulf %37, %36 : vector<1x1xf32>
    %39 = vector.extract_strided_slice %7 {offsets = [1, 1], sizes = [1, 1], strides = [1, 1]} : vector<9x128xf32> to vector<1x1xf32>
    %cst_10 = arith.constant 4.000000e-01 : f32
    %40 = vector.broadcast %cst_10 : f32 to vector<1x1xf32>
    %41 = arith.mulf %40, %39 : vector<1x1xf32>
    %42 = vector.extract_strided_slice %7 {offsets = [1, 2], sizes = [1, 1], strides = [1, 1]} : vector<9x128xf32> to vector<1x1xf32>
    %cst_11 = arith.constant 4.000000e-01 : f32
    %43 = vector.broadcast %cst_11 : f32 to vector<1x1xf32>
    %44 = arith.mulf %43, %42 : vector<1x1xf32>
    %45 = vector.extract_strided_slice %7 {offsets = [1, 3], sizes = [1, 1], strides = [1, 1]} : vector<9x128xf32> to vector<1x1xf32>
    %cst_12 = arith.constant 4.000000e-01 : f32
    %46 = vector.broadcast %cst_12 : f32 to vector<1x1xf32>
    %47 = arith.mulf %46, %45 : vector<1x1xf32>
    %48 = vector.extract_strided_slice %7 {offsets = [1, 4], sizes = [1, 1], strides = [1, 1]} : vector<9x128xf32> to vector<1x1xf32>
    %cst_13 = arith.constant 4.000000e-01 : f32
    %49 = vector.broadcast %cst_13 : f32 to vector<1x1xf32>
    %50 = arith.mulf %49, %48 : vector<1x1xf32>
    %51 = vector.extract_strided_slice %7 {offsets = [1, 5], sizes = [1, 1], strides = [1, 1]} : vector<9x128xf32> to vector<1x1xf32>
    %cst_14 = arith.constant 4.000000e-01 : f32
    %52 = vector.broadcast %cst_14 : f32 to vector<1x1xf32>
    %53 = arith.mulf %52, %51 : vector<1x1xf32>
    %54 = vector.extract_strided_slice %7 {offsets = [1, 6], sizes = [1, 1], strides = [1, 1]} : vector<9x128xf32> to vector<1x1xf32>
    %cst_15 = arith.constant 4.000000e-01 : f32
    %55 = vector.broadcast %cst_15 : f32 to vector<1x1xf32>
    %56 = arith.mulf %55, %54 : vector<1x1xf32>
    %57 = vector.extract_strided_slice %7 {offsets = [1, 7], sizes = [1, 1], strides = [1, 1]} : vector<9x128xf32> to vector<1x1xf32>
    %cst_16 = arith.constant 4.000000e-01 : f32
    %58 = vector.broadcast %cst_16 : f32 to vector<1x1xf32>
    %59 = arith.mulf %58, %57 : vector<1x1xf32>
    %60 = vector.extract_strided_slice %7 {offsets = [1, 8], sizes = [1, 1], strides = [1, 1]} : vector<9x128xf32> to vector<1x1xf32>
    %cst_17 = arith.constant 4.000000e-01 : f32
    %61 = vector.broadcast %cst_17 : f32 to vector<1x1xf32>
    %62 = arith.mulf %61, %60 : vector<1x1xf32>
    %63 = vector.extract_strided_slice %7 {offsets = [1, 9], sizes = [1, 1], strides = [1, 1]} : vector<9x128xf32> to vector<1x1xf32>
    %cst_18 = arith.constant 4.000000e-01 : f32
    %64 = vector.broadcast %cst_18 : f32 to vector<1x1xf32>
    %65 = arith.mulf %64, %63 : vector<1x1xf32>
    %66 = vector.extract_strided_slice %7 {offsets = [1, 10], sizes = [1, 1], strides = [1, 1]} : vector<9x128xf32> to vector<1x1xf32>
    %cst_19 = arith.constant 4.000000e-01 : f32
    %67 = vector.broadcast %cst_19 : f32 to vector<1x1xf32>
    %68 = arith.mulf %67, %66 : vector<1x1xf32>
    %69 = vector.extract_strided_slice %7 {offsets = [1, 11], sizes = [1, 1], strides = [1, 1]} : vector<9x128xf32> to vector<1x1xf32>
    %cst_20 = arith.constant 4.000000e-01 : f32
    %70 = vector.broadcast %cst_20 : f32 to vector<1x1xf32>
    %71 = arith.mulf %70, %69 : vector<1x1xf32>
    %72 = vector.extract_strided_slice %7 {offsets = [1, 12], sizes = [1, 1], strides = [1, 1]} : vector<9x128xf32> to vector<1x1xf32>
    %cst_21 = arith.constant 4.000000e-01 : f32
    %73 = vector.broadcast %cst_21 : f32 to vector<1x1xf32>
    %74 = arith.mulf %73, %72 : vector<1x1xf32>
    %75 = vector.extract_strided_slice %7 {offsets = [1, 13], sizes = [1, 1], strides = [1, 1]} : vector<9x128xf32> to vector<1x1xf32>
    %cst_22 = arith.constant 4.000000e-01 : f32
    %76 = vector.broadcast %cst_22 : f32 to vector<1x1xf32>
    %77 = arith.mulf %76, %75 : vector<1x1xf32>
    %78 = vector.extract_strided_slice %7 {offsets = [1, 14], sizes = [1, 1], strides = [1, 1]} : vector<9x128xf32> to vector<1x1xf32>
    %cst_23 = arith.constant 4.000000e-01 : f32
    %79 = vector.broadcast %cst_23 : f32 to vector<1x1xf32>
    %80 = arith.mulf %79, %78 : vector<1x1xf32>
    %81 = vector.extract_strided_slice %7 {offsets = [1, 15], sizes = [1, 1], strides = [1, 1]} : vector<9x128xf32> to vector<1x1xf32>
    %cst_24 = arith.constant 4.000000e-01 : f32
    %82 = vector.broadcast %cst_24 : f32 to vector<1x1xf32>
    %83 = arith.mulf %82, %81 : vector<1x1xf32>
    %84 = vector.extract_strided_slice %7 {offsets = [1, 16], sizes = [1, 1], strides = [1, 1]} : vector<9x128xf32> to vector<1x1xf32>
    %cst_25 = arith.constant 4.000000e-01 : f32
    %85 = vector.broadcast %cst_25 : f32 to vector<1x1xf32>
    %86 = arith.mulf %85, %84 : vector<1x1xf32>
    %87 = vector.extract_strided_slice %7 {offsets = [1, 17], sizes = [1, 1], strides = [1, 1]} : vector<9x128xf32> to vector<1x1xf32>
    %cst_26 = arith.constant 4.000000e-01 : f32
    %88 = vector.broadcast %cst_26 : f32 to vector<1x1xf32>
    %89 = arith.mulf %88, %87 : vector<1x1xf32>
    %90 = vector.extract_strided_slice %7 {offsets = [1, 18], sizes = [1, 1], strides = [1, 1]} : vector<9x128xf32> to vector<1x1xf32>
    %cst_27 = arith.constant 4.000000e-01 : f32
    %91 = vector.broadcast %cst_27 : f32 to vector<1x1xf32>
    %92 = arith.mulf %91, %90 : vector<1x1xf32>
    %93 = vector.extract_strided_slice %7 {offsets = [1, 19], sizes = [1, 1], strides = [1, 1]} : vector<9x128xf32> to vector<1x1xf32>
    %cst_28 = arith.constant 4.000000e-01 : f32
    %94 = vector.broadcast %cst_28 : f32 to vector<1x1xf32>
    %95 = arith.mulf %94, %93 : vector<1x1xf32>
    %96 = vector.extract_strided_slice %7 {offsets = [1, 20], sizes = [1, 1], strides = [1, 1]} : vector<9x128xf32> to vector<1x1xf32>
    %cst_29 = arith.constant 4.000000e-01 : f32
    %97 = vector.broadcast %cst_29 : f32 to vector<1x1xf32>
    %98 = arith.mulf %97, %96 : vector<1x1xf32>
    %99 = vector.extract_strided_slice %7 {offsets = [1, 21], sizes = [1, 1], strides = [1, 1]} : vector<9x128xf32> to vector<1x1xf32>
    %cst_30 = arith.constant 4.000000e-01 : f32
    %100 = vector.broadcast %cst_30 : f32 to vector<1x1xf32>
    %101 = arith.mulf %100, %99 : vector<1x1xf32>
    %102 = vector.extract_strided_slice %7 {offsets = [1, 22], sizes = [1, 1], strides = [1, 1]} : vector<9x128xf32> to vector<1x1xf32>
    %cst_31 = arith.constant 4.000000e-01 : f32
    %103 = vector.broadcast %cst_31 : f32 to vector<1x1xf32>
    %104 = arith.mulf %103, %102 : vector<1x1xf32>
    %105 = vector.extract_strided_slice %7 {offsets = [1, 23], sizes = [1, 1], strides = [1, 1]} : vector<9x128xf32> to vector<1x1xf32>
    %cst_32 = arith.constant 4.000000e-01 : f32
    %106 = vector.broadcast %cst_32 : f32 to vector<1x1xf32>
    %107 = arith.mulf %106, %105 : vector<1x1xf32>
    %108 = vector.extract_strided_slice %7 {offsets = [1, 24], sizes = [1, 1], strides = [1, 1]} : vector<9x128xf32> to vector<1x1xf32>
    %cst_33 = arith.constant 4.000000e-01 : f32
    %109 = vector.broadcast %cst_33 : f32 to vector<1x1xf32>
    %110 = arith.mulf %109, %108 : vector<1x1xf32>
    %111 = vector.extract_strided_slice %7 {offsets = [1, 25], sizes = [1, 1], strides = [1, 1]} : vector<9x128xf32> to vector<1x1xf32>
    %cst_34 = arith.constant 4.000000e-01 : f32
    %112 = vector.broadcast %cst_34 : f32 to vector<1x1xf32>
    %113 = arith.mulf %112, %111 : vector<1x1xf32>
    %114 = vector.extract_strided_slice %7 {offsets = [1, 26], sizes = [1, 1], strides = [1, 1]} : vector<9x128xf32> to vector<1x1xf32>
    %cst_35 = arith.constant 4.000000e-01 : f32
    %115 = vector.broadcast %cst_35 : f32 to vector<1x1xf32>
    %116 = arith.mulf %115, %114 : vector<1x1xf32>
    %117 = vector.extract_strided_slice %7 {offsets = [1, 27], sizes = [1, 1], strides = [1, 1]} : vector<9x128xf32> to vector<1x1xf32>
    %cst_36 = arith.constant 4.000000e-01 : f32
    %118 = vector.broadcast %cst_36 : f32 to vector<1x1xf32>
    %119 = arith.mulf %118, %117 : vector<1x1xf32>
    %120 = vector.extract_strided_slice %7 {offsets = [1, 28], sizes = [1, 1], strides = [1, 1]} : vector<9x128xf32> to vector<1x1xf32>
    %cst_37 = arith.constant 4.000000e-01 : f32
    %121 = vector.broadcast %cst_37 : f32 to vector<1x1xf32>
    %122 = arith.mulf %121, %120 : vector<1x1xf32>
    %123 = vector.extract_strided_slice %7 {offsets = [1, 29], sizes = [1, 1], strides = [1, 1]} : vector<9x128xf32> to vector<1x1xf32>
    %cst_38 = arith.constant 4.000000e-01 : f32
    %124 = vector.broadcast %cst_38 : f32 to vector<1x1xf32>
    %125 = arith.mulf %124, %123 : vector<1x1xf32>
    %126 = vector.extract_strided_slice %7 {offsets = [1, 30], sizes = [1, 1], strides = [1, 1]} : vector<9x128xf32> to vector<1x1xf32>
    %cst_39 = arith.constant 4.000000e-01 : f32
    %127 = vector.broadcast %cst_39 : f32 to vector<1x1xf32>
    %128 = arith.mulf %127, %126 : vector<1x1xf32>
    %129 = vector.extract_strided_slice %7 {offsets = [1, 31], sizes = [1, 1], strides = [1, 1]} : vector<9x128xf32> to vector<1x1xf32>
    %cst_40 = arith.constant 4.000000e-01 : f32
    %130 = vector.broadcast %cst_40 : f32 to vector<1x1xf32>
    %131 = arith.mulf %130, %129 : vector<1x1xf32>
    %132 = vector.extract_strided_slice %28 {offsets = [0, 0], sizes = [32, 8], strides = [1, 1]} : vector<32x32xf32> to vector<32x8xf32>
    %cst_41 = arith.constant dense<0.000000e+00> : vector<32xf32>
    %133 = vector.multi_reduction <add>, %132, %cst_41 [1] : vector<32x8xf32> to vector<32xf32>
    %134 = vector.shape_cast %133 : vector<32xf32> to vector<32x1xf32>
    %135 = vector.extract_strided_slice %31 {offsets = [0, 0], sizes = [8, 32], strides = [1, 1]} : vector<32x32xf32> to vector<8x32xf32>
    %cst_42 = arith.constant dense<0.000000e+00> : vector<32xf32>
    %136 = vector.multi_reduction <add>, %135, %cst_42 [0] : vector<8x32xf32> to vector<32xf32>
    %137 = vector.shape_cast %136 : vector<32xf32> to vector<1x32xf32>
    %138 = vector.broadcast %134 : vector<32x1xf32> to vector<32x32xf32>
    %139 = vector.broadcast %137 : vector<1x32xf32> to vector<32x32xf32>
    %140 = arith.addf %138, %139 : vector<32x32xf32>
    %cst_43 = arith.constant 6.000000e-01 : f32
    %141 = vector.broadcast %cst_43 : f32 to vector<32x32xf32>
    %142 = arith.mulf %141, %140 : vector<32x32xf32>
    %143 = vector.extract_strided_slice %24 {offsets = [0, 0], sizes = [32, 1], strides = [1, 1]} : vector<32x32xf32> to vector<32x1xf32>
    %144 = vector.extract_strided_slice %26 {offsets = [0, 0], sizes = [1, 32], strides = [1, 1]} : vector<32x32xf32> to vector<1x32xf32>
    %145 = vector.broadcast %143 : vector<32x1xf32> to vector<32x32xf32>
    %146 = vector.broadcast %144 : vector<1x32xf32> to vector<32x32xf32>
    %147 = arith.addf %145, %146 : vector<32x32xf32>
    %148 = math.absf %147 : vector<32x32xf32>
    %149 = vector.broadcast %38 : vector<1x1xf32> to vector<32x32xf32>
    %150 = arith.mulf %149, %148 : vector<32x32xf32>
    %151 = arith.addf %142, %150 : vector<32x32xf32>
    %152 = vector.extract_strided_slice %24 {offsets = [0, 1], sizes = [32, 1], strides = [1, 1]} : vector<32x32xf32> to vector<32x1xf32>
    %153 = vector.extract_strided_slice %26 {offsets = [1, 0], sizes = [1, 32], strides = [1, 1]} : vector<32x32xf32> to vector<1x32xf32>
    %154 = vector.broadcast %152 : vector<32x1xf32> to vector<32x32xf32>
    %155 = vector.broadcast %153 : vector<1x32xf32> to vector<32x32xf32>
    %156 = arith.addf %154, %155 : vector<32x32xf32>
    %157 = math.absf %156 : vector<32x32xf32>
    %158 = vector.broadcast %41 : vector<1x1xf32> to vector<32x32xf32>
    %159 = arith.mulf %158, %157 : vector<32x32xf32>
    %160 = arith.addf %151, %159 : vector<32x32xf32>
    %161 = vector.extract_strided_slice %24 {offsets = [0, 2], sizes = [32, 1], strides = [1, 1]} : vector<32x32xf32> to vector<32x1xf32>
    %162 = vector.extract_strided_slice %26 {offsets = [2, 0], sizes = [1, 32], strides = [1, 1]} : vector<32x32xf32> to vector<1x32xf32>
    %163 = vector.broadcast %161 : vector<32x1xf32> to vector<32x32xf32>
    %164 = vector.broadcast %162 : vector<1x32xf32> to vector<32x32xf32>
    %165 = arith.addf %163, %164 : vector<32x32xf32>
    %166 = math.absf %165 : vector<32x32xf32>
    %167 = vector.broadcast %44 : vector<1x1xf32> to vector<32x32xf32>
    %168 = arith.mulf %167, %166 : vector<32x32xf32>
    %169 = arith.addf %160, %168 : vector<32x32xf32>
    %170 = vector.extract_strided_slice %24 {offsets = [0, 3], sizes = [32, 1], strides = [1, 1]} : vector<32x32xf32> to vector<32x1xf32>
    %171 = vector.extract_strided_slice %26 {offsets = [3, 0], sizes = [1, 32], strides = [1, 1]} : vector<32x32xf32> to vector<1x32xf32>
    %172 = vector.broadcast %170 : vector<32x1xf32> to vector<32x32xf32>
    %173 = vector.broadcast %171 : vector<1x32xf32> to vector<32x32xf32>
    %174 = arith.addf %172, %173 : vector<32x32xf32>
    %175 = math.absf %174 : vector<32x32xf32>
    %176 = vector.broadcast %47 : vector<1x1xf32> to vector<32x32xf32>
    %177 = arith.mulf %176, %175 : vector<32x32xf32>
    %178 = arith.addf %169, %177 : vector<32x32xf32>
    %179 = vector.extract_strided_slice %24 {offsets = [0, 4], sizes = [32, 1], strides = [1, 1]} : vector<32x32xf32> to vector<32x1xf32>
    %180 = vector.extract_strided_slice %26 {offsets = [4, 0], sizes = [1, 32], strides = [1, 1]} : vector<32x32xf32> to vector<1x32xf32>
    %181 = vector.broadcast %179 : vector<32x1xf32> to vector<32x32xf32>
    %182 = vector.broadcast %180 : vector<1x32xf32> to vector<32x32xf32>
    %183 = arith.addf %181, %182 : vector<32x32xf32>
    %184 = math.absf %183 : vector<32x32xf32>
    %185 = vector.broadcast %50 : vector<1x1xf32> to vector<32x32xf32>
    %186 = arith.mulf %185, %184 : vector<32x32xf32>
    %187 = arith.addf %178, %186 : vector<32x32xf32>
    %188 = vector.extract_strided_slice %24 {offsets = [0, 5], sizes = [32, 1], strides = [1, 1]} : vector<32x32xf32> to vector<32x1xf32>
    %189 = vector.extract_strided_slice %26 {offsets = [5, 0], sizes = [1, 32], strides = [1, 1]} : vector<32x32xf32> to vector<1x32xf32>
    %190 = vector.broadcast %188 : vector<32x1xf32> to vector<32x32xf32>
    %191 = vector.broadcast %189 : vector<1x32xf32> to vector<32x32xf32>
    %192 = arith.addf %190, %191 : vector<32x32xf32>
    %193 = math.absf %192 : vector<32x32xf32>
    %194 = vector.broadcast %53 : vector<1x1xf32> to vector<32x32xf32>
    %195 = arith.mulf %194, %193 : vector<32x32xf32>
    %196 = arith.addf %187, %195 : vector<32x32xf32>
    %197 = vector.extract_strided_slice %24 {offsets = [0, 6], sizes = [32, 1], strides = [1, 1]} : vector<32x32xf32> to vector<32x1xf32>
    %198 = vector.extract_strided_slice %26 {offsets = [6, 0], sizes = [1, 32], strides = [1, 1]} : vector<32x32xf32> to vector<1x32xf32>
    %199 = vector.broadcast %197 : vector<32x1xf32> to vector<32x32xf32>
    %200 = vector.broadcast %198 : vector<1x32xf32> to vector<32x32xf32>
    %201 = arith.addf %199, %200 : vector<32x32xf32>
    %202 = math.absf %201 : vector<32x32xf32>
    %203 = vector.broadcast %56 : vector<1x1xf32> to vector<32x32xf32>
    %204 = arith.mulf %203, %202 : vector<32x32xf32>
    %205 = arith.addf %196, %204 : vector<32x32xf32>
    %206 = vector.extract_strided_slice %24 {offsets = [0, 7], sizes = [32, 1], strides = [1, 1]} : vector<32x32xf32> to vector<32x1xf32>
    %207 = vector.extract_strided_slice %26 {offsets = [7, 0], sizes = [1, 32], strides = [1, 1]} : vector<32x32xf32> to vector<1x32xf32>
    %208 = vector.broadcast %206 : vector<32x1xf32> to vector<32x32xf32>
    %209 = vector.broadcast %207 : vector<1x32xf32> to vector<32x32xf32>
    %210 = arith.addf %208, %209 : vector<32x32xf32>
    %211 = math.absf %210 : vector<32x32xf32>
    %212 = vector.broadcast %59 : vector<1x1xf32> to vector<32x32xf32>
    %213 = arith.mulf %212, %211 : vector<32x32xf32>
    %214 = arith.addf %205, %213 : vector<32x32xf32>
    %cst_44 = arith.constant -1.000000e+30 : f32
    %215 = vector.broadcast %cst_44 : f32 to vector<32x32xf32>
    %216 = arith.select %35, %214, %215 : vector<32x32xi1>, vector<32x32xf32>
    %cst_45 = arith.constant dense<0xFF800000> : vector<32xf32>
    %217 = vector.multi_reduction <maximumf>, %216, %cst_45 [1] : vector<32x32xf32> to vector<32xf32>
    %218 = vector.shape_cast %217 : vector<32xf32> to vector<32x1xf32>
    %219 = vector.broadcast %218 : vector<32x1xf32> to vector<32x32xf32>
    %220 = arith.subf %216, %219 : vector<32x32xf32>
    %221 = math.exp %220 : vector<32x32xf32>
    %cst_46 = arith.constant 0.000000e+00 : f32
    %222 = vector.broadcast %cst_46 : f32 to vector<32x32xf32>
    %223 = arith.select %35, %221, %222 : vector<32x32xi1>, vector<32x32xf32>
    %cst_47 = arith.constant dense<0.000000e+00> : vector<32xf32>
    %224 = vector.multi_reduction <add>, %223, %cst_47 [1] : vector<32x32xf32> to vector<32xf32>
    %225 = vector.shape_cast %224 : vector<32xf32> to vector<32x1xf32>
    %cst_48 = arith.constant 0.000000e+00 : f32
    %226 = vector.broadcast %cst_48 : f32 to vector<32x1xf32>
    %227 = arith.cmpf ogt, %225, %226 : vector<32x1xf32>
    %cst_49 = arith.constant 1.000000e+00 : f32
    %228 = vector.broadcast %cst_49 : f32 to vector<32x1xf32>
    %229 = arith.select %227, %225, %228 : vector<32x1xi1>, vector<32x1xf32>
    %230 = tpu.reciprocal %229 {approx = true} : vector<32x1xf32> -> vector<32x1xf32>
    %231 = vector.broadcast %230 : vector<32x1xf32> to vector<32x32xf32>
    %232 = arith.mulf %223, %231 : vector<32x32xf32>
    %233 = arith.truncf %232 : vector<32x32xf32> to vector<32x32xbf16>
    %234 = vector.extract_strided_slice %25 {offsets = [0, 0], sizes = [32, 8], strides = [1, 1]} : vector<32x32xbf16> to vector<32x8xbf16>
    %cst_50 = arith.constant dense<0.000000e+00> : vector<32x8xf32>
    %235 = tpu.matmul %233, %234, %cst_50 {dimension_numbers = #tpu.dot_dimension_numbers<[1], [0], [0], [1], [0, 0, 1, 1], [], []>} : vector<32x32xbf16>, vector<32x8xbf16>, vector<32x8xf32> -> vector<32x8xf32>
    %236 = vector.extract_strided_slice %28 {offsets = [0, 8], sizes = [32, 8], strides = [1, 1]} : vector<32x32xf32> to vector<32x8xf32>
    %cst_51 = arith.constant dense<0.000000e+00> : vector<32xf32>
    %237 = vector.multi_reduction <add>, %236, %cst_51 [1] : vector<32x8xf32> to vector<32xf32>
    %238 = vector.shape_cast %237 : vector<32xf32> to vector<32x1xf32>
    %239 = vector.extract_strided_slice %31 {offsets = [8, 0], sizes = [8, 32], strides = [1, 1]} : vector<32x32xf32> to vector<8x32xf32>
    %cst_52 = arith.constant dense<0.000000e+00> : vector<32xf32>
    %240 = vector.multi_reduction <add>, %239, %cst_52 [0] : vector<8x32xf32> to vector<32xf32>
    %241 = vector.shape_cast %240 : vector<32xf32> to vector<1x32xf32>
    %242 = vector.broadcast %238 : vector<32x1xf32> to vector<32x32xf32>
    %243 = vector.broadcast %241 : vector<1x32xf32> to vector<32x32xf32>
    %244 = arith.addf %242, %243 : vector<32x32xf32>
    %cst_53 = arith.constant 6.000000e-01 : f32
    %245 = vector.broadcast %cst_53 : f32 to vector<32x32xf32>
    %246 = arith.mulf %245, %244 : vector<32x32xf32>
    %247 = vector.extract_strided_slice %24 {offsets = [0, 8], sizes = [32, 1], strides = [1, 1]} : vector<32x32xf32> to vector<32x1xf32>
    %248 = vector.extract_strided_slice %26 {offsets = [8, 0], sizes = [1, 32], strides = [1, 1]} : vector<32x32xf32> to vector<1x32xf32>
    %249 = vector.broadcast %247 : vector<32x1xf32> to vector<32x32xf32>
    %250 = vector.broadcast %248 : vector<1x32xf32> to vector<32x32xf32>
    %251 = arith.addf %249, %250 : vector<32x32xf32>
    %252 = math.absf %251 : vector<32x32xf32>
    %253 = vector.broadcast %62 : vector<1x1xf32> to vector<32x32xf32>
    %254 = arith.mulf %253, %252 : vector<32x32xf32>
    %255 = arith.addf %246, %254 : vector<32x32xf32>
    %256 = vector.extract_strided_slice %24 {offsets = [0, 9], sizes = [32, 1], strides = [1, 1]} : vector<32x32xf32> to vector<32x1xf32>
    %257 = vector.extract_strided_slice %26 {offsets = [9, 0], sizes = [1, 32], strides = [1, 1]} : vector<32x32xf32> to vector<1x32xf32>
    %258 = vector.broadcast %256 : vector<32x1xf32> to vector<32x32xf32>
    %259 = vector.broadcast %257 : vector<1x32xf32> to vector<32x32xf32>
    %260 = arith.addf %258, %259 : vector<32x32xf32>
    %261 = math.absf %260 : vector<32x32xf32>
    %262 = vector.broadcast %65 : vector<1x1xf32> to vector<32x32xf32>
    %263 = arith.mulf %262, %261 : vector<32x32xf32>
    %264 = arith.addf %255, %263 : vector<32x32xf32>
    %265 = vector.extract_strided_slice %24 {offsets = [0, 10], sizes = [32, 1], strides = [1, 1]} : vector<32x32xf32> to vector<32x1xf32>
    %266 = vector.extract_strided_slice %26 {offsets = [10, 0], sizes = [1, 32], strides = [1, 1]} : vector<32x32xf32> to vector<1x32xf32>
    %267 = vector.broadcast %265 : vector<32x1xf32> to vector<32x32xf32>
    %268 = vector.broadcast %266 : vector<1x32xf32> to vector<32x32xf32>
    %269 = arith.addf %267, %268 : vector<32x32xf32>
    %270 = math.absf %269 : vector<32x32xf32>
    %271 = vector.broadcast %68 : vector<1x1xf32> to vector<32x32xf32>
    %272 = arith.mulf %271, %270 : vector<32x32xf32>
    %273 = arith.addf %264, %272 : vector<32x32xf32>
    %274 = vector.extract_strided_slice %24 {offsets = [0, 11], sizes = [32, 1], strides = [1, 1]} : vector<32x32xf32> to vector<32x1xf32>
    %275 = vector.extract_strided_slice %26 {offsets = [11, 0], sizes = [1, 32], strides = [1, 1]} : vector<32x32xf32> to vector<1x32xf32>
    %276 = vector.broadcast %274 : vector<32x1xf32> to vector<32x32xf32>
    %277 = vector.broadcast %275 : vector<1x32xf32> to vector<32x32xf32>
    %278 = arith.addf %276, %277 : vector<32x32xf32>
    %279 = math.absf %278 : vector<32x32xf32>
    %280 = vector.broadcast %71 : vector<1x1xf32> to vector<32x32xf32>
    %281 = arith.mulf %280, %279 : vector<32x32xf32>
    %282 = arith.addf %273, %281 : vector<32x32xf32>
    %283 = vector.extract_strided_slice %24 {offsets = [0, 12], sizes = [32, 1], strides = [1, 1]} : vector<32x32xf32> to vector<32x1xf32>
    %284 = vector.extract_strided_slice %26 {offsets = [12, 0], sizes = [1, 32], strides = [1, 1]} : vector<32x32xf32> to vector<1x32xf32>
    %285 = vector.broadcast %283 : vector<32x1xf32> to vector<32x32xf32>
    %286 = vector.broadcast %284 : vector<1x32xf32> to vector<32x32xf32>
    %287 = arith.addf %285, %286 : vector<32x32xf32>
    %288 = math.absf %287 : vector<32x32xf32>
    %289 = vector.broadcast %74 : vector<1x1xf32> to vector<32x32xf32>
    %290 = arith.mulf %289, %288 : vector<32x32xf32>
    %291 = arith.addf %282, %290 : vector<32x32xf32>
    %292 = vector.extract_strided_slice %24 {offsets = [0, 13], sizes = [32, 1], strides = [1, 1]} : vector<32x32xf32> to vector<32x1xf32>
    %293 = vector.extract_strided_slice %26 {offsets = [13, 0], sizes = [1, 32], strides = [1, 1]} : vector<32x32xf32> to vector<1x32xf32>
    %294 = vector.broadcast %292 : vector<32x1xf32> to vector<32x32xf32>
    %295 = vector.broadcast %293 : vector<1x32xf32> to vector<32x32xf32>
    %296 = arith.addf %294, %295 : vector<32x32xf32>
    %297 = math.absf %296 : vector<32x32xf32>
    %298 = vector.broadcast %77 : vector<1x1xf32> to vector<32x32xf32>
    %299 = arith.mulf %298, %297 : vector<32x32xf32>
    %300 = arith.addf %291, %299 : vector<32x32xf32>
    %301 = vector.extract_strided_slice %24 {offsets = [0, 14], sizes = [32, 1], strides = [1, 1]} : vector<32x32xf32> to vector<32x1xf32>
    %302 = vector.extract_strided_slice %26 {offsets = [14, 0], sizes = [1, 32], strides = [1, 1]} : vector<32x32xf32> to vector<1x32xf32>
    %303 = vector.broadcast %301 : vector<32x1xf32> to vector<32x32xf32>
    %304 = vector.broadcast %302 : vector<1x32xf32> to vector<32x32xf32>
    %305 = arith.addf %303, %304 : vector<32x32xf32>
    %306 = math.absf %305 : vector<32x32xf32>
    %307 = vector.broadcast %80 : vector<1x1xf32> to vector<32x32xf32>
    %308 = arith.mulf %307, %306 : vector<32x32xf32>
    %309 = arith.addf %300, %308 : vector<32x32xf32>
    %310 = vector.extract_strided_slice %24 {offsets = [0, 15], sizes = [32, 1], strides = [1, 1]} : vector<32x32xf32> to vector<32x1xf32>
    %311 = vector.extract_strided_slice %26 {offsets = [15, 0], sizes = [1, 32], strides = [1, 1]} : vector<32x32xf32> to vector<1x32xf32>
    %312 = vector.broadcast %310 : vector<32x1xf32> to vector<32x32xf32>
    %313 = vector.broadcast %311 : vector<1x32xf32> to vector<32x32xf32>
    %314 = arith.addf %312, %313 : vector<32x32xf32>
    %315 = math.absf %314 : vector<32x32xf32>
    %316 = vector.broadcast %83 : vector<1x1xf32> to vector<32x32xf32>
    %317 = arith.mulf %316, %315 : vector<32x32xf32>
    %318 = arith.addf %309, %317 : vector<32x32xf32>
    %cst_54 = arith.constant -1.000000e+30 : f32
    %319 = vector.broadcast %cst_54 : f32 to vector<32x32xf32>
    %320 = arith.select %35, %318, %319 : vector<32x32xi1>, vector<32x32xf32>
    %cst_55 = arith.constant dense<0xFF800000> : vector<32xf32>
    %321 = vector.multi_reduction <maximumf>, %320, %cst_55 [1] : vector<32x32xf32> to vector<32xf32>
    %322 = vector.shape_cast %321 : vector<32xf32> to vector<32x1xf32>
    %323 = vector.broadcast %322 : vector<32x1xf32> to vector<32x32xf32>
    %324 = arith.subf %320, %323 : vector<32x32xf32>
    %325 = math.exp %324 : vector<32x32xf32>
    %cst_56 = arith.constant 0.000000e+00 : f32
    %326 = vector.broadcast %cst_56 : f32 to vector<32x32xf32>
    %327 = arith.select %35, %325, %326 : vector<32x32xi1>, vector<32x32xf32>
    %cst_57 = arith.constant dense<0.000000e+00> : vector<32xf32>
    %328 = vector.multi_reduction <add>, %327, %cst_57 [1] : vector<32x32xf32> to vector<32xf32>
    %329 = vector.shape_cast %328 : vector<32xf32> to vector<32x1xf32>
    %cst_58 = arith.constant 0.000000e+00 : f32
    %330 = vector.broadcast %cst_58 : f32 to vector<32x1xf32>
    %331 = arith.cmpf ogt, %329, %330 : vector<32x1xf32>
    %cst_59 = arith.constant 1.000000e+00 : f32
    %332 = vector.broadcast %cst_59 : f32 to vector<32x1xf32>
    %333 = arith.select %331, %329, %332 : vector<32x1xi1>, vector<32x1xf32>
    %334 = tpu.reciprocal %333 {approx = true} : vector<32x1xf32> -> vector<32x1xf32>
    %335 = vector.broadcast %334 : vector<32x1xf32> to vector<32x32xf32>
    %336 = arith.mulf %327, %335 : vector<32x32xf32>
    %337 = arith.truncf %336 : vector<32x32xf32> to vector<32x32xbf16>
    %338 = vector.extract_strided_slice %25 {offsets = [0, 8], sizes = [32, 8], strides = [1, 1]} : vector<32x32xbf16> to vector<32x8xbf16>
    %cst_60 = arith.constant dense<0.000000e+00> : vector<32x8xf32>
    %339 = tpu.matmul %337, %338, %cst_60 {dimension_numbers = #tpu.dot_dimension_numbers<[1], [0], [0], [1], [0, 0, 1, 1], [], []>} : vector<32x32xbf16>, vector<32x8xbf16>, vector<32x8xf32> -> vector<32x8xf32>
    %340 = vector.extract_strided_slice %28 {offsets = [0, 16], sizes = [32, 8], strides = [1, 1]} : vector<32x32xf32> to vector<32x8xf32>
    %cst_61 = arith.constant dense<0.000000e+00> : vector<32xf32>
    %341 = vector.multi_reduction <add>, %340, %cst_61 [1] : vector<32x8xf32> to vector<32xf32>
    %342 = vector.shape_cast %341 : vector<32xf32> to vector<32x1xf32>
    %343 = vector.extract_strided_slice %31 {offsets = [16, 0], sizes = [8, 32], strides = [1, 1]} : vector<32x32xf32> to vector<8x32xf32>
    %cst_62 = arith.constant dense<0.000000e+00> : vector<32xf32>
    %344 = vector.multi_reduction <add>, %343, %cst_62 [0] : vector<8x32xf32> to vector<32xf32>
    %345 = vector.shape_cast %344 : vector<32xf32> to vector<1x32xf32>
    %346 = vector.broadcast %342 : vector<32x1xf32> to vector<32x32xf32>
    %347 = vector.broadcast %345 : vector<1x32xf32> to vector<32x32xf32>
    %348 = arith.addf %346, %347 : vector<32x32xf32>
    %cst_63 = arith.constant 6.000000e-01 : f32
    %349 = vector.broadcast %cst_63 : f32 to vector<32x32xf32>
    %350 = arith.mulf %349, %348 : vector<32x32xf32>
    %351 = vector.extract_strided_slice %24 {offsets = [0, 16], sizes = [32, 1], strides = [1, 1]} : vector<32x32xf32> to vector<32x1xf32>
    %352 = vector.extract_strided_slice %26 {offsets = [16, 0], sizes = [1, 32], strides = [1, 1]} : vector<32x32xf32> to vector<1x32xf32>
    %353 = vector.broadcast %351 : vector<32x1xf32> to vector<32x32xf32>
    %354 = vector.broadcast %352 : vector<1x32xf32> to vector<32x32xf32>
    %355 = arith.addf %353, %354 : vector<32x32xf32>
    %356 = math.absf %355 : vector<32x32xf32>
    %357 = vector.broadcast %86 : vector<1x1xf32> to vector<32x32xf32>
    %358 = arith.mulf %357, %356 : vector<32x32xf32>
    %359 = arith.addf %350, %358 : vector<32x32xf32>
    %360 = vector.extract_strided_slice %24 {offsets = [0, 17], sizes = [32, 1], strides = [1, 1]} : vector<32x32xf32> to vector<32x1xf32>
    %361 = vector.extract_strided_slice %26 {offsets = [17, 0], sizes = [1, 32], strides = [1, 1]} : vector<32x32xf32> to vector<1x32xf32>
    %362 = vector.broadcast %360 : vector<32x1xf32> to vector<32x32xf32>
    %363 = vector.broadcast %361 : vector<1x32xf32> to vector<32x32xf32>
    %364 = arith.addf %362, %363 : vector<32x32xf32>
    %365 = math.absf %364 : vector<32x32xf32>
    %366 = vector.broadcast %89 : vector<1x1xf32> to vector<32x32xf32>
    %367 = arith.mulf %366, %365 : vector<32x32xf32>
    %368 = arith.addf %359, %367 : vector<32x32xf32>
    %369 = vector.extract_strided_slice %24 {offsets = [0, 18], sizes = [32, 1], strides = [1, 1]} : vector<32x32xf32> to vector<32x1xf32>
    %370 = vector.extract_strided_slice %26 {offsets = [18, 0], sizes = [1, 32], strides = [1, 1]} : vector<32x32xf32> to vector<1x32xf32>
    %371 = vector.broadcast %369 : vector<32x1xf32> to vector<32x32xf32>
    %372 = vector.broadcast %370 : vector<1x32xf32> to vector<32x32xf32>
    %373 = arith.addf %371, %372 : vector<32x32xf32>
    %374 = math.absf %373 : vector<32x32xf32>
    %375 = vector.broadcast %92 : vector<1x1xf32> to vector<32x32xf32>
    %376 = arith.mulf %375, %374 : vector<32x32xf32>
    %377 = arith.addf %368, %376 : vector<32x32xf32>
    %378 = vector.extract_strided_slice %24 {offsets = [0, 19], sizes = [32, 1], strides = [1, 1]} : vector<32x32xf32> to vector<32x1xf32>
    %379 = vector.extract_strided_slice %26 {offsets = [19, 0], sizes = [1, 32], strides = [1, 1]} : vector<32x32xf32> to vector<1x32xf32>
    %380 = vector.broadcast %378 : vector<32x1xf32> to vector<32x32xf32>
    %381 = vector.broadcast %379 : vector<1x32xf32> to vector<32x32xf32>
    %382 = arith.addf %380, %381 : vector<32x32xf32>
    %383 = math.absf %382 : vector<32x32xf32>
    %384 = vector.broadcast %95 : vector<1x1xf32> to vector<32x32xf32>
    %385 = arith.mulf %384, %383 : vector<32x32xf32>
    %386 = arith.addf %377, %385 : vector<32x32xf32>
    %387 = vector.extract_strided_slice %24 {offsets = [0, 20], sizes = [32, 1], strides = [1, 1]} : vector<32x32xf32> to vector<32x1xf32>
    %388 = vector.extract_strided_slice %26 {offsets = [20, 0], sizes = [1, 32], strides = [1, 1]} : vector<32x32xf32> to vector<1x32xf32>
    %389 = vector.broadcast %387 : vector<32x1xf32> to vector<32x32xf32>
    %390 = vector.broadcast %388 : vector<1x32xf32> to vector<32x32xf32>
    %391 = arith.addf %389, %390 : vector<32x32xf32>
    %392 = math.absf %391 : vector<32x32xf32>
    %393 = vector.broadcast %98 : vector<1x1xf32> to vector<32x32xf32>
    %394 = arith.mulf %393, %392 : vector<32x32xf32>
    %395 = arith.addf %386, %394 : vector<32x32xf32>
    %396 = vector.extract_strided_slice %24 {offsets = [0, 21], sizes = [32, 1], strides = [1, 1]} : vector<32x32xf32> to vector<32x1xf32>
    %397 = vector.extract_strided_slice %26 {offsets = [21, 0], sizes = [1, 32], strides = [1, 1]} : vector<32x32xf32> to vector<1x32xf32>
    %398 = vector.broadcast %396 : vector<32x1xf32> to vector<32x32xf32>
    %399 = vector.broadcast %397 : vector<1x32xf32> to vector<32x32xf32>
    %400 = arith.addf %398, %399 : vector<32x32xf32>
    %401 = math.absf %400 : vector<32x32xf32>
    %402 = vector.broadcast %101 : vector<1x1xf32> to vector<32x32xf32>
    %403 = arith.mulf %402, %401 : vector<32x32xf32>
    %404 = arith.addf %395, %403 : vector<32x32xf32>
    %405 = vector.extract_strided_slice %24 {offsets = [0, 22], sizes = [32, 1], strides = [1, 1]} : vector<32x32xf32> to vector<32x1xf32>
    %406 = vector.extract_strided_slice %26 {offsets = [22, 0], sizes = [1, 32], strides = [1, 1]} : vector<32x32xf32> to vector<1x32xf32>
    %407 = vector.broadcast %405 : vector<32x1xf32> to vector<32x32xf32>
    %408 = vector.broadcast %406 : vector<1x32xf32> to vector<32x32xf32>
    %409 = arith.addf %407, %408 : vector<32x32xf32>
    %410 = math.absf %409 : vector<32x32xf32>
    %411 = vector.broadcast %104 : vector<1x1xf32> to vector<32x32xf32>
    %412 = arith.mulf %411, %410 : vector<32x32xf32>
    %413 = arith.addf %404, %412 : vector<32x32xf32>
    %414 = vector.extract_strided_slice %24 {offsets = [0, 23], sizes = [32, 1], strides = [1, 1]} : vector<32x32xf32> to vector<32x1xf32>
    %415 = vector.extract_strided_slice %26 {offsets = [23, 0], sizes = [1, 32], strides = [1, 1]} : vector<32x32xf32> to vector<1x32xf32>
    %416 = vector.broadcast %414 : vector<32x1xf32> to vector<32x32xf32>
    %417 = vector.broadcast %415 : vector<1x32xf32> to vector<32x32xf32>
    %418 = arith.addf %416, %417 : vector<32x32xf32>
    %419 = math.absf %418 : vector<32x32xf32>
    %420 = vector.broadcast %107 : vector<1x1xf32> to vector<32x32xf32>
    %421 = arith.mulf %420, %419 : vector<32x32xf32>
    %422 = arith.addf %413, %421 : vector<32x32xf32>
    %cst_64 = arith.constant -1.000000e+30 : f32
    %423 = vector.broadcast %cst_64 : f32 to vector<32x32xf32>
    %424 = arith.select %35, %422, %423 : vector<32x32xi1>, vector<32x32xf32>
    %cst_65 = arith.constant dense<0xFF800000> : vector<32xf32>
    %425 = vector.multi_reduction <maximumf>, %424, %cst_65 [1] : vector<32x32xf32> to vector<32xf32>
    %426 = vector.shape_cast %425 : vector<32xf32> to vector<32x1xf32>
    %427 = vector.broadcast %426 : vector<32x1xf32> to vector<32x32xf32>
    %428 = arith.subf %424, %427 : vector<32x32xf32>
    %429 = math.exp %428 : vector<32x32xf32>
    %cst_66 = arith.constant 0.000000e+00 : f32
    %430 = vector.broadcast %cst_66 : f32 to vector<32x32xf32>
    %431 = arith.select %35, %429, %430 : vector<32x32xi1>, vector<32x32xf32>
    %cst_67 = arith.constant dense<0.000000e+00> : vector<32xf32>
    %432 = vector.multi_reduction <add>, %431, %cst_67 [1] : vector<32x32xf32> to vector<32xf32>
    %433 = vector.shape_cast %432 : vector<32xf32> to vector<32x1xf32>
    %cst_68 = arith.constant 0.000000e+00 : f32
    %434 = vector.broadcast %cst_68 : f32 to vector<32x1xf32>
    %435 = arith.cmpf ogt, %433, %434 : vector<32x1xf32>
    %cst_69 = arith.constant 1.000000e+00 : f32
    %436 = vector.broadcast %cst_69 : f32 to vector<32x1xf32>
    %437 = arith.select %435, %433, %436 : vector<32x1xi1>, vector<32x1xf32>
    %438 = tpu.reciprocal %437 {approx = true} : vector<32x1xf32> -> vector<32x1xf32>
    %439 = vector.broadcast %438 : vector<32x1xf32> to vector<32x32xf32>
    %440 = arith.mulf %431, %439 : vector<32x32xf32>
    %441 = arith.truncf %440 : vector<32x32xf32> to vector<32x32xbf16>
    %442 = vector.extract_strided_slice %25 {offsets = [0, 16], sizes = [32, 8], strides = [1, 1]} : vector<32x32xbf16> to vector<32x8xbf16>
    %cst_70 = arith.constant dense<0.000000e+00> : vector<32x8xf32>
    %443 = tpu.matmul %441, %442, %cst_70 {dimension_numbers = #tpu.dot_dimension_numbers<[1], [0], [0], [1], [0, 0, 1, 1], [], []>} : vector<32x32xbf16>, vector<32x8xbf16>, vector<32x8xf32> -> vector<32x8xf32>
    %444 = vector.extract_strided_slice %28 {offsets = [0, 24], sizes = [32, 8], strides = [1, 1]} : vector<32x32xf32> to vector<32x8xf32>
    %cst_71 = arith.constant dense<0.000000e+00> : vector<32xf32>
    %445 = vector.multi_reduction <add>, %444, %cst_71 [1] : vector<32x8xf32> to vector<32xf32>
    %446 = vector.shape_cast %445 : vector<32xf32> to vector<32x1xf32>
    %447 = vector.extract_strided_slice %31 {offsets = [24, 0], sizes = [8, 32], strides = [1, 1]} : vector<32x32xf32> to vector<8x32xf32>
    %cst_72 = arith.constant dense<0.000000e+00> : vector<32xf32>
    %448 = vector.multi_reduction <add>, %447, %cst_72 [0] : vector<8x32xf32> to vector<32xf32>
    %449 = vector.shape_cast %448 : vector<32xf32> to vector<1x32xf32>
    %450 = vector.broadcast %446 : vector<32x1xf32> to vector<32x32xf32>
    %451 = vector.broadcast %449 : vector<1x32xf32> to vector<32x32xf32>
    %452 = arith.addf %450, %451 : vector<32x32xf32>
    %cst_73 = arith.constant 6.000000e-01 : f32
    %453 = vector.broadcast %cst_73 : f32 to vector<32x32xf32>
    %454 = arith.mulf %453, %452 : vector<32x32xf32>
    %455 = vector.extract_strided_slice %24 {offsets = [0, 24], sizes = [32, 1], strides = [1, 1]} : vector<32x32xf32> to vector<32x1xf32>
    %456 = vector.extract_strided_slice %26 {offsets = [24, 0], sizes = [1, 32], strides = [1, 1]} : vector<32x32xf32> to vector<1x32xf32>
    %457 = vector.broadcast %455 : vector<32x1xf32> to vector<32x32xf32>
    %458 = vector.broadcast %456 : vector<1x32xf32> to vector<32x32xf32>
    %459 = arith.addf %457, %458 : vector<32x32xf32>
    %460 = math.absf %459 : vector<32x32xf32>
    %461 = vector.broadcast %110 : vector<1x1xf32> to vector<32x32xf32>
    %462 = arith.mulf %461, %460 : vector<32x32xf32>
    %463 = arith.addf %454, %462 : vector<32x32xf32>
    %464 = vector.extract_strided_slice %24 {offsets = [0, 25], sizes = [32, 1], strides = [1, 1]} : vector<32x32xf32> to vector<32x1xf32>
    %465 = vector.extract_strided_slice %26 {offsets = [25, 0], sizes = [1, 32], strides = [1, 1]} : vector<32x32xf32> to vector<1x32xf32>
    %466 = vector.broadcast %464 : vector<32x1xf32> to vector<32x32xf32>
    %467 = vector.broadcast %465 : vector<1x32xf32> to vector<32x32xf32>
    %468 = arith.addf %466, %467 : vector<32x32xf32>
    %469 = math.absf %468 : vector<32x32xf32>
    %470 = vector.broadcast %113 : vector<1x1xf32> to vector<32x32xf32>
    %471 = arith.mulf %470, %469 : vector<32x32xf32>
    %472 = arith.addf %463, %471 : vector<32x32xf32>
    %473 = vector.extract_strided_slice %24 {offsets = [0, 26], sizes = [32, 1], strides = [1, 1]} : vector<32x32xf32> to vector<32x1xf32>
    %474 = vector.extract_strided_slice %26 {offsets = [26, 0], sizes = [1, 32], strides = [1, 1]} : vector<32x32xf32> to vector<1x32xf32>
    %475 = vector.broadcast %473 : vector<32x1xf32> to vector<32x32xf32>
    %476 = vector.broadcast %474 : vector<1x32xf32> to vector<32x32xf32>
    %477 = arith.addf %475, %476 : vector<32x32xf32>
    %478 = math.absf %477 : vector<32x32xf32>
    %479 = vector.broadcast %116 : vector<1x1xf32> to vector<32x32xf32>
    %480 = arith.mulf %479, %478 : vector<32x32xf32>
    %481 = arith.addf %472, %480 : vector<32x32xf32>
    %482 = vector.extract_strided_slice %24 {offsets = [0, 27], sizes = [32, 1], strides = [1, 1]} : vector<32x32xf32> to vector<32x1xf32>
    %483 = vector.extract_strided_slice %26 {offsets = [27, 0], sizes = [1, 32], strides = [1, 1]} : vector<32x32xf32> to vector<1x32xf32>
    %484 = vector.broadcast %482 : vector<32x1xf32> to vector<32x32xf32>
    %485 = vector.broadcast %483 : vector<1x32xf32> to vector<32x32xf32>
    %486 = arith.addf %484, %485 : vector<32x32xf32>
    %487 = math.absf %486 : vector<32x32xf32>
    %488 = vector.broadcast %119 : vector<1x1xf32> to vector<32x32xf32>
    %489 = arith.mulf %488, %487 : vector<32x32xf32>
    %490 = arith.addf %481, %489 : vector<32x32xf32>
    %491 = vector.extract_strided_slice %24 {offsets = [0, 28], sizes = [32, 1], strides = [1, 1]} : vector<32x32xf32> to vector<32x1xf32>
    %492 = vector.extract_strided_slice %26 {offsets = [28, 0], sizes = [1, 32], strides = [1, 1]} : vector<32x32xf32> to vector<1x32xf32>
    %493 = vector.broadcast %491 : vector<32x1xf32> to vector<32x32xf32>
    %494 = vector.broadcast %492 : vector<1x32xf32> to vector<32x32xf32>
    %495 = arith.addf %493, %494 : vector<32x32xf32>
    %496 = math.absf %495 : vector<32x32xf32>
    %497 = vector.broadcast %122 : vector<1x1xf32> to vector<32x32xf32>
    %498 = arith.mulf %497, %496 : vector<32x32xf32>
    %499 = arith.addf %490, %498 : vector<32x32xf32>
    %500 = vector.extract_strided_slice %24 {offsets = [0, 29], sizes = [32, 1], strides = [1, 1]} : vector<32x32xf32> to vector<32x1xf32>
    %501 = vector.extract_strided_slice %26 {offsets = [29, 0], sizes = [1, 32], strides = [1, 1]} : vector<32x32xf32> to vector<1x32xf32>
    %502 = vector.broadcast %500 : vector<32x1xf32> to vector<32x32xf32>
    %503 = vector.broadcast %501 : vector<1x32xf32> to vector<32x32xf32>
    %504 = arith.addf %502, %503 : vector<32x32xf32>
    %505 = math.absf %504 : vector<32x32xf32>
    %506 = vector.broadcast %125 : vector<1x1xf32> to vector<32x32xf32>
    %507 = arith.mulf %506, %505 : vector<32x32xf32>
    %508 = arith.addf %499, %507 : vector<32x32xf32>
    %509 = vector.extract_strided_slice %24 {offsets = [0, 30], sizes = [32, 1], strides = [1, 1]} : vector<32x32xf32> to vector<32x1xf32>
    %510 = vector.extract_strided_slice %26 {offsets = [30, 0], sizes = [1, 32], strides = [1, 1]} : vector<32x32xf32> to vector<1x32xf32>
    %511 = vector.broadcast %509 : vector<32x1xf32> to vector<32x32xf32>
    %512 = vector.broadcast %510 : vector<1x32xf32> to vector<32x32xf32>
    %513 = arith.addf %511, %512 : vector<32x32xf32>
    %514 = math.absf %513 : vector<32x32xf32>
    %515 = vector.broadcast %128 : vector<1x1xf32> to vector<32x32xf32>
    %516 = arith.mulf %515, %514 : vector<32x32xf32>
    %517 = arith.addf %508, %516 : vector<32x32xf32>
    %518 = vector.extract_strided_slice %24 {offsets = [0, 31], sizes = [32, 1], strides = [1, 1]} : vector<32x32xf32> to vector<32x1xf32>
    %519 = vector.extract_strided_slice %26 {offsets = [31, 0], sizes = [1, 32], strides = [1, 1]} : vector<32x32xf32> to vector<1x32xf32>
    %520 = vector.broadcast %518 : vector<32x1xf32> to vector<32x32xf32>
    %521 = vector.broadcast %519 : vector<1x32xf32> to vector<32x32xf32>
    %522 = arith.addf %520, %521 : vector<32x32xf32>
    %523 = math.absf %522 : vector<32x32xf32>
    %524 = vector.broadcast %131 : vector<1x1xf32> to vector<32x32xf32>
    %525 = arith.mulf %524, %523 : vector<32x32xf32>
    %526 = arith.addf %517, %525 : vector<32x32xf32>
    %cst_74 = arith.constant -1.000000e+30 : f32
    %527 = vector.broadcast %cst_74 : f32 to vector<32x32xf32>
    %528 = arith.select %35, %526, %527 : vector<32x32xi1>, vector<32x32xf32>
    %cst_75 = arith.constant dense<0xFF800000> : vector<32xf32>
    %529 = vector.multi_reduction <maximumf>, %528, %cst_75 [1] : vector<32x32xf32> to vector<32xf32>
    %530 = vector.shape_cast %529 : vector<32xf32> to vector<32x1xf32>
    %531 = vector.broadcast %530 : vector<32x1xf32> to vector<32x32xf32>
    %532 = arith.subf %528, %531 : vector<32x32xf32>
    %533 = math.exp %532 : vector<32x32xf32>
    %cst_76 = arith.constant 0.000000e+00 : f32
    %534 = vector.broadcast %cst_76 : f32 to vector<32x32xf32>
    %535 = arith.select %35, %533, %534 : vector<32x32xi1>, vector<32x32xf32>
    %cst_77 = arith.constant dense<0.000000e+00> : vector<32xf32>
    %536 = vector.multi_reduction <add>, %535, %cst_77 [1] : vector<32x32xf32> to vector<32xf32>
    %537 = vector.shape_cast %536 : vector<32xf32> to vector<32x1xf32>
    %cst_78 = arith.constant 0.000000e+00 : f32
    %538 = vector.broadcast %cst_78 : f32 to vector<32x1xf32>
    %539 = arith.cmpf ogt, %537, %538 : vector<32x1xf32>
    %cst_79 = arith.constant 1.000000e+00 : f32
    %540 = vector.broadcast %cst_79 : f32 to vector<32x1xf32>
    %541 = arith.select %539, %537, %540 : vector<32x1xi1>, vector<32x1xf32>
    %542 = tpu.reciprocal %541 {approx = true} : vector<32x1xf32> -> vector<32x1xf32>
    %543 = vector.broadcast %542 : vector<32x1xf32> to vector<32x32xf32>
    %544 = arith.mulf %535, %543 : vector<32x32xf32>
    %545 = arith.truncf %544 : vector<32x32xf32> to vector<32x32xbf16>
    %546 = vector.extract_strided_slice %25 {offsets = [0, 24], sizes = [32, 8], strides = [1, 1]} : vector<32x32xbf16> to vector<32x8xbf16>
    %cst_80 = arith.constant dense<0.000000e+00> : vector<32x8xf32>
    %547 = tpu.matmul %545, %546, %cst_80 {dimension_numbers = #tpu.dot_dimension_numbers<[1], [0], [0], [1], [0, 0, 1, 1], [], []>} : vector<32x32xbf16>, vector<32x8xbf16>, vector<32x8xf32> -> vector<32x8xf32>
    %548 = tpu.concatenate %235, %339, %443, %547 in 1 : vector<32x8xf32>, vector<32x8xf32>, vector<32x8xf32>, vector<32x8xf32> -> vector<32x32xf32>
    %549 = vector.broadcast %10 : vector<1x32xf32> to vector<32x32xf32>
    %550 = arith.addf %548, %549 : vector<32x32xf32>
    %cst_81 = arith.constant dense<0.000000e+00> : vector<32xf32>
    %551 = vector.multi_reduction <add>, %550, %cst_81 [1] : vector<32x32xf32> to vector<32xf32>
    %552 = vector.shape_cast %551 : vector<32xf32> to vector<32x1xf32>
    %cst_82 = arith.constant 3.200000e+01 : f32
    %553 = vector.broadcast %cst_82 : f32 to vector<32x1xf32>
    %554 = arith.divf %552, %553 : vector<32x1xf32>
    %555 = vector.broadcast %554 : vector<32x1xf32> to vector<32x32xf32>
    %556 = arith.subf %550, %555 : vector<32x32xf32>
    %557 = arith.mulf %556, %556 : vector<32x32xf32>
    %cst_83 = arith.constant dense<0.000000e+00> : vector<32xf32>
    %558 = vector.multi_reduction <add>, %557, %cst_83 [1] : vector<32x32xf32> to vector<32xf32>
    %559 = vector.shape_cast %558 : vector<32xf32> to vector<32x1xf32>
    %cst_84 = arith.constant 3.200000e+01 : f32
    %560 = vector.broadcast %cst_84 : f32 to vector<32x1xf32>
    %561 = arith.divf %559, %560 : vector<32x1xf32>
    %562 = vector.broadcast %554 : vector<32x1xf32> to vector<32x32xf32>
    %563 = arith.subf %550, %562 : vector<32x32xf32>
    %cst_85 = arith.constant 9.99999974E-6 : f32
    %564 = vector.broadcast %cst_85 : f32 to vector<32x1xf32>
    %565 = arith.addf %561, %564 : vector<32x1xf32>
    %566 = math.rsqrt %565 : vector<32x1xf32>
    %567 = vector.broadcast %566 : vector<32x1xf32> to vector<32x32xf32>
    %568 = arith.mulf %563, %567 : vector<32x32xf32>
    %569 = vector.broadcast %11 : vector<1x32xf32> to vector<32x32xf32>
    %570 = arith.mulf %568, %569 : vector<32x32xf32>
    %571 = vector.broadcast %12 : vector<1x32xf32> to vector<32x32xf32>
    %572 = arith.addf %570, %571 : vector<32x32xf32>
    %573 = arith.truncf %572 : vector<32x32xf32> to vector<32x32xbf16>
    %574 = arith.index_cast %arg1 : i32 to index
    %c0_86 = arith.constant 0 : index
    %c0_87 = arith.constant 0 : index
    %575 = vector.load %arg5[%574, %c0_86, %c0_87] : memref<2x32x128xbf16, #tpu.memory_space<vmem>>, vector<1x32x128xbf16>
    %576 = vector.shape_cast %575 : vector<1x32x128xbf16> to vector<32x128xbf16>
    %cst_88 = arith.constant dense<0.000000e+00> : vector<32x128xf32>
    %577 = tpu.matmul %573, %576, %cst_88 {dimension_numbers = #tpu.dot_dimension_numbers<[1], [0], [0], [1], [0, 0, 1, 1], [], []>} : vector<32x32xbf16>, vector<32x128xbf16>, vector<32x128xf32> -> vector<32x128xf32>
    %578 = vector.broadcast %13 : vector<1x128xf32> to vector<32x128xf32>
    %579 = arith.addf %577, %578 : vector<32x128xf32>
    %580 = arith.negf %579 : vector<32x128xf32>
    %581 = math.exp %580 : vector<32x128xf32>
    %cst_89 = arith.constant 1.000000e+00 : f32
    %582 = vector.broadcast %cst_89 : f32 to vector<32x128xf32>
    %583 = arith.addf %582, %581 : vector<32x128xf32>
    %584 = arith.divf %582, %583 : vector<32x128xf32>
    %585 = arith.mulf %579, %584 : vector<32x128xf32>
    %586 = arith.truncf %585 : vector<32x128xf32> to vector<32x128xbf16>
    %587 = arith.index_cast %arg1 : i32 to index
    %c0_90 = arith.constant 0 : index
    %c0_91 = arith.constant 0 : index
    %588 = vector.load %arg6[%587, %c0_90, %c0_91] : memref<2x128x32xbf16, #tpu.memory_space<vmem>>, vector<1x128x32xbf16>
    %589 = vector.shape_cast %588 : vector<1x128x32xbf16> to vector<128x32xbf16>
    %cst_92 = arith.constant dense<0.000000e+00> : vector<32x32xf32>
    %590 = tpu.matmul %586, %589, %cst_92 {dimension_numbers = #tpu.dot_dimension_numbers<[1], [0], [0], [1], [0, 0, 1, 1], [], []>} : vector<32x128xbf16>, vector<128x32xbf16>, vector<32x32xf32> -> vector<32x32xf32>
    %591 = vector.broadcast %14 : vector<1x32xf32> to vector<32x32xf32>
    %592 = arith.addf %590, %591 : vector<32x32xf32>
    %593 = arith.addf %550, %592 : vector<32x32xf32>
    %cst_93 = arith.constant dense<0.000000e+00> : vector<32xf32>
    %594 = vector.multi_reduction <add>, %593, %cst_93 [1] : vector<32x32xf32> to vector<32xf32>
    %595 = vector.shape_cast %594 : vector<32xf32> to vector<32x1xf32>
    %cst_94 = arith.constant 3.200000e+01 : f32
    %596 = vector.broadcast %cst_94 : f32 to vector<32x1xf32>
    %597 = arith.divf %595, %596 : vector<32x1xf32>
    %598 = vector.broadcast %597 : vector<32x1xf32> to vector<32x32xf32>
    %599 = arith.subf %593, %598 : vector<32x32xf32>
    %600 = arith.mulf %599, %599 : vector<32x32xf32>
    %cst_95 = arith.constant dense<0.000000e+00> : vector<32xf32>
    %601 = vector.multi_reduction <add>, %600, %cst_95 [1] : vector<32x32xf32> to vector<32xf32>
    %602 = vector.shape_cast %601 : vector<32xf32> to vector<32x1xf32>
    %cst_96 = arith.constant 3.200000e+01 : f32
    %603 = vector.broadcast %cst_96 : f32 to vector<32x1xf32>
    %604 = arith.divf %602, %603 : vector<32x1xf32>
    %605 = vector.broadcast %597 : vector<32x1xf32> to vector<32x32xf32>
    %606 = arith.subf %593, %605 : vector<32x32xf32>
    %cst_97 = arith.constant 9.99999974E-6 : f32
    %607 = vector.broadcast %cst_97 : f32 to vector<32x1xf32>
    %608 = arith.addf %604, %607 : vector<32x1xf32>
    %609 = math.rsqrt %608 : vector<32x1xf32>
    %610 = vector.broadcast %609 : vector<32x1xf32> to vector<32x32xf32>
    %611 = arith.mulf %606, %610 : vector<32x32xf32>
    %612 = vector.broadcast %15 : vector<1x32xf32> to vector<32x32xf32>
    %613 = arith.mulf %611, %612 : vector<32x32xf32>
    %614 = vector.broadcast %16 : vector<1x32xf32> to vector<32x32xf32>
    %615 = arith.addf %613, %614 : vector<32x32xf32>
    %c0_98 = arith.constant 0 : index
    %c0_99 = arith.constant 0 : index
    %616 = vector.load %arg8[%c0_98, %c0_99] : memref<32x32xf32, #tpu.memory_space<vmem>>, vector<32x32xf32>
    tpu.vector_store %arg8[%c0_98, %c0_99], %615 {strides = array<i32>} : memref<32x32xf32, #tpu.memory_space<vmem>>, vector<32x32xf32>,
    return
  }
  func.func @transform_0(%arg0: i32, %arg1: i32) -> (i32, i32, i32) {
    %c0_i32 = arith.constant 0 : i32
    %c0_i32_0 = arith.constant 0 : i32
    %c0_i32_1 = arith.constant 0 : i32
    return %arg0, %c0_i32, %c0_i32_0 : i32, i32, i32
  }
  func.func @transform_1(%arg0: i32, %arg1: i32) -> (i32, i32) {
    %c0_i32 = arith.constant 0 : i32
    %c0_i32_0 = arith.constant 0 : i32
    return %arg0, %c0_i32 : i32, i32
  }
  func.func @transform_2(%arg0: i32, %arg1: i32) -> (i32, i32, i32) {
    %c0_i32 = arith.constant 0 : i32
    %c0_i32_0 = arith.constant 0 : i32
    %c0_i32_1 = arith.constant 0 : i32
    %c0_i32_2 = arith.constant 0 : i32
    return %c0_i32, %c0_i32_0, %c0_i32_1 : i32, i32, i32
  }
  func.func @transform_3(%arg0: i32, %arg1: i32) -> (i32, i32, i32) {
    %c0_i32 = arith.constant 0 : i32
    %c0_i32_0 = arith.constant 0 : i32
    %c0_i32_1 = arith.constant 0 : i32
    %c0_i32_2 = arith.constant 0 : i32
    return %c0_i32, %c0_i32_0, %c0_i32_1 : i32, i32, i32
  }
  func.func @transform_4(%arg0: i32, %arg1: i32) -> (i32, i32, i32) {
    %c0_i32 = arith.constant 0 : i32
    %c0_i32_0 = arith.constant 0 : i32
    %c0_i32_1 = arith.constant 0 : i32
    %c0_i32_2 = arith.constant 0 : i32
    return %c0_i32, %c0_i32_0, %c0_i32_1 : i32, i32, i32
  }
  func.func @transform_5(%arg0: i32, %arg1: i32) -> (i32, i32, i32) {
    %c0_i32 = arith.constant 0 : i32
    %c0_i32_0 = arith.constant 0 : i32
    %c0_i32_1 = arith.constant 0 : i32
    %c0_i32_2 = arith.constant 0 : i32
    return %c0_i32, %c0_i32_0, %c0_i32_1 : i32, i32, i32
  }
  func.func @transform_6(%arg0: i32, %arg1: i32) -> (i32, i32) {
    %c0_i32 = arith.constant 0 : i32
    %c0_i32_0 = arith.constant 0 : i32
    return %arg0, %c0_i32 : i32, i32
  }
}

</mosaic_0001>

<bundles_post_ra>
// kernel: tpu_custom_call.1
= control target key start
LH: loop header
LB: loop body
LE: loop exit
PB: predicated region body
PF: predicated region fallthrough
CT: control target
= control target key end

     0   :  { %11 = vsyncpa [#allocation3], 0  ;;  %s3651_s21 = smov 0   ;;  %s3653_s22 = smov 0   ;;  %s5485_s0 = inlined_call_operand.vmem [shape: s8[1,32,32], index: 0, kind: input, shape index: {}]   ;;  %s5486_s1 = inlined_call_operand.vmem [shape: f32[32,32], index: 1, kind: input, shape index: {}]   ;;  %s5487_s2 = inlined_call_operand.vmem [shape: bf16[2,32,64], index: 2, kind: input, shape index: {}]   ;;  %s5488_s3 = inlined_call_operand.vmem [shape: bf16[2,32,128], index: 3, kind: input, shape index: {}]   ;;  %s5489_s4 = inlined_call_operand.vmem [shape: bf16[2,128,32], index: 4, kind: input, shape index: {}]   ;;  %s5490_s5 = inlined_call_operand.vmem [shape: f32[2,9,128], index: 5, kind: input, shape index: {}]   ;;  %s5491_s6 = inlined_call_operand.hbm [shape: f32[32,32], index: 6, kind: output, shape index: {}]  }
   0x1   :  { %s3655_s23 = smov 0  }
   0x2 LB: > { %s2990_s24 = sadd.s32 4294967295, %s3540_s23   ;;  %s26_s25 = sadd.s32 1, %s3536_s22  ;;  %s3540_s23 = sphi %s3655_s23, %s17_s23   ;;  %s3536_s22 = sphi %s3653_s22, %s5849_s22   ;;  %s3532_s21 = sphi %s3651_s21, %s5848_s21  }
   0x3   : > { %p27_p0 = scmp.ge.s32.totalorder %s26_s25, 2  ;;  %p2994_p1 = scmp.ge.s32.totalorder %s3540_s23, 1 }
   0x4   : > { %p235_p2 = scmp.lt.s32.totalorder %s3540_s23, 3 }
   0x5   : > { %s5851_s25 = smov (%p27_p0, %s26_s25), 0 }
   0x6   : > { %p236_p3 = pnand %p2994_p1, %p235_p2 }
   0x8   : > { %239 = sbr.rel (%p236_p3) target bundleno = 2962 (0xb92), region = 44 }
   0xf   : > { %p2995_p4 = scmp.ne.s32.totalorder %s3532_s21, 0 }
  0x10   : > { %v282_v0 = vld [vmem:[%s5486_s1] sm:$0xff] (!%p2995_p4)  ;;  %vm286_vm0 = vcmask (!%p2995_p4), 261120   ;;  %v283_v1 = vld [vmem:[%s5486_s1 + $0x8] sm:$0xff] (!%p2995_p4)  ;;  %v284_v2 = vld [vmem:[%s5486_s1 + $0x10] sm:$0xff] (!%p2995_p4) }
  0x11   : > { %281 = sbr.rel (%p2995_p4) target bundleno = 24 (0x18), region = 48  ;;  %287 = vst.msk [vmem:[#allocation2] sm:$0xff] (!%p2995_p4), %vm286_vm0, %v282_v0  ;;  %288 = vst.msk [vmem:[#allocation2 + $0x8] sm:$0xff] (!%p2995_p4), %vm286_vm0, %v283_v1  ;;  %v285_v3 = vld [vmem:[%s5486_s1 + $0x18] sm:$0xff] (!%p2995_p4) }
  0x12   : > { %289 = vst.msk [vmem:[#allocation2 + $0x10] sm:$0xff] (!%p2995_p4), %vm286_vm0, %v284_v2  ;;  %290 = vst.msk [vmem:[#allocation2 + $0x18] sm:$0xff] (!%p2995_p4), %vm286_vm0, %v285_v3 }
  0x18 PF: > { %s3686_s10 = sshll.u32 %s3532_s21, 4  ;;  %v308_v4 = vlaneseq  ;;  %v291_v5 = vld [vmem:[#allocation2] sm:$0xff]  ;;  %v292_v6 = vld [vmem:[#allocation2 + $0x8] sm:$0xff]  ;;  %vm324_vm1 = vcmask 261120   ;;  %s3542_s17 = smov 126   ;;  %v3558_v19 = vmov 32  }
  0x19   : > { %s3692_s13 = scalar_lea.vmem %s5490_s5, %s3686_s10  ;;  %s303_s16 = scalar_lea.vmem %s5487_s2, %s3686_s10  ;;  %v295_v7 = vpack.c.bf16 %v292_v6, %v291_v5  ;;  %v293_v14 = vld [vmem:[#allocation2 + $0x10] sm:$0xff]  ;;  %v294_v15 = vld [vmem:[#allocation2 + $0x18] sm:$0xff]  ;;  %3308 = vset.pattern.permute.xlu0 %v3558_v19  ;;  %v3562_v37 = vmov 34   ;;  %v3564_v38 = vmov 35   ;;  %v3565_v39 = vmov 37  }
  0x1a   : > { %v299_v8 = vld [vmem:[%s3692_s13] sm:$0xff]  ;;  %v3699_v9 = vshrl.u32 %v308_v4, 7  ;;  %v3380_v12 = vld [vmem:[%s303_s16 + $0x8] sm:$0xff]   ;;  %v296_v17 = vpack.c.bf16 %v294_v15, %v293_v14  ;;  %s3543_s18 = smov 124   ;;  %s3544_s19 = smov 32   ;;  %v3566_v45 = vmov 41  }
  0x1b   : > { %v3379_v10 = vld [vmem:[%s303_s16] sm:$0xff]   ;;  %v464_v11 = vmul.f32 0.4, %v299_v8  ;;  %3075 = vmatprep.mubr.msk.bf16.mxu1 %vm324_vm1, %v295_v7  ;;  %s3545_s20 = smov 122   ;;  %s3546_s26 = smov 120   ;;  %v3567_v50 = vmov 38  }
  0x1c   : > { %3071 = vmatprep.subr.bf16.mxu1 %v3379_v10  ;;  %v3706_v16 = vsub.s32 1, %v3699_v9  ;;  %s3547_s27 = smov 118   ;;  %s3548_s28 = smov 116   ;;  %v3735_v21 = vsub.s32 0, %v3699_v9  ;;  %vm481_vm2 = vcmask 64512  }
  0x1d   : > { %v3702_v13 = vrot.slane %v464_v11, 1  ;;  %3072 = vmatpush3.bf16.msra.mxu1 %v3379_v10  ;;  %s3549_s29 = smov 114   ;;  %s3550_s30 = smov 112  }
  0x1e   : > { %3073 = vmatprep.subr.bf16.mxu1 %v3380_v12  ;;  %5586 = vst [vmem:[#allocation5_spill] sm:$0xff] %v3706_v16  ;;  %v3711_v18 = vrot.slane %v299_v8, %v3706_v16  ;;  %s3551_s7 = smov 110   ;;  %s3552_s8 = smov 108   ;;  %v311_v23 = vrot.slane %v299_v8, %v3735_v21 }
  0x1f   : > { %623 = vrot.lane.b32.xlu0 %v3702_v13, %s3542_s17  ;;  %3139 = vpush %v3702_v13  ;;  %s3553_s9 = smov 106   ;;  %s3554_s11 = smov 104  }
  0x20   : > { %s3555_s12 = smov 102   ;;  %s3556_s14 = smov 100  }
  0x21   : > { %3074 = vmatpush3.bf16.msra.mxu1 %v3380_v12  ;;  %s3557_s15 = smov 98   ;;  %s3559_s16 = smov 96  }
  0x22   : > { %s3560_s17 = smov 88   ;;  %p5447_p5 = scmp.eq.s32.totalorder %s2990_s24, 1 }
  0x23   : > { %705 = vrot.lane.b32.xlu0 %v3702_v13, %s3543_s18  ;;  %s3561_s18 = smov 80  }
  0x24   : > { %3076 = vmatmul.mubr.msk.bf16.vlgmr.msra.gmra.mrb[0].mxu1 %vm324_vm1, %v296_v17 }
  0x27   : > { %419 = vrot.lane.b32.xlu0 %v3711_v18, %s3544_s19  ;;  %s3563_s19 = smov 72  }
  0x2b   : > { %787 = vrot.lane.b32.xlu0 %v3702_v13, %s3545_s20  ;;  %s3568_s20 = smov 127  }
  0x2f   : > { %1054 = vrot.lane.b32.xlu0 %v3702_v13, %s3546_s26 }
  0x33   : > { %1136 = vrot.lane.b32.xlu0 %v3702_v13, %s3547_s27  ;;  %s3569_s27 = smov 125  }
  0x37   : > { %1218 = vrot.lane.b32.xlu0 %v3702_v13, %s3548_s28  ;;  %s3570_s28 = smov 123  }
  0x3b   : > { %1300 = vrot.lane.b32.xlu0 %v3702_v13, %s3549_s29  ;;  %s3571_s29 = smov 121  }
  0x3f   : > { %1546 = vrot.lane.b32.xlu0 %v3702_v13, %s3550_s30 }
  0x43   : > { %1628 = vrot.lane.b32.xlu0 %v3702_v13, %s3551_s7  ;;  %s3572_s7 = smov 119  }
  0x47   : > { %1710 = vrot.lane.b32.xlu0 %v3702_v13, %s3552_s8  ;;  %s3573_s8 = smov 117  }
  0x4b   : > { %1792 = vrot.lane.b32.xlu0 %v3702_v13, %s3553_s9  ;;  %s3574_s9 = smov 115  }
  0x4f   : > { %2036 = vrot.lane.b32.xlu0 %v3702_v13, %s3554_s11 }
  0x53   : > { %2118 = vrot.lane.b32.xlu0 %v3702_v13, %s3555_s12  ;;  %s3575_s12 = smov 113  }
  0x57   : > { %2200 = vrot.lane.b32.xlu0 %v3702_v13, %s3556_s14  ;;  %s3576_s14 = smov 111  }
  0x5b   : > { %2282 = vrot.lane.b32.xlu0 %v3702_v13, %s3557_s15  ;;  %s3577_s15 = smov 109  }
  0x91   : > { %v3732_v20 = vpop.permute.xlu0 %623 }
  0x95   : > { %v3737_v22 = vpop.permute.xlu0 %705 }
  0x99   : > { %v420_v25 = vpop.permute.xlu0 %419 }
  0x9d   : > { %v3775_v42 = vpop.permute.xlu0 %787 }
  0xa1   : > { %v3777_v43 = vpop.permute.xlu0 %1054 }
  0xa5   : > { %v3779_v44 = vpop.permute.xlu0 %1136 }
  0xa9   : > { %v3783_v46 = vpop.permute.xlu0 %1218 }
  0xad   : > { %v3786_v47 = vpop.permute.xlu0 %1300 }
  0xb1   : > { %v3790_v49 = vpop.permute.xlu0 %1546 }
  0xb5   : > { %v3795_v52 = vpop.permute.xlu0 %1628 }
  0xb9   : > { %v3801_v55 = vpop.permute.xlu0 %1710 }
  0xbd   : > { %v3804_v56 = vpop.permute.xlu0 %1792 }
  0xc1   : > { %v3807_v57 = vpop.permute.xlu0 %2036 }
  0xc5   : > { %v3811_v58 = vpop.permute.xlu0 %2118 }
  0xc9   : > { %v3813_v59 = vpop.permute.xlu0 %2200 }
  0xcd   : > { %v3815_v60 = vpop.permute.xlu0 %2282 }
  0xf7   : > { %v3077_v24 = vpop.f32.mrb[0].mxu1 }
  0xf8   : > { %v3740_v26 = vadd.f32 %v3077_v24, %v311_v23  ;;  %v365_v27 = vpop.f32.mrb[1].mxu1 }
  0xf9   : > { %v3742_v28 = vadd.f32 %v365_v27, %v311_v23  ;;  %v3078_v29 = vpop.f32.mrb[2].mxu1 }
  0xfa   : > { %v368_v30 = vpop.f32.mrb[3].mxu1  ;;  %v424_v31 = vmul.f32 %v420_v25, %v3740_v26  ;;  %v3745_v32 = vadd.f32 %v3078_v29, %v311_v23  ;;  %v428_v53 = vmul.f32 %v3711_v18, %v3740_v26 }
  0xfb   : > { %v3747_v33 = vadd.f32 %v368_v30, %v311_v23  ;;  %v422_v34 = vmul.f32 %v420_v25, %v3742_v28  ;;  %v426_v48 = vmul.f32 %v3711_v18, %v3742_v28 }
  0xfc   : > { %473 = vrot.lane.b32.xlu1 %v424_v31, %s3559_s16  ;;  %v3759_v36 = vpack.c.bf16 %v3745_v32, %v3740_v26  ;;  %v425_v40 = vmul.f32 %v420_v25, %v3745_v32  ;;  %v429_v54 = vmul.f32 %v3711_v18, %v3745_v32 }
  0xfd   : > { %469 = vrot.lane.b32.xlu0 %v422_v34, %s3559_s16  ;;  %v3754_v35 = vpack.c.bf16 %v3747_v33, %v3742_v28  ;;  %v423_v41 = vmul.f32 %v420_v25, %v3747_v33  ;;  %v427_v51 = vmul.f32 %v3711_v18, %v3747_v33 }
  0xfe   : > { %5588 = vst [vmem:[#allocation7_spill] sm:$0xff] %v3759_v36 }
  0xff   : > { %5587 = vst [vmem:[#allocation6_spill] sm:$0xff] %v3754_v35  ;;  %3079 = vmatprep.subr.bf16.mxu1 %v3754_v35 }
 0x100   : > { %991 = vrot.lane.b32.xlu1 %v424_v31, %s3560_s17  ;;  %3080 = vmatpush3.bf16.msra.mxu1 %v3754_v35  ;;  %v4098_v35 = vsub.s32 4, %v3699_v9 }
 0x101   : > { %516 = vperm.xlu0 %3308, %v3747_v33   ;;  %3081 = vmatprep.subr.bf16.mxu1 %v3759_v36 }
 0x102   : > { %5598 = vst [vmem:[#allocation17_spill] sm:$0xff] %v4098_v35 }
 0x104   : > { %1483 = vrot.lane.b32.xlu1 %v424_v31, %s3561_s18  ;;  %3082 = vmatpush3.bf16.msra.mxu1 %v3759_v36 }
 0x105   : > { %3309 = vset.pattern.permute.xlu0 %v3562_v37 }
 0x106   : > { %600 = vperm.xlu0 %3309, %v3747_v33  }
 0x108   : > { %1973 = vrot.lane.b32.xlu1 %v424_v31, %s3563_s19 }
 0x10a   : > { %3310 = vset.pattern.permute.xlu0 %v3564_v38 }
 0x10b   : > { %641 = vperm.xlu0 %3310, %v3747_v33  }
 0x10c   : > { %987 = vrot.lane.b32.xlu1 %v422_v34, %s3560_s17 }
 0x10f   : > { %3311 = vset.pattern.permute.xlu0 %v3565_v39 }
 0x110   : > { %1479 = vrot.lane.b32.xlu1 %v422_v34, %s3561_s18  ;;  %723 = vperm.xlu0 %3311, %v3747_v33  }
 0x114   : > { %1969 = vrot.lane.b32.xlu1 %v422_v34, %s3563_s19  ;;  %475 = vrot.lane.b32.xlu0 %v425_v40, %s3559_s16 }
 0x118   : > { %471 = vrot.lane.b32.xlu1 %v423_v41, %s3559_s16  ;;  %993 = vrot.lane.b32.xlu0 %v425_v40, %s3560_s17  ;;  %s3578_s16 = smov 107  }
 0x11c   : > { %1485 = vrot.lane.b32.xlu0 %v425_v40, %s3561_s18 }
 0x120   : > { %1975 = vrot.lane.b32.xlu0 %v425_v40, %s3563_s19 }
 0x124   : > { %989 = vrot.lane.b32.xlu0 %v423_v41, %s3560_s17  ;;  %s3579_s17 = smov 105  }
 0x128   : > { %1481 = vrot.lane.b32.xlu0 %v423_v41, %s3561_s18  ;;  %s3580_s18 = smov 103  }
 0x12c   : > { %1971 = vrot.lane.b32.xlu0 %v423_v41, %s3563_s19  ;;  %s3581_s19 = smov 101   ;;  %v5516_v41 = vmov 39  }
 0x130   : > { %727 = vperm.xlu0 %3311, %v3740_v26  }
 0x134   : > { %3312 = vset.pattern.permute.xlu0 %v3566_v45 }
 0x135   : > { %1076 = vperm.xlu0 %3312, %v3740_v26  }
 0x139   : > { %3313 = vset.pattern.permute.xlu0 %v3567_v50 }
 0x141   : > { %430 = vxpose.xlu1.b32.start [1/4] (short) (narrow) %v426_v48, 32 }
 0x145   : > { %431 = vxpose.xlu1.b32.cont [2/4] (short) (narrow) %v427_v51, 32 }
 0x149   : > { %432 = vxpose.xlu1.b32.cont [3/4] (short) (narrow) %v428_v53, 32 }
 0x14d   : > { %433 = vxpose.xlu1.b32.end [4/4] (short) (narrow) %v429_v54, 32 }
 0x151   : > { %382 = vxpose.xlu1.b32.start [1/4] (short) (narrow) %v3742_v28, 32 }
 0x155   : > { %383 = vxpose.xlu1.b32.cont [2/4] (short) (narrow) %v3747_v33, 32 }
 0x159   : > { %384 = vxpose.xlu1.b32.cont [3/4] (short) (narrow) %v3740_v26, 32 }
 0x15d   : > { %385 = vxpose.xlu1.b32.end [4/4] (short) (narrow) %v3745_v32, 32 }
 0x16e   : > { %v474_v61 = vpop.permute.xlu1 %473 }
 0x16f   : > { %v488_v62 = vsel %vm481_vm2, %v474_v61, 0.0  ;;  %v470_v63 = vpop.permute.xlu0 %469 }
 0x170   : > { %489 = vadd.xlane.f32.xlu0 %v488_v62  ;;  %v482_v0 = vsel %vm481_vm2, %v470_v63, 0.0 }
 0x172   : > { %v3838_v10 = vpop.permute.xlu1 %991 }
 0x174   : > { %483 = vadd.xlane.f32.xlu0 %v482_v0 }
 0x176   : > { %v3841_v12 = vpop.permute.xlu1 %1483 }
 0x17a   : > { %v1974_v18 = vpop.permute.xlu1 %1973 }
 0x17b   : > { %582 = vrot.lane.b32.xlu1 %v3702_v13, %s3568_s20  ;;  %s3582_s20 = smov 99   ;;  %v1987_v61 = vsel %vm481_vm2, %v1974_v18, 0.0  ;;  %v3591_v18 = vmov 57  }
 0x17c   : > { %3330 = vset.pattern.permute.xlu1 %v3558_v19 }
 0x17e   : > { %v3850_v24 = vpop.permute.xlu1 %987 }
 0x17f   : > { %664 = vrot.lane.b32.xlu1 %v3702_v13, %s3569_s27  ;;  %s3583_s27 = smov 97  }
 0x180   : > { %v3822_v1 = vpop.permute.xlu0 %516 }
 0x182   : > { %v3855_v27 = vpop.permute.xlu1 %1479 }
 0x183   : > { %746 = vrot.lane.b32.xlu1 %v3702_v13, %s3570_s28  ;;  %s3979_s28 = spop %3139 }
 0x185   : > { %v3825_v2 = vpop.permute.xlu0 %600 }
 0x186   : > { %v3858_v29 = vpop.permute.xlu1 %1969 }
 0x187   : > { %828 = vrot.lane.b32.xlu1 %v3702_v13, %s3571_s29 }
 0x18a   : > { %v3828_v3 = vpop.permute.xlu0 %641  ;;  %v472_v30 = vpop.permute.xlu1 %471 }
 0x18b   : > { %1095 = vrot.lane.b32.xlu1 %v3702_v13, %s3572_s7 }
 0x18f   : > { %1177 = vrot.lane.b32.xlu1 %v3702_v13, %s3573_s8  ;;  %v3832_v4 = vpop.permute.xlu0 %723 }
 0x193   : > { %1259 = vrot.lane.b32.xlu1 %v3702_v13, %s3574_s9  ;;  %v476_v5 = vpop.permute.xlu0 %475 }
 0x194   : > { %v491_v6 = vsel %vm481_vm2, %v476_v5, 0.0 }
 0x195   : > { %492 = vadd.xlane.f32.xlu0 %v491_v6  ;;  %v3585_v6 = vmov 33  }
 0x197   : > { %1341 = vrot.lane.b32.xlu1 %v3702_v13, %s3575_s12  ;;  %v994_v7 = vpop.permute.xlu0 %993 }
 0x198   : > { %v1008_v8 = vsel %vm481_vm2, %v994_v7, 0.0 }
 0x199   : > { %1009 = vadd.xlane.f32.xlu0 %v1008_v8  ;;  %v5512_v8 = vmov 48  }
 0x19b   : > { %1587 = vrot.lane.b32.xlu1 %v3702_v13, %s3576_s14  ;;  %v1486_v11 = vpop.permute.xlu0 %1485 }
 0x19c   : > { %v1500_v25 = vsel %vm481_vm2, %v1486_v11, 0.0  ;;  %v5510_v11 = vmov 56  }
 0x19f   : > { %1669 = vrot.lane.b32.xlu1 %v3702_v13, %s3577_s15  ;;  %v3844_v14 = vpop.permute.xlu0 %1975 }
 0x1a3   : > { %1751 = vrot.lane.b32.xlu1 %v3702_v13, %s3578_s16  ;;  %v990_v15 = vpop.permute.xlu0 %989 }
 0x1a4   : > { %v1002_v17 = vsel %vm481_vm2, %v990_v15, 0.0 }
 0x1a5   : > { %1003 = vadd.xlane.f32.xlu0 %v1002_v17  ;;  %v5508_v17 = vmov 49  }
 0x1a7   : > { %1833 = vrot.lane.b32.xlu1 %v3702_v13, %s3579_s17  ;;  %v1482_v19 = vpop.permute.xlu0 %1481 }
 0x1a8   : > { %v1494_v23 = vsel %vm481_vm2, %v1482_v19, 0.0  ;;  %v3594_v19 = vmov 36  }
 0x1a9   : > { %1495 = vadd.xlane.f32.xlu0 %v1494_v23  ;;  %v3596_v23 = vmov 40  }
 0x1ab   : > { %2077 = vrot.lane.b32.xlu1 %v3702_v13, %s3580_s18 }
 0x1ad   : > { %1501 = vadd.xlane.f32.xlu0 %v1500_v25 }
 0x1af   : > { %2159 = vrot.lane.b32.xlu1 %v3702_v13, %s3581_s19 }
 0x1b3   : > { %2241 = vrot.lane.b32.xlu1 %v3702_v13, %s3582_s20 }
 0x1b7   : > { %2323 = vrot.lane.b32.xlu1 %v3702_v13, %s3583_s27  ;;  %v485_v13 = vsel %vm481_vm2, %v472_v30, 0.0  ;;  %v5500_v30 = vmov 59  }
 0x1c1   : > { %v3861_v31 = vpop.trf.xlu1 }
 0x1c3   : > { %760 = vperm.xlu0 %3313, %v3742_v28  }
 0x1c5   : > { %v3864_v34 = vpop.trf.xlu1 }
 0x1c7   : > { %772 = vperm.xlu0 %3313, %v3745_v32  }
 0x1c9   : > { %v3867_v40 = vpop.trf.xlu1 }
 0x1cb   : > { %3314 = vset.pattern.permute.xlu0 %v5516_v41 }
 0x1cd   : > { %v3870_v48 = vpop.trf.xlu1 }
 0x1d1   : > { %v3872_v51 = vpop.trf.xlu1 }
 0x1d5   : > { %v3875_v53 = vpop.trf.xlu1 }
 0x1d9   : > { %v3877_v54 = vpop.trf.xlu1 }
 0x1da   : > { %5589 = vst [vmem:[#allocation8_spill] sm:$0xff] %v3877_v54 }
 0x1db   : > { %486 = vadd.xlane.f32.xlu1 %v485_v13 }
 0x1dd   : > { %v3880_v62 = vpop.trf.xlu1 }
 0x1de   : > { %5590 = vst [vmem:[#allocation9_spill] sm:$0xff] %v3880_v62 }
 0x1e6   : > { %1988 = vadd.xlane.f32.xlu0 %v1987_v61 }
 0x1ec   : > { %511 = vperm.xlu1 %3330, %v3742_v28  }
 0x1ed   : > { %v583_v63 = vpop.permute.xlu1 %582 }
 0x1ee   : > { %3141 = vpush %v583_v63  ;;  %v5498_v63 = vmov 52  }
 0x1ef   : > { %3143 = vpush %v3732_v20 }
 0x1f0   : > { %521 = vperm.xlu1 %3330, %v3740_v26  }
 0x1f1   : > { %v665_v0 = vpop.permute.xlu1 %664 }
 0x1f2   : > { %3145 = vpush %v665_v0 }
 0x1f3   : > { %3147 = vpush %v3737_v22  ;;  %v5514_v22 = vmov 44  }
 0x1f4   : > { %526 = vperm.xlu1 %3330, %v3745_v32  }
 0x1f5   : > { %v747_v5 = vpop.permute.xlu1 %746 }
 0x1f6   : > { %3149 = vpush %v747_v5 }
 0x1f7   : > { %3151 = vpush %v3775_v42 }
 0x1f8   : > { %3331 = vset.pattern.permute.xlu1 %v3585_v6  ;;  %v5496_v6 = vmov 60  }
 0x1f9   : > { %555 = vperm.xlu1 %3331, %v3742_v28   ;;  %v829_v7 = vpop.permute.xlu1 %828 }
 0x1fa   : > { %3153 = vpush %v829_v7  ;;  %v3976_v7 = vrot.slane %v3872_v51, %v3706_v16 }
 0x1fb   : > { %3155 = vpush %v3777_v43 }
 0x1fc   : > { %801 = vperm.xlu0 %3314, %v3742_v28  }
 0x1fd   : > { %559 = vperm.xlu1 %3331, %v3747_v33   ;;  %v1096_v20 = vpop.permute.xlu1 %1095 }
 0x1fe   : > { %3157 = vpush %v1096_v20 }
 0x1ff   : > { %3159 = vpush %v3779_v44 }
 0x200   : > { %3315 = vset.pattern.permute.xlu0 %v5514_v22 }
 0x201   : > { %563 = vperm.xlu1 %3331, %v3740_v26   ;;  %v1178_v42 = vpop.permute.xlu1 %1177  ;;  %1191 = vperm.xlu0 %3315, %v3742_v28  }
 0x202   : > { %3161 = vpush %v1178_v42 }
 0x203   : > { %3163 = vpush %v3783_v46 }
 0x205   : > { %567 = vperm.xlu1 %3331, %v3745_v32   ;;  %v1260_v43 = vpop.permute.xlu1 %1259  ;;  %3316 = vset.pattern.permute.xlu0 %v5512_v8 }
 0x206   : > { %3165 = vpush %v1260_v43  ;;  %1523 = vperm.xlu0 %3316, %v3747_v33  }
 0x207   : > { %3167 = vpush %v3786_v47  ;;  %v5509_v47 = vmov 45  }
 0x209   : > { %v1342_v44 = vpop.permute.xlu1 %1341  ;;  %3332 = vset.pattern.permute.xlu1 %v3562_v37 }
 0x20a   : > { %3169 = vpush %v1342_v44  ;;  %1527 = vperm.xlu0 %3316, %v3740_v26  }
 0x20b   : > { %3171 = vpush %v3790_v49 }
 0x20d   : > { %v1588_v46 = vpop.permute.xlu1 %1587 }
 0x20e   : > { %3173 = vpush %v1588_v46  ;;  %3317 = vset.pattern.permute.xlu0 %v5510_v11 }
 0x20f   : > { %2009 = vperm.xlu0 %3317, %v3742_v28   ;;  %3175 = vpush %v3795_v52 }
 0x211   : > { %v1670_v15 = vpop.permute.xlu1 %1669 }
 0x212   : > { %3177 = vpush %v1670_v15 }
 0x213   : > { %2017 = vperm.xlu0 %3317, %v3740_v26   ;;  %3179 = vpush %v3801_v55 }
 0x215   : > { %v1752_v37 = vpop.permute.xlu1 %1751 }
 0x216   : > { %3181 = vpush %v1752_v37 }
 0x217   : > { %3318 = vset.pattern.permute.xlu0 %v5509_v47  ;;  %3183 = vpush %v3804_v56 }
 0x218   : > { %1236 = vperm.xlu0 %3318, %v3747_v33  }
 0x219   : > { %v1834_v49 = vpop.permute.xlu1 %1833 }
 0x21a   : > { %3185 = vpush %v1834_v49  ;;  %v5493_v49 = vmov 53  }
 0x21b   : > { %3187 = vpush %v3807_v57  ;;  %v999_v57 = vsel %vm481_vm2, %v3850_v24, 0.0  ;;  %v5502_v24 = vmov 51  }
 0x21c   : > { %1240 = vperm.xlu0 %3318, %v3740_v26  }
 0x21d   : > { %v2078_v52 = vpop.permute.xlu1 %2077 }
 0x21e   : > { %3189 = vpush %v2078_v52 }
 0x21f   : > { %3191 = vpush %v3811_v58  ;;  %s3142_s29 = spop %3141 }
 0x220   : > { %1244 = vperm.xlu0 %3318, %v3745_v32   ;;  %v3984_v44 = vstv %s3142_s29  ;;  %s3144_s7 = spop %3143 }
 0x221   : > { %v2160_v55 = vpop.permute.xlu1 %2159  ;;  %v4090_v41 = vstv %s3144_s7 }
 0x222   : > { %3193 = vpush %v2160_v55 }
 0x223   : > { %3195 = vpush %v3813_v59  ;;  %v1005_v59 = vsel %vm481_vm2, %v3838_v10, 0.0  ;;  %v5506_v10 = vmov 50   ;;  %s3146_s8 = spop %3145 }
 0x224   : > { %3319 = vset.pattern.permute.xlu0 %v5508_v17  ;;  %s3148_s9 = spop %3147 }
 0x225   : > { %v2242_v56 = vpop.permute.xlu1 %2241  ;;  %1568 = vperm.xlu0 %3319, %v3740_v26  }
 0x226   : > { %3197 = vpush %v2242_v56 }
 0x227   : > { %3199 = vpush %v3815_v60  ;;  %v3592_v60 = vmov 46   ;;  %s3150_s15 = spop %3149 }
 0x228   : > { %s3152_s16 = spop %3151 }
 0x229   : > { %1000 = vadd.xlane.f32.xlu1 %v999_v57  ;;  %v2324_v58 = vpop.permute.xlu1 %2323  ;;  %1572 = vperm.xlu0 %3319, %v3745_v32  }
 0x22a   : > { %3201 = vpush %v2324_v58  ;;  %v5492_v58 = vmov 61  }
 0x22b   : > { %s3154_s17 = spop %3153 }
 0x22c   : > { %s3156_s18 = spop %3155 }
 0x22d   : > { %1006 = vadd.xlane.f32.xlu1 %v1005_v59  ;;  %3320 = vset.pattern.permute.xlu0 %v3591_v18 }
 0x22e   : > { %2050 = vperm.xlu0 %3320, %v3742_v28  }
 0x22f   : > { %s3158_s19 = spop %3157 }
 0x230   : > { %s3160_s20 = spop %3159 }
 0x232   : > { %2054 = vperm.xlu0 %3320, %v3747_v33  }
 0x233   : > { %s3162_s27 = spop %3161 }
 0x236   : > { %2058 = vperm.xlu0 %3320, %v3740_v26  }
 0x23a   : > { %2062 = vperm.xlu0 %3320, %v3745_v32  }
 0x23e   : > { %596 = vperm.xlu1 %3332, %v3742_v28   ;;  %3321 = vset.pattern.permute.xlu0 %v3592_v60  ;;  %v4010_v60 = vpop.permute.xlu0 %1971 }
 0x23f   : > { %1273 = vperm.xlu0 %3321, %v3742_v28  }
 0x242   : > { %604 = vperm.xlu1 %3332, %v3740_v26  }
 0x243   : > { %1277 = vperm.xlu0 %3321, %v3747_v33  }
 0x246   : > { %608 = vperm.xlu1 %3332, %v3745_v32  }
 0x247   : > { %1281 = vperm.xlu0 %3321, %v3740_v26  }
 0x24a   : > { %3333 = vset.pattern.permute.xlu1 %v3564_v38  ;;  %v5504_v38 = vmov 58  }
 0x24b   : > { %637 = vperm.xlu1 %3333, %v3742_v28   ;;  %1285 = vperm.xlu0 %3321, %v3745_v32  }
 0x24f   : > { %645 = vperm.xlu1 %3333, %v3740_v26   ;;  %3322 = vset.pattern.permute.xlu0 %v5506_v10 }
 0x250   : > { %1601 = vperm.xlu0 %3322, %v3742_v28  }
 0x253   : > { %649 = vperm.xlu1 %3333, %v3745_v32  }
 0x254   : > { %1609 = vperm.xlu0 %3322, %v3740_v26  }
 0x257   : > { %3334 = vset.pattern.permute.xlu1 %v3594_v19 }
 0x258   : > { %678 = vperm.xlu1 %3334, %v3742_v28   ;;  %3323 = vset.pattern.permute.xlu0 %v5504_v38 }
 0x259   : > { %2095 = vperm.xlu0 %3323, %v3747_v33  }
 0x25c   : > { %682 = vperm.xlu1 %3334, %v3747_v33  }
 0x25d   : > { %2103 = vperm.xlu0 %3323, %v3745_v32  }
 0x260   : > { %3335 = vset.pattern.permute.xlu1 %v3596_v23 }
 0x261   : > { %1027 = vperm.xlu1 %3335, %v3742_v28   ;;  %3324 = vset.pattern.permute.xlu0 %v5502_v24  ;;  %v4058_v24 = vrot.slane %v3872_v51, %v3735_v21 }
 0x262   : > { %1642 = vperm.xlu0 %3324, %v3742_v28  }
 0x265   : > { %1031 = vperm.xlu1 %3335, %v3747_v33  }
 0x266   : > { %1650 = vperm.xlu0 %3324, %v3740_v26  }
 0x268   : > { %v3953_v25 = vpop.xlane.xlu1 %486 }
 0x269   : > { %3336 = vset.pattern.permute.xlu1 %v3594_v19  ;;  %v3603_v19 = vmov 54  }
 0x26a   : > { %686 = vperm.xlu1 %3336, %v3740_v26   ;;  %3325 = vset.pattern.permute.xlu0 %v5500_v30 }
 0x26b   : > { %2136 = vperm.xlu0 %3325, %v3747_v33  }
 0x26c   : > { %v3958_v13 = vpop.permute.xlu1 %511 }
 0x26e   : > { %690 = vperm.xlu1 %3336, %v3745_v32  }
 0x26f   : > { %2140 = vperm.xlu0 %3325, %v3740_v26  }
 0x270   : > { %v3962_v61 = vpop.permute.xlu1 %521 }
 0x272   : > { %3337 = vset.pattern.permute.xlu1 %v3596_v23  ;;  %v5518_v23 = vmov 42  }
 0x273   : > { %1035 = vperm.xlu1 %3337, %v3740_v26   ;;  %3326 = vset.pattern.permute.xlu0 %v5498_v63 }
 0x274   : > { %v3966_v0 = vpop.permute.xlu1 %526  ;;  %1691 = vperm.xlu0 %3326, %v3740_v26  }
 0x277   : > { %1039 = vperm.xlu1 %3337, %v3745_v32  }
 0x278   : > { %v3970_v5 = vpop.permute.xlu1 %555  ;;  %3327 = vset.pattern.permute.xlu0 %v5496_v6  ;;  %v5507_v6 = vmov 63  }
 0x279   : > { %2177 = vperm.xlu0 %3327, %v3747_v33  }
 0x27b   : > { %3338 = vset.pattern.permute.xlu1 %v3565_v39 }
 0x27c   : > { %719 = vperm.xlu1 %3338, %v3742_v28   ;;  %v560_v20 = vpop.permute.xlu1 %559 }
 0x27d   : > { %v575_v42 = vadd.f32 %v3976_v7, %v560_v20  ;;  %2181 = vperm.xlu0 %3327, %v3740_v26  }
 0x27f   : > { %v579_v43 = vand.u32 2147483647, %v575_v42  ;;  %v3605_v42 = vmov 62  }
 0x280   : > { %3339 = vset.pattern.permute.xlu1 %v3566_v45  ;;  %v564_v46 = vpop.permute.xlu1 %563 }
 0x281   : > { %v3988_v15 = vmul.f32 %v3984_v44, %v579_v43  ;;  %v576_v37 = vadd.f32 %v3976_v7, %v564_v46  ;;  %1068 = vperm.xlu1 %3339, %v3742_v28   ;;  %3328 = vset.pattern.permute.xlu0 %v5493_v49 }
 0x282   : > { %1732 = vperm.xlu0 %3328, %v3740_v26  }
 0x283   : > { %v580_v52 = vand.u32 2147483647, %v576_v37  ;;  %v1491_v37 = vsel %vm481_vm2, %v3855_v27, 0.0 }
 0x284   : > { %v568_v55 = vpop.permute.xlu1 %567 }
 0x285   : > { %v3995_v56 = vmul.f32 %v3984_v44, %v580_v52  ;;  %v577_v57 = vadd.f32 %v3976_v7, %v568_v55  ;;  %1072 = vperm.xlu1 %3339, %v3747_v33   ;;  %v494_v55 = vsel %vm324_vm1, %v3861_v31, 0.0 }
 0x286   : > { %3329 = vset.pattern.permute.xlu0 %v5492_v58 }
 0x287   : > { %v581_v59 = vand.u32 2147483647, %v577_v57  ;;  %2218 = vperm.xlu0 %3329, %v3747_v33   ;;  %v5495_v57 = vmov 55  }
 0x289   : > { %v4002_v18 = vmul.f32 %v3984_v44, %v581_v59  ;;  %3340 = vset.pattern.permute.xlu1 %v3565_v39  ;;  %v4015_v39 = vpop.permute.xlu0 %727 }
 0x28a   : > { %731 = vperm.xlu1 %3340, %v3745_v32  }
 0x28b   : > { %2222 = vperm.xlu0 %3329, %v3740_v26  }
 0x28e   : > { %3341 = vset.pattern.permute.xlu1 %v3566_v45  ;;  %v4018_v45 = vpop.permute.xlu0 %1076 }
 0x28f   : > { %1080 = vperm.xlu1 %3341, %v3745_v32   ;;  %2226 = vperm.xlu0 %3329, %v3745_v32  }
 0x292   : > { %v4021_v20 = vpop.xlane.xlu0 %489 }
 0x293   : > { %3373 = vset.pattern.permute.xlu0 %v3603_v19  ;;  %3342 = vset.pattern.permute.xlu1 %v5518_v23 }
 0x294   : > { %1765 = vperm.xlu0 %3373, %v3742_v28  }
 0x296   : > { %v4024_v43 = vpop.xlane.xlu0 %483 }
 0x298   : > { %1769 = vperm.xlu0 %3373, %v3747_v33  }
 0x29a   : > { %v4027_v46 = vpop.xlane.xlu0 %492 }
 0x29c   : > { %1773 = vperm.xlu0 %3373, %v3740_v26  }
 0x29e   : > { %v4033_v52 = vpop.xlane.xlu0 %1009 }
 0x2a0   : > { %1777 = vperm.xlu0 %3373, %v3745_v32  }
 0x2a2   : > { %v4041_v19 = vpop.xlane.xlu0 %1003 }
 0x2a3   : > { %5592 = vst [vmem:[#allocation11_spill] sm:$0xff] %v4041_v19 }
 0x2a4   : > { %3374 = vset.pattern.permute.xlu0 %v3605_v42  ;;  %v495_v42 = vrot.slane %v494_v55, 4 }
 0x2a5   : > { %2255 = vperm.xlu0 %3374, %v3742_v28  }
 0x2a6   : > { %v496_v27 = vadd.f32 %v495_v42, %v494_v55  ;;  %v4046_v49 = vpop.xlane.xlu0 %1495 }
 0x2a7   : > { %5594 = vst [vmem:[#allocation13_spill] sm:$0xff] %v4046_v49 }
 0x2a8   : > { %v497_v31 = vrot.slane %v496_v27, 2 }
 0x2a9   : > { %2259 = vperm.xlu0 %3374, %v3747_v33  }
 0x2aa   : > { %v4052_v63 = vpop.xlane.xlu0 %1501  ;;  %v498_v30 = vadd.f32 %v497_v31, %v496_v27  ;;  %v4068_v27 = vsub.s32 2, %v3699_v9 }
 0x2ab   : > { %5595 = vst [vmem:[#allocation14_spill] sm:$0xff] %v4052_v63  ;;  %v4103_v63 = vrot.slane %v3872_v51, %v4098_v35 }
 0x2ac   : > { %v499_v42 = vrot.slane %v498_v30, 1  ;;  %5596 = vst [vmem:[#allocation15_spill] sm:$0xff] %v4068_v27  ;;  %v4075_v11 = vrot.slane %v3872_v51, %v4068_v27 }
 0x2ad   : > { %2263 = vperm.xlu0 %3374, %v3740_v26  }
 0x2ae   : > { %v4063_v10 = vadd.f32 %v499_v42, %v498_v30  ;;  %v4078_v30 = vsub.s32 3, %v3699_v9  ;;  %v4081_v42 = vstv %s3979_s28  ;;  %s3164_s28 = spop %3163 }
 0x2af   : > { %s3166_s29 = spop %3165 }
 0x2b0   : > { %v502_v31 = vadd.f32 %v4063_v10, %v3953_v25  ;;  %5597 = vst [vmem:[#allocation16_spill] sm:$0xff] %v4078_v30  ;;  %v4088_v25 = vrot.slane %v3872_v51, %v4078_v30  ;;  %s3168_s7 = spop %3167 }
 0x2b1   : > { %2267 = vperm.xlu0 %3374, %v3745_v32  }
 0x2b3   : > { %1492 = vadd.xlane.f32.xlu1 %v1491_v37 }
 0x2b5   : > { %3376 = vset.pattern.permute.xlu0 %v5495_v57 }
 0x2b6   : > { %v4038_v59 = vpop.xlane.xlu1 %1000  ;;  %1810 = vperm.xlu0 %3376, %v3747_v33  }
 0x2b7   : > { %5591 = vst [vmem:[#allocation10_spill] sm:$0xff] %v4038_v59  ;;  %v4111_v59 = vstv %s3148_s9 }
 0x2ba   : > { %v4043_v58 = vpop.xlane.xlu1 %1006  ;;  %1814 = vperm.xlu0 %3376, %v3740_v26  }
 0x2bb   : > { %5593 = vst [vmem:[#allocation12_spill] sm:$0xff] %v4043_v58 }
 0x2be   : > { %v4048_v37 = vpop.permute.xlu1 %596  ;;  %1818 = vperm.xlu0 %3376, %v3745_v32  }
 0x2c2   : > { %v605_v57 = vpop.permute.xlu1 %604  ;;  %3378 = vset.pattern.permute.xlu0 %v5507_v6  ;;  %v534_v6 = vadd.f32 %v4058_v24, %v3822_v1  ;;  %v506_v1 = vmul.f32 0.6, %v502_v31  ;;  %v657_v31 = vadd.f32 %v4088_v25, %v3828_v3  ;;  %v535_v3 = vadd.f32 %v4058_v24, %v3962_v61 }
 0x2c3   : > { %2300 = vperm.xlu0 %3378, %v3747_v33   ;;  %v617_v19 = vadd.f32 %v4075_v11, %v605_v57  ;;  %v503_v61 = vadd.f32 %v4063_v10, %v4021_v20 }
 0x2c4   : > { %1109 = vperm.xlu1 %3342, %v3742_v28   ;;  %v538_v47 = vand.u32 2147483647, %v534_v6  ;;  %v661_v49 = vand.u32 2147483647, %v657_v31  ;;  %v539_v30 = vand.u32 2147483647, %v535_v3 }
 0x2c5   : > { %v507_v57 = vmul.f32 0.6, %v503_v61 }
 0x2c6   : > { %v609_v55 = vpop.permute.xlu1 %608  ;;  %v547_v22 = vmul.f32 %v4081_v42, %v538_v47 }
 0x2c8   : > { %1113 = vperm.xlu1 %3342, %v3747_v33   ;;  %v551_v6 = vadd.f32 %v547_v22, %v506_v1  ;;  %v4105_v22 = vstv %s3146_s8  ;;  %s3170_s8 = spop %3169 }
 0x2c9   : > { %s4620_s9 = spop %3171 }
 0x2ca   : > { %v4061_v38 = vpop.permute.xlu1 %637  ;;  %v592_v47 = vadd.f32 %v3988_v15, %v551_v6  ;;  %v670_v6 = vmul.f32 %v4105_v22, %v661_v49  ;;  %s4637_s12 = spop %3173 }
 0x2cb   : > { %s4640_s14 = spop %3175 }
 0x2cc   : > { %3343 = vset.pattern.permute.xlu1 %v3567_v50  ;;  %v616_v50 = vadd.f32 %v4075_v11, %v3825_v2 }
 0x2ce   : > { %v646_v17 = vpop.permute.xlu1 %645  ;;  %v620_v36 = vand.u32 2147483647, %v616_v50 }
 0x2d0   : > { %v629_v2 = vmul.f32 %v4090_v41, %v620_v36  ;;  %v536_v36 = vadd.f32 %v4058_v24, %v3966_v0  ;;  %v618_v0 = vadd.f32 %v4075_v11, %v609_v55 }
 0x2d2   : > { %v650_v8 = vpop.permute.xlu1 %649  ;;  %v633_v50 = vadd.f32 %v629_v2, %v592_v47  ;;  %v658_v47 = vadd.f32 %v4088_v25, %v646_v17  ;;  %v540_v2 = vand.u32 2147483647, %v536_v36  ;;  %v462_v17 = vld [vmem:[%s5485_s0] sm:$0xff] }
 0x2d3   : > { %vm463_vm3 = vnez %v462_v17 }
 0x2d4   : > { %v674_v27 = vadd.f32 %v670_v6, %v633_v50  ;;  %v662_v50 = vand.u32 2147483647, %v658_v47  ;;  %v659_v6 = vadd.f32 %v4088_v25, %v650_v8  ;;  %v549_v20 = vmul.f32 %v4081_v42, %v540_v2  ;;  %v761_v47 = vpop.permute.xlu0 %760 }
 0x2d5   : > { %v1497_v2 = vsel %vm481_vm2, %v3841_v12, 0.0 }
 0x2d6   : > { %v663_v61 = vand.u32 2147483647, %v659_v6 }
 0x2d7   : > { %v4092_v23 = vpop.permute.xlu1 %678 }
 0x2db   : > { %v683_v1 = vpop.permute.xlu1 %682 }
 0x2dc   : > { %v698_v15 = vadd.f32 %v4103_v63, %v683_v1  ;;  %v548_v1 = vmul.f32 %v4081_v42, %v539_v30  ;;  %v622_v30 = vand.u32 2147483647, %v618_v0 }
 0x2de   : > { %v702_v58 = vand.u32 2147483647, %v698_v15  ;;  %v621_v15 = vand.u32 2147483647, %v617_v19 }
 0x2e0   : > { %v711_v31 = vmul.f32 %v4111_v59, %v702_v58  ;;  %v4117_v62 = vpop.permute.xlu1 %1027  ;;  %v504_v58 = vadd.f32 %v4063_v10, %v4027_v46  ;;  %v630_v19 = vmul.f32 %v4090_v41, %v621_v15  ;;  %v671_v46 = vmul.f32 %v4105_v22, %v662_v50 }
 0x2e1   : > { %v631_v15 = vmul.f32 %v4090_v41, %v622_v30  ;;  %v615_v30 = vadd.f32 %v4075_v11, %v4048_v37 }
 0x2e2   : > { %v4122_v49 = vadd.f32 %v711_v31, %v674_v27  ;;  %v552_v27 = vadd.f32 %v548_v1, %v507_v57  ;;  %v508_v55 = vmul.f32 0.6, %v504_v58  ;;  %v5528_v58 = vmov 0  }
 0x2e3   : > { %v574_v57 = vadd.f32 %v3976_v7, %v3970_v5 }
 0x2e4   : > { %5599 = vst [vmem:[#allocation18_spill] sm:$0xff] %v4122_v49  ;;  %v4126_v3 = vpop.permute.xlu1 %1031  ;;  %v593_v31 = vadd.f32 %v3995_v56, %v552_v27  ;;  %v533_v49 = vadd.f32 %v4058_v24, %v3958_v13  ;;  %v4145_v56 = vsel %vm463_vm3, 16843009, %v5528_v58  ;;  %v672_v13 = vmul.f32 %v4105_v22, %v663_v61 }
 0x2e5   : > { %5600 = vst [vmem:[#allocation19_spill] sm:$0xff] %v4126_v3  ;;  %v553_v3 = vadd.f32 %v549_v20, %v508_v55  ;;  %v1981_v27 = vsel %vm481_vm2, %v3858_v29, 0.0  ;;  %v4163_v55 = vsub.s32 6, %v3699_v9  ;;  %v656_v29 = vadd.f32 %v4088_v25, %v4061_v38 }
 0x2e6   : > { %v634_v1 = vadd.f32 %v630_v19, %v593_v31  ;;  %v537_v20 = vand.u32 2147483647, %v533_v49  ;;  %v842_v19 = vunpack.c.0.s8 %v4145_v56  ;;  %v4165_v49 = vpop.permute.xlu0 %772  ;;  %v4183_v38 = vsub.s32 5, %v3699_v9 }
 0x2e7   : > { %v594_v50 = vadd.f32 %v4002_v18, %v553_v3  ;;  %v501_v3 = vadd.f32 %v4063_v10, %v4024_v43  ;;  %5601 = vst [vmem:[#allocation20_spill] sm:$0xff] %v4163_v55  ;;  %v1984_v10 = vsel %vm481_vm2, %v4010_v60, 0.0 }
 0x2e8   : > { %v675_v24 = vadd.f32 %v671_v46, %v634_v1  ;;  %v4173_v46 = vsub.s32 7, %v3699_v9  ;;  %v846_v43 = vpack.c.b16 %v842_v19, %v842_v19  ;;  %v546_v61 = vmul.f32 %v4081_v42, %v537_v20  ;;  %5603 = vst [vmem:[#allocation22_spill] sm:$0xff] %v4183_v38 }
 0x2e9   : > { %v687_v36 = vpop.permute.xlu1 %686  ;;  %v635_v5 = vadd.f32 %v631_v15, %v594_v50  ;;  %v505_v15 = vmul.f32 0.6, %v501_v3  ;;  %v660_v42 = vand.u32 2147483647, %v656_v29 }
 0x2ea   : > { %v699_v8 = vadd.f32 %v4103_v63, %v687_v36  ;;  %v578_v36 = vand.u32 2147483647, %v574_v57  ;;  %5602 = vst [vmem:[#allocation21_spill] sm:$0xff] %v4173_v46  ;;  %v4185_v25 = vpop.xlane.xlu0 %1988  ;;  %v847_v50 = vpack.c.b8 %v846_v43, %v846_v43  ;;  %v4215_v43 = vstv %s3154_s17 }
 0x2eb   : > { %v676_v31 = vadd.f32 %v672_v13, %v635_v5  ;;  %5604 = vst [vmem:[#allocation23_spill] sm:$0xff] %v4185_v25  ;;  %v4201_v13 = vrot.slane %v3872_v51, %v4183_v38 }
 0x2ec   : > { %v703_v0 = vand.u32 2147483647, %v699_v8  ;;  %1498 = vadd.xlane.f32.xlu1 %v1497_v2  ;;  %v619_v8 = vand.u32 2147483647, %v615_v30  ;;  %v697_v2 = vadd.f32 %v4103_v63, %v4092_v23  ;;  %v587_v60 = vmul.f32 %v3984_v44, %v578_v36 }
 0x2ed   : > { %v691_v6 = vpop.permute.xlu1 %690  ;;  %v4196_v23 = vrot.slane %v3872_v51, %v4173_v46  ;;  %vm854_vm4 = vnez %v847_v50  ;;  %v4211_v36 = vstv %s3152_s16  ;;  %v5609_v50 = vmov 42  }
 0x2ee   : > { %v712_v12 = vmul.f32 %v4111_v59, %v703_v0  ;;  %v700_v17 = vadd.f32 %v4103_v63, %v691_v6  ;;  %v4189_v0 = vrot.slane %v3872_v51, %v4163_v55  ;;  %v550_v63 = vadd.f32 %v546_v61, %v505_v15 }
 0x2ef   : > { %v628_v9 = vmul.f32 %v4090_v41, %v619_v8  ;;  %v701_v6 = vand.u32 2147483647, %v697_v2  ;;  %v858_v3 = vsel %vm854_vm4, 16843009, %v5528_v58  ;;  %v5605_v2 = vmov 0 }
 0x2f0   : > { %v4158_v7 = vadd.f32 %v712_v12, %v675_v24  ;;  %v704_v18 = vand.u32 2147483647, %v700_v17  ;;  %1982 = vadd.xlane.f32.xlu1 %v1981_v27  ;;  %v802_v24 = vpop.permute.xlu0 %801  ;;  %v779_v12 = vadd.f32 %v4189_v0, %v761_v47  ;;  %v591_v44 = vadd.f32 %v587_v60, %v550_v63 }
 0x2f1   : > { %v669_v17 = vmul.f32 %v4105_v22, %v660_v42  ;;  %v820_v27 = vadd.f32 %v4196_v23, %v802_v24  ;;  %v710_v30 = vmul.f32 %v4111_v59, %v701_v6  ;;  %v4209_v47 = vstv %s3150_s15  ;;  %s4652_s15 = spop %3177 }
 0x2f2   : > { %v713_v11 = vmul.f32 %v4111_v59, %v704_v18  ;;  %v4170_v37 = vpop.permute.xlu1 %1035  ;;  %v632_v19 = vadd.f32 %v628_v9, %v591_v44  ;;  %v783_v5 = vand.u32 2147483647, %v779_v12  ;;  %v5610_v63 = vmov 39   ;;  %s4657_s16 = spop %3179 }
 0x2f3   : > { %v824_v22 = vand.u32 2147483647, %v820_v27  ;;  %v1990_v9 = vsel %vm481_vm2, %v3844_v14, 0.0  ;;  %v3609_v6 = vmov 43   ;;  %v5616_v27 = vmov 48   ;;  %s4667_s17 = spop %3181 }
 0x2f4   : > { %v4180_v1 = vadd.f32 %v713_v11, %v676_v31  ;;  %1985 = vadd.xlane.f32.xlu1 %v1984_v10  ;;  %v673_v18 = vadd.f32 %v669_v17, %v632_v19  ;;  %v862_v11 = vunpack.c.0.s8 %v858_v3  ;;  %v792_v59 = vmul.f32 %v4211_v36, %v783_v5  ;;  %v4239_v24 = vpop.permute.xlu0 %1191 }
 0x2f5   : > { %v833_v61 = vmul.f32 %v4215_v43, %v824_v22  ;;  %v5614_v17 = vmov 44  }
 0x2f6   : > { %v4192_v57 = vpop.permute.xlu1 %1039  ;;  %v714_v29 = vadd.f32 %v710_v30, %v673_v18  ;;  %vm4219_vm5 = vcmp.ne.s32.totalorder %v862_v11, 0  ;;  %v5621_v11 = vmov 49  }
 0x2f7   : > { %v5606_v2 = vsel %vm4219_vm5, 4294967295, %v5605_v2 }
 0x2f8   : > { %5607 = vst [vmem:[#allocation24_spill] sm:$0xff] %v5606_v2  ;;  %v4243_v12 = vpop.permute.xlu0 %1523 }
 0x2f9   : > { %5611 = vst [vmem:[#allocation26_spill] sm:$0xff] %v4243_v12 }
 0x2fb   : > { %v720_v20 = vpop.permute.xlu1 %719 }
 0x2fc   : > { %v738_v41 = vadd.f32 %v4201_v13, %v720_v20  ;;  %v4247_v14 = vpop.permute.xlu0 %1527 }
 0x2fd   : > { %5612 = vst [vmem:[#allocation27_spill] sm:$0xff] %v4247_v14 }
 0x2fe   : > { %v742_v51 = vand.u32 2147483647, %v738_v41 }
 0x300   : > { %v751_v31 = vmul.f32 %v4209_v47, %v742_v51  ;;  %v4250_v44 = vpop.permute.xlu0 %2009  ;;  %v4262_v30 = vpop.permute.xlu1 %1068  ;;  %v5618_v51 = vmov 56  }
 0x301   : > { %5613 = vst [vmem:[#allocation28_spill] sm:$0xff] %v4250_v44  ;;  %v5641_v44 = vmov 52  }
 0x302   : > { %v755_v10 = vadd.f32 %v751_v31, %v714_v29  ;;  %v5620_v29 = vmov 45  }
 0x304   : > { %v796_v8 = vadd.f32 %v792_v59, %v755_v10  ;;  %v4254_v20 = vpop.permute.xlu0 %2017  ;;  %v4269_v5 = vpop.permute.xlu1 %1072 }
 0x305   : > { %764 = vperm.xlu1 %3343, %v3747_v33   ;;  %5615 = vst [vmem:[#allocation29_spill] sm:$0xff] %v4254_v20  ;;  %v740_v20 = vadd.f32 %v4201_v13, %v4015_v39 }
 0x306   : > { %v837_v15 = vadd.f32 %v833_v61, %v796_v8 }
 0x307   : > { %v744_v2 = vand.u32 2147483647, %v740_v20 }
 0x308   : > { %v4225_v60 = vsel %vm4219_vm5, %v837_v15, -1e+30  ;;  %v4259_v19 = vpop.permute.xlu0 %1236 }
 0x309   : > { %5608 = vst [vmem:[#allocation25_spill] sm:$0xff] %v4225_v60  ;;  %768 = vperm.xlu1 %3343, %v3740_v26   ;;  %v874_v42 = vsel %vm324_vm1, %v4225_v60, -inf  ;;  %v732_v3 = vpop.permute.xlu1 %731  ;;  %v5633_v60 = vmov 51  }
 0x30a   : > { %875 = vmax.xlane.f32.xlu0 %v874_v42  ;;  %v5626_v42 = vmov 50  }
 0x30c   : > { %v4265_v41 = vpop.permute.xlu0 %1240 }
 0x30d   : > { %3344 = vset.pattern.permute.xlu1 %v5609_v50 }
 0x30e   : > { %1117 = vperm.xlu1 %3344, %v3740_v26   ;;  %v4279_v31 = vpop.permute.xlu1 %1080 }
 0x310   : > { %v4271_v18 = vpop.permute.xlu0 %1244 }
 0x311   : > { %5617 = vst [vmem:[#allocation30_spill] sm:$0xff] %v4271_v18 }
 0x312   : > { %1121 = vperm.xlu1 %3344, %v3745_v32  }
 0x314   : > { %v4275_v22 = vpop.permute.xlu0 %1568 }
 0x315   : > { %5619 = vst [vmem:[#allocation31_spill] sm:$0xff] %v4275_v22 }
 0x316   : > { %3345 = vset.pattern.permute.xlu1 %v5610_v63 }
 0x318   : > { %v4282_v59 = vpop.permute.xlu0 %1572 }
 0x319   : > { %5622 = vst [vmem:[#allocation32_spill] sm:$0xff] %v4282_v59  ;;  %v844_v59 = vunpack.c.2.s8 %v4145_v56 }
 0x31b   : > { %v850_v25 = vpack.c.b16 %v844_v59, %v844_v59 }
 0x31c   : > { %v4288_v61 = vpop.permute.xlu0 %2050 }
 0x31d   : > { %5624 = vst [vmem:[#allocation34_spill] sm:$0xff] %v4288_v61  ;;  %v851_v12 = vpack.c.b8 %v850_v25, %v850_v25 }
 0x31f   : > { %vm856_vm6 = vnez %v851_v12 }
 0x320   : > { %v4294_v15 = vpop.permute.xlu0 %2054 }
 0x321   : > { %5625 = vst [vmem:[#allocation35_spill] sm:$0xff] %v4294_v15 }
 0x336   : > { %1991 = vadd.xlane.f32.xlu1 %v1990_v9 }
 0x340   : > { %v4285_v10 = vpop.xlane.xlu1 %1492 }
 0x341   : > { %5623 = vst [vmem:[#allocation33_spill] sm:$0xff] %v4285_v10 }
 0x344   : > { %v4290_v8 = vpop.permute.xlu1 %1109 }
 0x347   : > { %805 = vperm.xlu1 %3345, %v3747_v33  }
 0x348   : > { %v4297_v50 = vpop.permute.xlu1 %1113 }
 0x34b   : > { %3346 = vset.pattern.permute.xlu1 %v3609_v6 }
 0x34c   : > { %1150 = vperm.xlu1 %3346, %v3742_v28  }
 0x350   : > { %1154 = vperm.xlu1 %3346, %v3747_v33  }
 0x354   : > { %3347 = vset.pattern.permute.xlu1 %v5610_v63  ;;  %v4300_v63 = vpop.permute.xlu0 %2058 }
 0x355   : > { %809 = vperm.xlu1 %3347, %v3740_v26   ;;  %5627 = vst [vmem:[#allocation36_spill] sm:$0xff] %v4300_v63  ;;  %v741_v63 = vadd.f32 %v4201_v13, %v732_v3  ;;  %v782_v3 = vadd.f32 %v4189_v0, %v4165_v49 }
 0x357   : > { %v786_v12 = vand.u32 2147483647, %v782_v3 }
 0x359   : > { %813 = vperm.xlu1 %3347, %v3745_v32  }
 0x35d   : > { %3348 = vset.pattern.permute.xlu1 %v3609_v6  ;;  %v5629_v6 = vmov 58  }
 0x35e   : > { %1158 = vperm.xlu1 %3348, %v3740_v26  }
 0x362   : > { %1162 = vperm.xlu1 %3348, %v3745_v32  }
 0x366   : > { %3349 = vset.pattern.permute.xlu1 %v5614_v17 }
 0x367   : > { %1195 = vperm.xlu1 %3349, %v3747_v33  }
 0x36b   : > { %3350 = vset.pattern.permute.xlu1 %v5616_v27 }
 0x36c   : > { %1519 = vperm.xlu1 %3350, %v3742_v28  }
 0x370   : > { %3351 = vset.pattern.permute.xlu1 %v5614_v17  ;;  %v4307_v17 = vpop.permute.xlu0 %2062 }
 0x371   : > { %1199 = vperm.xlu1 %3351, %v3740_v26   ;;  %5630 = vst [vmem:[#allocation38_spill] sm:$0xff] %v4307_v17 }
 0x375   : > { %1203 = vperm.xlu1 %3351, %v3745_v32  }
 0x379   : > { %3352 = vset.pattern.permute.xlu1 %v5616_v27  ;;  %v4302_v9 = vpop.xlane.xlu1 %1498 }
 0x37a   : > { %1531 = vperm.xlu1 %3352, %v3745_v32   ;;  %5628 = vst [vmem:[#allocation37_spill] sm:$0xff] %v4302_v9 }
 0x37d   : > { %v4309_v27 = vpop.xlane.xlu1 %1982 }
 0x37e   : > { %3353 = vset.pattern.permute.xlu1 %v5618_v51  ;;  %5631 = vst [vmem:[#allocation39_spill] sm:$0xff] %v4309_v27 }
 0x37f   : > { %2013 = vperm.xlu1 %3353, %v3747_v33  }
 0x383   : > { %3354 = vset.pattern.permute.xlu1 %v5620_v29  ;;  %v4312_v29 = vpop.permute.xlu0 %1273 }
 0x384   : > { %1232 = vperm.xlu1 %3354, %v3742_v28  }
 0x388   : > { %3355 = vset.pattern.permute.xlu1 %v5621_v11  ;;  %v4314_v11 = vpop.xlane.xlu1 %1985 }
 0x389   : > { %1560 = vperm.xlu1 %3355, %v3742_v28   ;;  %5632 = vst [vmem:[#allocation40_spill] sm:$0xff] %v4314_v11 }
 0x38c   : > { %v4319_v58 = vpop.permute.xlu1 %764 }
 0x38d   : > { %1564 = vperm.xlu1 %3355, %v3747_v33  }
 0x390   : > { %v769_v27 = vpop.permute.xlu1 %768 }
 0x391   : > { %3356 = vset.pattern.permute.xlu1 %v5618_v51  ;;  %v3610_v51 = vmov 47   ;;  %v781_v14 = vadd.f32 %v4189_v0, %v769_v27 }
 0x392   : > { %2021 = vperm.xlu1 %3356, %v3745_v32  }
 0x393   : > { %v785_v18 = vand.u32 2147483647, %v781_v14  ;;  %v5644_v14 = vmov 0  }
 0x394   : > { %v4330_v9 = vpop.permute.xlu1 %1117  ;;  %v860_v20 = vsel %vm856_vm6, 16843009, %v5644_v14 }
 0x396   : > { %3357 = vset.pattern.permute.xlu1 %v5626_v42  ;;  %v4317_v42 = vpop.permute.xlu0 %1277 }
 0x397   : > { %1605 = vperm.xlu1 %3357, %v3747_v33  }
 0x398   : > { %v4335_v15 = vpop.permute.xlu1 %1121 }
 0x399   : > { %5637 = vst [vmem:[#allocation44_spill] sm:$0xff] %v4335_v15 }
 0x39a   : > { %v4324_v10 = vpop.permute.xlu0 %1281 }
 0x39b   : > { %1613 = vperm.xlu1 %3357, %v3745_v32   ;;  %5634 = vst [vmem:[#allocation41_spill] sm:$0xff] %v4324_v10 }
 0x39e   : > { %v4328_v11 = vpop.permute.xlu0 %1285 }
 0x39f   : > { %3358 = vset.pattern.permute.xlu1 %v5629_v6  ;;  %5635 = vst [vmem:[#allocation42_spill] sm:$0xff] %v4328_v11 }
 0x3a0   : > { %2091 = vperm.xlu1 %3358, %v3742_v28  }
 0x3a2   : > { %v4333_v17 = vpop.permute.xlu0 %1601 }
 0x3a3   : > { %5636 = vst [vmem:[#allocation43_spill] sm:$0xff] %v4333_v17  ;;  %v845_v17 = vunpack.c.3.s8 %v4145_v56 }
 0x3a4   : > { %3359 = vset.pattern.permute.xlu1 %v3610_v51 }
 0x3a5   : > { %1314 = vperm.xlu1 %3359, %v3742_v28  }
 0x3a6   : > { %v4341_v61 = vpop.permute.xlu0 %1609 }
 0x3a7   : > { %5639 = vst [vmem:[#allocation46_spill] sm:$0xff] %v4341_v61  ;;  %v852_v61 = vpack.c.b16 %v845_v17, %v845_v17  ;;  %v753_v17 = vmul.f32 %v4209_v47, %v744_v2 }
 0x3a9   : > { %1318 = vperm.xlu1 %3359, %v3747_v33   ;;  %v853_v59 = vpack.c.b8 %v852_v61, %v852_v61  ;;  %v794_v61 = vmul.f32 %v4211_v36, %v785_v18  ;;  %v757_v49 = vadd.f32 %v753_v17, %v4158_v7 }
 0x3ab   : > { %vm857_vm7 = vnez %v853_v59  ;;  %v864_v59 = vunpack.c.0.s8 %v860_v20  ;;  %v798_v15 = vadd.f32 %v794_v61, %v757_v49 }
 0x3ac   : > { %v861_v2 = vsel %vm857_vm7, 16843009, %v5644_v14 }
 0x3ad   : > { %3360 = vset.pattern.permute.xlu1 %v5633_v60  ;;  %v865_v3 = vunpack.c.0.s8 %v861_v2  ;;  %vm4383_vm8 = vcmp.ne.s32.totalorder %v864_v59, 0  ;;  %v5656_v59 = vmov 53  }
 0x3ae   : > { %1646 = vperm.xlu1 %3360, %v3747_v33  }
 0x3af   : > { %vm4400_vm9 = vcmp.ne.s32.totalorder %v865_v3, 0 }
 0x3b2   : > { %3361 = vset.pattern.permute.xlu1 %v5629_v6 }
 0x3b3   : > { %2099 = vperm.xlu1 %3361, %v3740_v26  }
 0x3b7   : > { %3362 = vset.pattern.permute.xlu1 %v3610_v51  ;;  %v5640_v51 = vmov 59  }
 0x3b8   : > { %1322 = vperm.xlu1 %3362, %v3740_v26  }
 0x3bc   : > { %1326 = vperm.xlu1 %3362, %v3745_v32  }
 0x3c0   : > { %3363 = vset.pattern.permute.xlu1 %v5633_v60  ;;  %v4350_v60 = vpop.permute.xlu0 %2095 }
 0x3c1   : > { %1654 = vperm.xlu1 %3363, %v3745_v32   ;;  %5642 = vst [vmem:[#allocation47_spill] sm:$0xff] %v4350_v60  ;;  %v745_v60 = vand.u32 2147483647, %v741_v63 }
 0x3c3   : > { %v4339_v6 = vpop.xlane.xlu1 %1991  ;;  %v754_v25 = vmul.f32 %v4209_v47, %v745_v60 }
 0x3c4   : > { %5638 = vst [vmem:[#allocation45_spill] sm:$0xff] %v4339_v6  ;;  %v4362_v10 = vpop.permute.xlu0 %2103 }
 0x3c5   : > { %3364 = vset.pattern.permute.xlu1 %v5640_v51  ;;  %5643 = vst [vmem:[#allocation48_spill] sm:$0xff] %v4362_v10  ;;  %v758_v60 = vadd.f32 %v754_v25, %v4180_v1  ;;  %v5650_v25 = vmov 60  }
 0x3c6   : > { %2132 = vperm.xlu1 %3364, %v3742_v28  }
 0x3c7   : > { %v4346_v22 = vpop.permute.xlu1 %805 }
 0x3c8   : > { %v4373_v27 = vpop.permute.xlu0 %1642 }
 0x3c9   : > { %5645 = vst [vmem:[#allocation49_spill] sm:$0xff] %v4373_v27  ;;  %v795_v27 = vmul.f32 %v4211_v36, %v786_v12  ;;  %v5652_v12 = vmov 0 }
 0x3ca   : > { %3365 = vset.pattern.permute.xlu1 %v5641_v44  ;;  %v5653_v12 = vsel %vm4400_vm9, 4294967295, %v5652_v12 }
 0x3cb   : > { %1683 = vperm.xlu1 %3365, %v3742_v28   ;;  %v4353_v6 = vpop.permute.xlu1 %1150  ;;  %v799_v20 = vadd.f32 %v795_v27, %v758_v60  ;;  %5654 = vst [vmem:[#allocation53_spill] sm:$0xff] %v5653_v12 }
 0x3cf   : > { %1687 = vperm.xlu1 %3365, %v3747_v33   ;;  %v4360_v11 = vpop.permute.xlu1 %1154 }
 0x3d3   : > { %3366 = vset.pattern.permute.xlu1 %v5640_v51 }
 0x3d4   : > { %2144 = vperm.xlu1 %3366, %v3745_v32   ;;  %v810_v39 = vpop.permute.xlu1 %809 }
 0x3d5   : > { %v822_v63 = vadd.f32 %v4196_v23, %v810_v39 }
 0x3d7   : > { %v826_v51 = vand.u32 2147483647, %v822_v63  ;;  %v5646_v63 = vmov 0 }
 0x3d8   : > { %3367 = vset.pattern.permute.xlu1 %v5641_v44  ;;  %v814_v10 = vpop.permute.xlu1 %813  ;;  %v5647_v63 = vsel %vm4383_vm8, 4294967295, %v5646_v63  ;;  %v4387_v44 = vpop.permute.xlu0 %1650 }
 0x3d9   : > { %v835_v18 = vmul.f32 %v4215_v43, %v826_v51  ;;  %v823_v39 = vadd.f32 %v4196_v23, %v814_v10  ;;  %1695 = vperm.xlu1 %3367, %v3745_v32   ;;  %5648 = vst [vmem:[#allocation50_spill] sm:$0xff] %v5647_v63  ;;  %5649 = vst [vmem:[#allocation51_spill] sm:$0xff] %v4387_v44  ;;  %v5681_v63 = vld [vmem:[#allocation16_spill] sm:$0xff] }
 0x3db   : > { %v827_v7 = vand.u32 2147483647, %v823_v39  ;;  %v839_v17 = vadd.f32 %v835_v18, %v798_v15 }
 0x3dc   : > { %v4413_v60 = vpop.permute.xlu0 %2136 }
 0x3dd   : > { %v836_v1 = vmul.f32 %v4215_v43, %v827_v7  ;;  %3368 = vset.pattern.permute.xlu1 %v5650_v25  ;;  %v4391_v61 = vpop.permute.xlu1 %1158  ;;  %v4395_v10 = vsel %vm4383_vm8, %v839_v17, -1e+30  ;;  %5657 = vst [vmem:[#allocation55_spill] sm:$0xff] %v4413_v60  ;;  %v5667_v60 = vmov 63  }
 0x3de   : > { %5651 = vst [vmem:[#allocation52_spill] sm:$0xff] %v4395_v10  ;;  %2173 = vperm.xlu1 %3368, %v3742_v28   ;;  %v880_v15 = vsel %vm324_vm1, %v4395_v10, -inf }
 0x3df   : > { %881 = vmax.xlane.f32.xlu0 %v880_v15  ;;  %v840_v49 = vadd.f32 %v836_v1, %v799_v20  ;;  %v1011_v1 = vsel %vm324_vm1, %v3864_v34, 0.0 }
 0x3e0   : > { %v4419_v39 = vpop.permute.xlu0 %2140 }
 0x3e1   : > { %v4404_v51 = vpop.permute.xlu1 %1162  ;;  %v4408_v2 = vsel %vm4400_vm9, %v840_v49, -1e+30  ;;  %5658 = vst [vmem:[#allocation56_spill] sm:$0xff] %v4419_v39  ;;  %v1503_v49 = vsel %vm324_vm1, %v3867_v40, 0.0 }
 0x3e2   : > { %5655 = vst [vmem:[#allocation54_spill] sm:$0xff] %v4408_v2  ;;  %3369 = vset.pattern.permute.xlu1 %v5656_v59  ;;  %v883_v27 = vsel %vm324_vm1, %v4408_v2, -inf  ;;  %v1504_v2 = vrot.slane %v1503_v49, 4 }
 0x3e3   : > { %1724 = vperm.xlu1 %3369, %v3742_v28   ;;  %884 = vmax.xlane.f32.xlu0 %v883_v27 }
 0x3e4   : > { %v4425_v7 = vpop.permute.xlu0 %1691 }
 0x3e5   : > { %5660 = vst [vmem:[#allocation58_spill] sm:$0xff] %v4425_v7 }
 0x3e6   : > { %v4416_v18 = vpop.permute.xlu1 %1195 }
 0x3e7   : > { %1728 = vperm.xlu1 %3369, %v3747_v33   ;;  %v1012_v33 = vrot.slane %v1011_v1, 4 }
 0x3e8   : > { %v4435_v15 = vpop.permute.xlu0 %2177 }
 0x3e9   : > { %5661 = vst [vmem:[#allocation59_spill] sm:$0xff] %v4435_v15  ;;  %v1013_v27 = vadd.f32 %v1012_v33, %v1011_v1  ;;  %v1505_v15 = vadd.f32 %v1504_v2, %v1503_v49  ;;  %v4460_v2 = vrot.slane %v3875_v53, %v3706_v16 }
 0x3eb   : > { %3370 = vset.pattern.permute.xlu1 %v5650_v25  ;;  %v4422_v3 = vpop.permute.xlu1 %1519  ;;  %v5662_v25 = vmov 61   ;;  %v1506_v1 = vrot.slane %v1505_v15, 2 }
 0x3ec   : > { %5659 = vst [vmem:[#allocation57_spill] sm:$0xff] %v4422_v3  ;;  %2185 = vperm.xlu1 %3370, %v3745_v32   ;;  %v5664_v3 = vmov 55   ;;  %v4446_v7 = vpop.permute.xlu0 %2181 }
 0x3ed   : > { %5665 = vst [vmem:[#allocation61_spill] sm:$0xff] %v4446_v7  ;;  %v1507_v7 = vadd.f32 %v1506_v1, %v1505_v15 }
 0x3f0   : > { %3371 = vset.pattern.permute.xlu1 %v5656_v59  ;;  %v4428_v17 = vpop.permute.xlu1 %1199  ;;  %v1993_v59 = vsel %vm324_vm1, %v3870_v48, 0.0  ;;  %v4453_v44 = vpop.permute.xlu0 %1732 }
 0x3f1   : > { %1736 = vperm.xlu1 %3371, %v3745_v32   ;;  %v1994_v34 = vrot.slane %v1993_v59, 4  ;;  %5668 = vst [vmem:[#allocation63_spill] sm:$0xff] %v4453_v44  ;;  %v4523_v44 = vstv %s3156_s18  ;;  %s4677_s18 = spop %3183 }
 0x3f3   : > { %v1995_v39 = vadd.f32 %v1994_v34, %v1993_v59  ;;  %v1508_v59 = vrot.slane %v1507_v7, 1  ;;  %v739_v34 = vadd.f32 %v4201_v13, %v3832_v4 }
 0x3f4   : > { %v4433_v20 = vpop.permute.xlu1 %1203  ;;  %v4462_v49 = vpop.permute.xlu0 %2218 }
 0x3f5   : > { %3372 = vset.pattern.permute.xlu1 %v5662_v25  ;;  %v1014_v25 = vrot.slane %v1013_v27, 2  ;;  %v1996_v33 = vrot.slane %v1995_v39, 2  ;;  %5669 = vst [vmem:[#allocation64_spill] sm:$0xff] %v4462_v49  ;;  %v743_v13 = vand.u32 2147483647, %v739_v34 }
 0x3f6   : > { %2214 = vperm.xlu1 %3372, %v3742_v28  }
 0x3f7   : > { %v1015_v48 = vadd.f32 %v1014_v25, %v1013_v27  ;;  %v1997_v12 = vadd.f32 %v1996_v33, %v1995_v39  ;;  %v4475_v39 = vrot.slane %v3875_v53, %v3735_v21  ;;  %v4491_v33 = vrot.slane %v3875_v53, %v4098_v35 }
 0x3f8   : > { %v4487_v1 = vpop.permute.xlu0 %2222  ;;  %v4521_v49 = vmul.f32 %v4209_v47, %v743_v13  ;;  %v4548_v35 = vstv %s3164_s28 }
 0x3f9   : > { %v4443_v10 = vpop.permute.xlu1 %1531  ;;  %v1998_v27 = vrot.slane %v1997_v12, 1  ;;  %5673 = vst [vmem:[#allocation68_spill] sm:$0xff] %v4487_v1  ;;  %v5680_v1 = vld [vmem:[#allocation19_spill] sm:$0xff] }
 0x3fa   : > { %5663 = vst [vmem:[#allocation60_spill] sm:$0xff] %v4443_v10  ;;  %3375 = vset.pattern.permute.xlu1 %v5664_v3  ;;  %v1016_v3 = vrot.slane %v1015_v48, 1 }
 0x3fb   : > { %1806 = vperm.xlu1 %3375, %v3742_v28   ;;  %v4485_v4 = vadd.f32 %v1998_v27, %v1997_v12  ;;  %v1087_v12 = vadd.f32 %v4460_v2, %v4262_v30  ;;  %v5677_v27 = vld [vmem:[#allocation15_spill] sm:$0xff] }
 0x3fc   : > { %v4511_v34 = vrot.slane %v3875_v53, %v5677_v27 }
 0x3fd   : > { %5672 = vst [vmem:[#allocation67_spill] sm:$0xff] %v4485_v4  ;;  %v1091_v13 = vand.u32 2147483647, %v1087_v12  ;;  %v4553_v12 = vstv %s3168_s7 }
 0x3fe   : > { %v4449_v40 = vpop.permute.xlu1 %2013  ;;  %v1128_v4 = vadd.f32 %v4511_v34, %v4290_v8  ;;  %v1088_v8 = vadd.f32 %v4460_v2, %v4269_v5  ;;  %v1129_v5 = vadd.f32 %v4511_v34, %v4297_v50  ;;  %v4568_v50 = vrot.slane %v3875_v53, %v4163_v55 }
 0x3ff   : > { %5666 = vst [vmem:[#allocation62_spill] sm:$0xff] %v4449_v40  ;;  %3377 = vset.pattern.permute.xlu1 %v5667_v60  ;;  %v4464_v60 = vadd.f32 %v1016_v3, %v1015_v48  ;;  %v4483_v48 = vadd.f32 %v1508_v59, %v1507_v7  ;;  %v4503_v7 = vstv %s3158_s19  ;;  %v4507_v59 = vrot.slane %v3875_v53, %v4183_v38  ;;  %s4688_s19 = spop %3185 }
 0x400   : > { %2296 = vperm.xlu1 %3377, %v3742_v28   ;;  %v1047_v40 = vadd.f32 %v4475_v39, %v5680_v1  ;;  %v5683_v1 = vld [vmem:[#allocation10_spill] sm:$0xff] }
 0x401   : > { %v1021_v15 = vadd.f32 %v4464_v60, %v4033_v52  ;;  %v4495_v52 = vrot.slane %v3877_v54, %v3735_v21  ;;  %v1018_v47 = vadd.f32 %v4464_v60, %v5683_v1  ;;  %v4551_v1 = vstv %s3166_s29 }
 0x402   : > { %v1051_v27 = vand.u32 2147483647, %v1047_v40  ;;  %v1092_v40 = vand.u32 2147483647, %v1088_v8 }
 0x403   : > { %v4455_v10 = vpop.permute.xlu1 %1232  ;;  %5674 = vst [vmem:[#allocation69_spill] sm:$0xff] %v4495_v52  ;;  %v4544_v52 = vpop.permute.xlu0 %2226 }
 0x404   : > { %2304 = vperm.xlu1 %3377, %v3740_v26   ;;  %v1089_v26 = vadd.f32 %v4460_v2, %v4018_v45  ;;  %5684 = vst [vmem:[#allocation19_spill] sm:$0xff] %v4544_v52  ;;  %v1210_v52 = vadd.f32 %v4491_v33, %v4239_v24  ;;  %v1060_v24 = vmul.f32 %v4523_v44, %v1051_v27 }
 0x406   : > { %v1093_v45 = vand.u32 2147483647, %v1089_v26  ;;  %v843_v26 = vunpack.c.1.s8 %v4145_v56  ;;  %v4529_v56 = vrot.slane %v3875_v53, %v5681_v63 }
 0x408   : > { %2308 = vperm.xlu1 %3377, %v3745_v32   ;;  %v4467_v28 = vpop.permute.xlu1 %1560  ;;  %v1046_v32 = vadd.f32 %v4475_v39, %v4117_v62  ;;  %v5675_v62 = vld [vmem:[#allocation9_spill] sm:$0xff]  ;;  %v848_v38 = vpack.c.b16 %v843_v26, %v843_v26  ;;  %v780_v26 = vadd.f32 %v4189_v0, %v4319_v58  ;;  %v1170_v16 = vadd.f32 %v4529_v56, %v4360_v11  ;;  %v4573_v58 = vpop.permute.xlu0 %1765 }
 0x409   : > { %5670 = vst [vmem:[#allocation65_spill] sm:$0xff] %v4467_v28  ;;  %v4499_v3 = vrot.slane %v5675_v62, %v3735_v21  ;;  %v4514_v28 = vmul.f32 0.6, %v1021_v15  ;;  %v5679_v21 = vld [vmem:[#allocation11_spill] sm:$0xff]  ;;  %v1132_v62 = vand.u32 2147483647, %v1128_v4  ;;  %v1211_v11 = vadd.f32 %v4491_v33, %v4416_v18 }
 0x40a   : > { %v1050_v30 = vand.u32 2147483647, %v1046_v32  ;;  %v4536_v32 = vstv %s3160_s20  ;;  %v849_v4 = vpack.c.b8 %v848_v38, %v848_v38  ;;  %5686 = vst [vmem:[#allocation72_spill] sm:$0xff] %v4573_v58  ;;  %v1251_v38 = vadd.f32 %v4507_v59, %v4455_v10  ;;  %s4692_s20 = spop %3187 }
 0x40b   : > { %5676 = vst [vmem:[#allocation70_spill] sm:$0xff] %v4499_v3  ;;  %5678 = vst [vmem:[#allocation71_spill] sm:$0xff] %v4514_v28  ;;  %v4540_v3 = vstv %s3162_s27  ;;  %v1141_v0 = vmul.f32 %v4536_v32, %v1132_v62  ;;  %v784_v8 = vand.u32 2147483647, %v780_v26  ;;  %v1174_v62 = vand.u32 2147483647, %v1170_v16  ;;  %s4714_s27 = spop %3189 }
 0x40c   : > { %v4481_v25 = vpop.permute.xlu1 %1564  ;;  %v1059_v63 = vmul.f32 %v4523_v44, %v1050_v30  ;;  %vm855_vm10 = vnez %v849_v4  ;;  %v1252_v18 = vadd.f32 %v4507_v59, %v4259_v19  ;;  %v4596_v58 = vpop.permute.xlu0 %1769  ;;  %s4727_s28 = spop %3191 }
 0x40d   : > { %5671 = vst [vmem:[#allocation66_spill] sm:$0xff] %v4481_v25  ;;  %v1019_v25 = vadd.f32 %v4464_v60, %v5679_v21  ;;  %v4534_v21 = vmul.f32 %v4503_v7, %v1093_v45  ;;  %v793_v16 = vmul.f32 %v4211_v36, %v784_v8  ;;  %s4740_s29 = spop %3193 }
 0x40e   : > { %s4753_s7 = spop %3195 }
 0x40f   : > { %v1023_v45 = vmul.f32 0.6, %v1019_v25  ;;  %v1100_v25 = vmul.f32 %v4503_v7, %v1091_v13  ;;  %v1214_v13 = vand.u32 2147483647, %v1210_v52 }
 0x411   : > { %v4531_v15 = vpop.permute.xlu1 %2021  ;;  %v1064_v10 = vadd.f32 %v1060_v24, %v1023_v45  ;;  %v1223_v26 = vmul.f32 %v4548_v35, %v1214_v13  ;;  %v1183_v45 = vmul.f32 %v4540_v3, %v1174_v62 }
 0x412   : > { %5682 = vst [vmem:[#allocation11_spill] sm:$0xff] %v4531_v15  ;;  %v1169_v15 = vadd.f32 %v4529_v56, %v4353_v6  ;;  %v1022_v6 = vmul.f32 0.6, %v1018_v47  ;;  %v821_v47 = vadd.f32 %v4196_v23, %v4346_v22  ;;  %v1101_v23 = vmul.f32 %v4503_v7, %v1092_v40 }
 0x413   : > { %v1292_v40 = vadd.f32 %v4568_v50, %v4312_v29 }
 0x414   : > { %v1173_v30 = vand.u32 2147483647, %v1169_v15  ;;  %v1063_v28 = vadd.f32 %v1059_v63, %v1022_v6  ;;  %v1133_v15 = vand.u32 2147483647, %v1129_v5  ;;  %v1048_v63 = vadd.f32 %v4475_v39, %v4170_v37 }
 0x415   : > { %v4586_v5 = vstv %s3170_s8  ;;  %v825_v52 = vand.u32 2147483647, %v821_v47  ;;  %v1256_v47 = vand.u32 2147483647, %v1252_v18  ;;  %v1130_v18 = vadd.f32 %v4511_v34, %v4330_v9  ;;  %s3198_s8 = spop %3197 }
 0x416   : > { %v4562_v54 = vpop.permute.xlu1 %1605  ;;  %v1104_v27 = vadd.f32 %v1100_v25, %v1063_v28  ;;  %v1182_v22 = vmul.f32 %v4540_v3, %v1173_v30  ;;  %v1142_v37 = vmul.f32 %v4536_v32, %v1133_v15  ;;  %v1215_v28 = vand.u32 2147483647, %v1211_v11  ;;  %v5690_v11 = vld [vmem:[#allocation18_spill] sm:$0xff] }
 0x417   : > { %5685 = vst [vmem:[#allocation10_spill] sm:$0xff] %v4562_v54  ;;  %v1255_v25 = vand.u32 2147483647, %v1251_v38  ;;  %v859_v30 = vsel %vm855_vm10, 16843009, %v5644_v14  ;;  %v756_v29 = vadd.f32 %v4521_v49, %v5690_v11  ;;  %v834_v36 = vmul.f32 %v4215_v43, %v825_v52  ;;  %v4622_v52 = vpop.permute.xlu0 %1773 }
 0x418   : > { %v1145_v54 = vadd.f32 %v1141_v0, %v1104_v27  ;;  %v1052_v4 = vand.u32 2147483647, %v1048_v63  ;;  %v5689_v0 = vld [vmem:[#allocation12_spill] sm:$0xff]  ;;  %v1224_v14 = vmul.f32 %v4548_v35, %v1215_v28  ;;  %v863_v63 = vunpack.c.0.s8 %v859_v30 }
 0x419   : > { %v1020_v15 = vadd.f32 %v4464_v60, %v5689_v0  ;;  %v1264_v13 = vmul.f32 %v4551_v1, %v1255_v25  ;;  %v1293_v27 = vadd.f32 %v4568_v50, %v4317_v42  ;;  %v797_v8 = vadd.f32 %v793_v16, %v756_v29 }
 0x41a   : > { %v4582_v6 = vpop.permute.xlu1 %1613  ;;  %v1186_v19 = vadd.f32 %v1182_v22, %v1145_v54  ;;  %v1296_v54 = vand.u32 2147483647, %v1292_v40  ;;  %v1061_v60 = vmul.f32 %v4523_v44, %v1052_v4  ;;  %v1049_v43 = vadd.f32 %v4475_v39, %v4192_v57 }
 0x41b   : > { %5687 = vst [vmem:[#allocation73_spill] sm:$0xff] %v4582_v6  ;;  %v1105_v6 = vadd.f32 %v1101_v23, %v1064_v10  ;;  %v4612_v23 = vrot.slane %v3875_v53, %v4173_v46  ;;  %v1265_v22 = vmul.f32 %v4551_v1, %v1256_v47  ;;  %v1024_v62 = vmul.f32 0.6, %v1020_v15 }
 0x41c   : > { %v838_v42 = vadd.f32 %v834_v36, %v797_v8  ;;  %vm4625_vm11 = vcmp.ne.s32.totalorder %v863_v63, 0  ;;  %v5691_v57 = vmov 0  ;;  %v4631_v39 = vadd.f32 %v4507_v59, %v4265_v41 }
 0x41d   : > { %v1146_v38 = vadd.f32 %v1142_v37, %v1105_v6  ;;  %v1227_v6 = vadd.f32 %v1223_v26, %v1186_v19  ;;  %v5692_v57 = vsel %vm4625_vm11, 4294967295, %v5691_v57  ;;  %v1297_v25 = vand.u32 2147483647, %v1293_v27 }
 0x41e   : > { %5693 = vst [vmem:[#allocation12_spill] sm:$0xff] %v5692_v57  ;;  %v1090_v9 = vadd.f32 %v4460_v2, %v4279_v31  ;;  %v1171_v26 = vadd.f32 %v4529_v56, %v4391_v61  ;;  %v1305_v40 = vmul.f32 %v4553_v12, %v1296_v54  ;;  %v1065_v16 = vadd.f32 %v1061_v60, %v1024_v62 }
 0x41f   : > { %v4599_v24 = vpop.permute.xlu1 %2091  ;;  %v1187_v49 = vadd.f32 %v1183_v45, %v1146_v38  ;;  %v1268_v37 = vadd.f32 %v1264_v13, %v1227_v6  ;;  %v1053_v30 = vand.u32 2147483647, %v1049_v43  ;;  %v1134_v19 = vand.u32 2147483647, %v1130_v18  ;;  %v5694_v45 = vld [vmem:[#allocation44_spill] sm:$0xff] }
 0x420   : > { %5688 = vst [vmem:[#allocation74_spill] sm:$0xff] %v4599_v24  ;;  %v1131_v41 = vadd.f32 %v4511_v34, %v5694_v45  ;;  %v1212_v47 = vadd.f32 %v4491_v33, %v4428_v17  ;;  %v4648_v61 = vsel %vm4625_vm11, %v838_v42, -1e+30  ;;  %v1306_v29 = vmul.f32 %v4553_v12, %v1297_v25  ;;  %v5699_v42 = vld [vmem:[#allocation14_spill] sm:$0xff]  ;;  %v5738_v24 = vld [vmem:[#allocation32_spill] sm:$0xff] }
 0x421   : > { %v1228_v53 = vadd.f32 %v1224_v14, %v1187_v49  ;;  %5695 = vst [vmem:[#allocation18_spill] sm:$0xff] %v4648_v61  ;;  %v1309_v11 = vadd.f32 %v1305_v40, %v1268_v37  ;;  %v1094_v36 = vand.u32 2147483647, %v1090_v9  ;;  %v1175_v34 = vand.u32 2147483647, %v1171_v26  ;;  %v4660_v14 = vpop.permute.xlu0 %1777  ;;  %v5700_v37 = vld [vmem:[#allocation71_spill] sm:$0xff] }
 0x422   : > { %v1172_v17 = vadd.f32 %v4529_v56, %v4404_v51  ;;  %v1062_v38 = vmul.f32 %v4523_v44, %v1053_v30  ;;  %v877_v63 = vsel %vm324_vm1, %v4648_v61, -inf  ;;  %v1143_v27 = vmul.f32 %v4536_v32, %v1134_v19  ;;  %v5701_v30 = vld [vmem:[#allocation30_spill] sm:$0xff]  ;;  %v5702_v19 = vld [vmem:[#allocation41_spill] sm:$0xff]  ;;  %v5732_v49 = vld [vmem:[#allocation36_spill] sm:$0xff] }
 0x423   : > { %v1269_v2 = vadd.f32 %v1265_v22, %v1228_v53  ;;  %v1135_v8 = vand.u32 2147483647, %v1131_v41  ;;  %v1216_v60 = vand.u32 2147483647, %v1212_v47  ;;  %v1213_v43 = vadd.f32 %v4491_v33, %v4433_v20 }
 0x424   : > { %v1315_v10 = vpop.permute.xlu1 %1314  ;;  %v1106_v51 = vadd.f32 %v4534_v21, %v1065_v16  ;;  %v1103_v62 = vmul.f32 %v4503_v7, %v1094_v36  ;;  %v1184_v20 = vmul.f32 %v4540_v3, %v1175_v34  ;;  %v1176_v33 = vand.u32 2147483647, %v1172_v17  ;;  %v5698_v21 = vld [vmem:[#allocation13_spill] sm:$0xff] }
 0x425   : > { %v1333_v28 = vadd.f32 %v4612_v23, %v1315_v10  ;;  %v1310_v22 = vadd.f32 %v1306_v29, %v1269_v2  ;;  %v1511_v10 = vadd.f32 %v4483_v48, %v5698_v21  ;;  %v1513_v53 = vadd.f32 %v4483_v48, %v5699_v42  ;;  %v4699_v41 = vpop.permute.xlu0 %2255  ;;  %v5707_v29 = vld [vmem:[#allocation8_spill] sm:$0xff]  ;;  %v5708_v34 = vld [vmem:[#allocation9_spill] sm:$0xff] }
 0x426   : > { %v1147_v9 = vadd.f32 %v1143_v27, %v1106_v51  ;;  %v1144_v7 = vmul.f32 %v4536_v32, %v1135_v8  ;;  %v1225_v26 = vmul.f32 %v4548_v35, %v1216_v60  ;;  %v1217_v40 = vand.u32 2147483647, %v1213_v43 }
 0x427   : > { %v1337_v4 = vand.u32 2147483647, %v1333_v28  ;;  %v1066_v28 = vadd.f32 %v1062_v38, %v5700_v37  ;;  %v1257_v16 = vand.u32 2147483647, %v4631_v39  ;;  %v1294_v45 = vadd.f32 %v4568_v50, %v5702_v19 }
 0x428   : > { %v1319_v31 = vpop.permute.xlu1 %1318  ;;  %v1185_v2 = vmul.f32 %v4540_v3, %v1176_v33  ;;  %v4725_v3 = vstv %s4620_s9  ;;  %v4734_v27 = vstv %s4640_s14  ;;  %v4737_v8 = vstv %s4652_s15  ;;  %s3200_s9 = spop %3199 }
 0x429   : > { %v1346_v0 = vmul.f32 %v4586_v5, %v1337_v4  ;;  %v1334_v15 = vadd.f32 %v4612_v23, %v1319_v31  ;;  %v1254_v4 = vadd.f32 %v4507_v59, %v5701_v30  ;;  %v1107_v47 = vadd.f32 %v1103_v62, %v1066_v28 }
 0x42a   : > { %v1188_v31 = vadd.f32 %v1184_v20, %v1147_v9  ;;  %v1266_v60 = vmul.f32 %v4551_v1, %v1257_v16  ;;  %v1298_v51 = vand.u32 2147483647, %v1294_v45  ;;  %v4745_v20 = vstv %s4657_s16  ;;  %v5712_v9 = vld [vmem:[#allocation17_spill] sm:$0xff]  ;;  %s2601_s16 = scalar_lea.vmem %s5488_s3, %s3686_s10  ;;  %s3036_s10 = sshll.u32 %s3532_s21, 6 }
 0x42b   : > { %v1338_v13 = vand.u32 2147483647, %v1334_v15  ;;  %v1350_v54 = vadd.f32 %v1346_v0, %v1309_v11  ;;  %v4710_v0 = vmul.f32 0.6, %v1511_v10  ;;  %v4712_v15 = vmul.f32 0.6, %v1513_v53  ;;  %v4759_v10 = vpop.permute.xlu0 %2259 }
 0x42c   : > { %878 = vmax.xlane.f32.xlu1 %v877_v63  ;;  %v5706_v11 = vld [vmem:[#allocation5_spill] sm:$0xff]  ;;  %v1148_v38 = vadd.f32 %v1144_v7, %v1107_v47  ;;  %v1226_v63 = vmul.f32 %v4548_v35, %v1217_v40  ;;  %v1258_v43 = vand.u32 2147483647, %v1254_v4  ;;  %v4748_v33 = vstv %s4667_s17  ;;  %v5711_v53 = vld [vmem:[#allocation16_spill] sm:$0xff]  ;;  %s3614_s21 = smov [#allocation2]  }
 0x42d   : > { %v1347_v44 = vmul.f32 %v4586_v5, %v1338_v13  ;;  %v4671_v56 = vpop.permute.xlu1 %1646  ;;  %v4675_v6 = vsel %vm4219_vm5, %v1350_v54, -1e+30  ;;  %5705 = vst [vmem:[#allocation71_spill] sm:$0xff] %v4712_v15  ;;  %v4718_v36 = vrot.slane %v5707_v29, %v5706_v11  ;;  %v4722_v17 = vrot.slane %v5708_v34, %v5706_v11  ;;  %v5716_v11 = vld [vmem:[#allocation26_spill] sm:$0xff] }
 0x42e   : > { %5697 = vst [vmem:[#allocation44_spill] sm:$0xff] %v4675_v6  ;;  %v1358_v18 = vsel %vm324_vm1, %v4675_v6, -inf  ;;  %v1229_v13 = vadd.f32 %v1225_v26, %v1188_v31  ;;  %v4731_v54 = vstv %s4637_s12  ;;  %v1189_v62 = vadd.f32 %v1185_v2, %v1148_v38  ;;  %v5713_v26 = vld [vmem:[#allocation22_spill] sm:$0xff]  ;;  %v5717_v38 = vld [vmem:[#allocation69_spill] sm:$0xff]  ;;  %s3202_s12 = spop %3201 }
 0x42f   : > { %v1351_v25 = vadd.f32 %v1347_v44, %v1310_v22  ;;  %v5709_v44 = vld [vmem:[#allocation42_spill] sm:$0xff]  ;;  %v4751_v35 = vstv %s4677_s18  ;;  %v4768_v7 = vrot.slane %v5707_v29, %v5712_v9  ;;  %v4772_v40 = vrot.slane %v5707_v29, %v5713_v26 }
 0x430   : > { %1359 = vmax.xlane.f32.xlu1 %v1358_v18  ;;  %v1295_v22 = vadd.f32 %v4568_v50, %v5709_v44  ;;  %v5710_v18 = vld [vmem:[#allocation15_spill] sm:$0xff]  ;;  %v4763_v50 = vrot.slane %v5707_v29, %v5711_v53  ;;  %v1270_v37 = vadd.f32 %v1266_v60, %v1229_v13  ;;  %v1230_v28 = vadd.f32 %v1226_v63, %v1189_v62  ;;  %v5741_v15 = vld [vmem:[#allocation34_spill] sm:$0xff] }
 0x431   : > { %v4703_v32 = vsel %vm4625_vm11, %v1351_v25, -1e+30  ;;  %v4757_v21 = vrot.slane %v5707_v29, %v5710_v18  ;;  %v4776_v16 = vrot.slane %v5707_v29, %v4163_v55  ;;  %v4780_v30 = vrot.slane %v5707_v29, %v4173_v46 }
 0x432   : > { %5703 = vst [vmem:[#allocation13_spill] sm:$0xff] %v4703_v32  ;;  %v4706_v39 = vpop.permute.xlu1 %2099  ;;  %v1361_v59 = vsel %vm324_vm1, %v4703_v32, -inf  ;;  %v1267_v4 = vmul.f32 %v4551_v1, %v1258_v43  ;;  %v1307_v19 = vmul.f32 %v4553_v12, %v1298_v51  ;;  %v1299_v45 = vand.u32 2147483647, %v1295_v22 }
 0x433   : > { %5704 = vst [vmem:[#allocation14_spill] sm:$0xff] %v4706_v39  ;;  %1362 = vmax.xlane.f32.xlu0 %v1361_v59  ;;  %5714 = vst [vmem:[#allocation30_spill] sm:$0xff] %v4780_v30  ;;  %v4785_v31 = vstv %s4688_s19  ;;  %v4788_v2 = vstv %s4692_s20  ;;  %v4791_v59 = vstv %s4714_s27  ;;  %v1539_v29 = vadd.f32 %v5717_v38, %v5716_v11  ;;  %v5726_v11 = vld [vmem:[#allocation70_spill] sm:$0xff]  ;;  %s2708_s19 = scalar_lea.vmem %s5489_s4, %s3036_s10  ;;  %s2911_s20 = sshll.u32 %s3614_s21, 4  ;;  %s2912_s20 = int_to_ptr.vmem [resolvable:$true] %s2911_s20 }
 0x434   : > { %5715 = vst [vmem:[#allocation41_spill] sm:$0xff] %v4785_v31  ;;  %v1271_v63 = vadd.f32 %v1267_v4, %v1230_v28  ;;  %v1311_v43 = vadd.f32 %v1307_v19, %v1270_v37  ;;  %v4798_v51 = vstv %s4727_s28  ;;  %v4801_v44 = vstv %s4740_s29  ;;  %v5725_v19 = vld [vmem:[#allocation29_spill] sm:$0xff]  ;;  %s3488_s27 = scalar_lea.vmem %s2912_s20, 512  ;;  %p3495_p9 = scmp.lt.s32.totalorder %s2912_s20, %s2912_s20 }
 0x435   : > { %5718 = vst [vmem:[#allocation5_spill] sm:$0xff] %v4798_v51  ;;  %v4804_v22 = vstv %s4753_s7  ;;  %v4806_v62 = vstv %s3198_s8  ;;  %v4813_v28 = vrot.slane %v5708_v34, %v5710_v18  ;;  %v4817_v37 = vstv %s3202_s12  ;;  %v5736_v18 = vld [vmem:[#allocation28_spill] sm:$0xff]  ;;  %p3489_p6 = scmp.ne.s32.totalorder %s2912_s20, %s3488_s27  ;;  %p3496_p10 = scmp.lt.s32.totalorder %s3488_s27, %s3488_s27 }
 0x436   : > { %5719 = vst [vmem:[#allocation8_spill] sm:$0xff] %v4804_v22  ;;  %5720 = vst [vmem:[#allocation9_spill] sm:$0xff] %v4806_v62  ;;  %v4823_v32 = vrot.slane %v5708_v34, %v5711_v53  ;;  %v1543_v6 = vand.u32 2147483647, %v1539_v29  ;;  %v4838_v53 = vrot.slane %v5708_v34, %v5712_v9  ;;  %v5734_v29 = vld [vmem:[#allocation23_spill] sm:$0xff]  ;;  %v1582_v39 = vadd.f32 %v4718_v36, %v5738_v24 }
 0x437   : > { %v1323_v42 = vpop.permute.xlu1 %1322  ;;  %5722 = vst [vmem:[#allocation26_spill] sm:$0xff] %v4813_v28  ;;  %5724 = vst [vmem:[#allocation76_spill] sm:$0xff] %v4817_v37  ;;  %p3490_p7 = pnand %p3489_p6, %p5447_p5  ;;  %p3497_p11 = por %p3496_p10, %p3495_p9 }
 0x438   : > { %v1335_v25 = vadd.f32 %v4612_v23, %v1323_v42  ;;  %v4808_v42 = vpop.permute.xlu0 %2263  ;;  %5727 = vst [vmem:[#allocation29_spill] sm:$0xff] %v4823_v32 }
 0x439   : > { %5721 = vst [vmem:[#allocation42_spill] sm:$0xff] %v4808_v42  ;;  %p3491_p8 = pneg %p3490_p7 }
 0x43a   : > { %v1339_v47 = vand.u32 2147483647, %v1335_v25  ;;  %v1308_v25 = vmul.f32 %v4553_v12, %v1299_v45 }
 0x43b   : > { %v1327_v13 = vpop.permute.xlu1 %1326  ;;  %p3498_p12 = pnand %p3497_p11, %p3491_p8 }
 0x43c   : > { %v1348_v60 = vmul.f32 %v4586_v5, %v1339_v47  ;;  %v1336_v1 = vadd.f32 %v4612_v23, %v1327_v13  ;;  %v4815_v23 = vstv %s3200_s9  ;;  %v2030_v13 = vadd.f32 %v5726_v11, %v5725_v19 }
 0x43d   : > { %5723 = vst [vmem:[#allocation75_spill] sm:$0xff] %v4815_v23  ;;  %v2071_v19 = vadd.f32 %v4722_v17, %v5732_v49 }
 0x43e   : > { %v1340_v4 = vand.u32 2147483647, %v1336_v1  ;;  %v1352_v47 = vadd.f32 %v1348_v60, %v1311_v43  ;;  %v1312_v60 = vadd.f32 %v1308_v25, %v1271_v63  ;;  %v5731_v43 = vld [vmem:[#allocation27_spill] sm:$0xff]  ;;  %v4848_v63 = vrot.slane %v5708_v34, %v5713_v26 }
 0x43f   : > { %v1540_v61 = vadd.f32 %v5717_v38, %v5731_v43  ;;  %5733 = vst [vmem:[#allocation27_spill] sm:$0xff] %v4838_v53  ;;  %v2034_v49 = vand.u32 2147483647, %v2030_v13  ;;  %v5737_v43 = vld [vmem:[#allocation31_spill] sm:$0xff]  ;;  %v2069_v26 = vadd.f32 %v4722_v17, %v5741_v15  ;;  %v2075_v24 = vand.u32 2147483647, %v2071_v19 }
 0x440   : > { %v1349_v12 = vmul.f32 %v4586_v5, %v1340_v4  ;;  %v4826_v45 = vpop.permute.xlu1 %1654  ;;  %v4830_v1 = vsel %vm4383_vm8, %v1352_v47, -1e+30  ;;  %v5735_v4 = vld [vmem:[#allocation67_spill] sm:$0xff]  ;;  %v2028_v47 = vadd.f32 %v5726_v11, %v5736_v18  ;;  %v1581_v9 = vadd.f32 %v4718_v36, %v5737_v43 }
 0x441   : > { %5728 = vst [vmem:[#allocation77_spill] sm:$0xff] %v4826_v45  ;;  %5730 = vst [vmem:[#allocation78_spill] sm:$0xff] %v4830_v1  ;;  %v1364_v5 = vsel %vm324_vm1, %v4830_v1, -inf  ;;  %v2002_v57 = vadd.f32 %v5735_v4, %v5734_v29  ;;  %v4856_v1 = vrot.slane %v5708_v34, %v4163_v55  ;;  %v4858_v29 = vpop.permute.xlu0 %2267  ;;  %v1552_v18 = vmul.f32 %v4725_v3, %v1543_v6  ;;  %v5745_v45 = vld [vmem:[#allocation38_spill] sm:$0xff]  ;;  %v5747_v15 = vld [vmem:[#allocation43_spill] sm:$0xff] }
 0x442   : > { %1365 = vmax.xlane.f32.xlu1 %v1364_v5  ;;  %v1353_v25 = vadd.f32 %v1349_v12, %v1312_v60  ;;  %5740 = vst [vmem:[#allocation23_spill] sm:$0xff] %v4858_v29  ;;  %v5742_v5 = vld [vmem:[#allocation35_spill] sm:$0xff]  ;;  %v1544_v43 = vand.u32 2147483647, %v1540_v61  ;;  %v2072_v55 = vadd.f32 %v4722_v17, %v5745_v45  ;;  %v2032_v31 = vand.u32 2147483647, %v2028_v47 }
 0x443   : > { %5739 = vst [vmem:[#allocation36_spill] sm:$0xff] %v4856_v1  ;;  %v2070_v13 = vadd.f32 %v4722_v17, %v5742_v5  ;;  %v2006_v29 = vmul.f32 0.6, %v2002_v57  ;;  %v1620_v42 = vadd.f32 %v4757_v21, %v5747_v15  ;;  %v4879_v5 = vrot.slane %v5708_v34, %v4173_v46  ;;  %v5749_v17 = vld [vmem:[#allocation46_spill] sm:$0xff]  ;;  %v5751_v47 = vld [vmem:[#allocation48_spill] sm:$0xff] }
 0x444   : > { %v4867_v60 = vsel %vm4400_vm9, %v1353_v25, -1e+30  ;;  %v2043_v61 = vmul.f32 %v4788_v2, %v2034_v49  ;;  %v1585_v19 = vand.u32 2147483647, %v1581_v9  ;;  %v1586_v25 = vand.u32 2147483647, %v1582_v39 }
 0x445   : > { %5744 = vst [vmem:[#allocation67_spill] sm:$0xff] %v4867_v60  ;;  %v4871_v37 = vpop.permute.xlu1 %2132  ;;  %v1367_v6 = vsel %vm324_vm1, %v4867_v60, -inf  ;;  %5748 = vst [vmem:[#allocation31_spill] sm:$0xff] %v4879_v5  ;;  %v1622_v45 = vadd.f32 %v4757_v21, %v5749_v17  ;;  %v2073_v12 = vand.u32 2147483647, %v2069_v26  ;;  %v5750_v60 = vld [vmem:[#allocation47_spill] sm:$0xff]  ;;  %v2113_v15 = vadd.f32 %v4813_v28, %v5751_v47  ;;  %v4895_v49 = vpop.permute.xlu0 %1810 }
 0x446   : > { %5746 = vst [vmem:[#allocation28_spill] sm:$0xff] %v4871_v37  ;;  %1368 = vmax.xlane.f32.xlu0 %v1367_v6  ;;  %v2074_v37 = vand.u32 2147483647, %v2070_v13  ;;  %v2111_v57 = vadd.f32 %v4813_v28, %v5750_v60  ;;  %v4889_v38 = vadd.f32 %v1552_v18, %v4710_v0  ;;  %v4892_v34 = vmul.f32 %v4725_v3, %v1544_v43  ;;  %v5752_v6 = vld [vmem:[#allocation49_spill] sm:$0xff]  ;;  %v5753_v17 = vld [vmem:[#allocation51_spill] sm:$0xff] }
 0x447   : > { %v2084_v9 = vmul.f32 %v4791_v59, %v2075_v24  ;;  %v2076_v39 = vand.u32 2147483647, %v2072_v55  ;;  %v4898_v26 = vmul.f32 %v4788_v2, %v2032_v31  ;;  %v1624_v13 = vand.u32 2147483647, %v1620_v42 }
 0x448   : > { %v1661_v60 = vadd.f32 %v4763_v50, %v5752_v6  ;;  %v1663_v47 = vadd.f32 %v4763_v50, %v5753_v17  ;;  %v2047_v18 = vadd.f32 %v2043_v61, %v2006_v29  ;;  %v4907_v43 = vmul.f32 %v4731_v54, %v1585_v19  ;;  %v5759_v29 = vld [vmem:[#allocation55_spill] sm:$0xff]  ;;  %v5760_v19 = vld [vmem:[#allocation56_spill] sm:$0xff] }
 0x449   : > { %v4910_v55 = vmul.f32 %v4731_v54, %v1586_v25  ;;  %v1626_v24 = vand.u32 2147483647, %v1622_v45  ;;  %v4913_v31 = vmul.f32 %v4791_v59, %v2073_v12  ;;  %v4916_v42 = vmul.f32 %v4791_v59, %v2074_v37  ;;  %v5762_v37 = vld [vmem:[#allocation58_spill] sm:$0xff] }
 0x44a   : > { %v4904_v0 = vpop.permute.xlu1 %1683  ;;  %v2115_v6 = vand.u32 2147483647, %v2111_v57  ;;  %v2117_v46 = vand.u32 2147483647, %v2113_v15  ;;  %v4918_v28 = vadd.f32 %v2084_v9, %v2047_v18  ;;  %v4921_v17 = vmul.f32 %v4791_v59, %v2076_v39  ;;  %v5763_v59 = vld [vmem:[#allocation59_spill] sm:$0xff]  ;;  %v5764_v18 = vld [vmem:[#allocation61_spill] sm:$0xff] }
 0x44b   : > { %5754 = vst [vmem:[#allocation32_spill] sm:$0xff] %v4904_v0  ;;  %5755 = vst [vmem:[#allocation34_spill] sm:$0xff] %v4910_v55  ;;  %v2152_v61 = vadd.f32 %v4823_v32, %v5759_v29  ;;  %v2153_v25 = vadd.f32 %v4823_v32, %v5760_v19  ;;  %v4928_v45 = vmul.f32 %v4734_v27, %v1624_v13  ;;  %v1665_v12 = vand.u32 2147483647, %v1661_v60  ;;  %v5765_v19 = vld [vmem:[#allocation63_spill] sm:$0xff]  ;;  %v5769_v0 = vld [vmem:[#allocation68_spill] sm:$0xff] }
 0x44c   : > { %5756 = vst [vmem:[#allocation35_spill] sm:$0xff] %v4913_v31  ;;  %5757 = vst [vmem:[#allocation38_spill] sm:$0xff] %v4918_v28  ;;  %v1667_v55 = vand.u32 2147483647, %v1663_v47  ;;  %v1704_v57 = vadd.f32 %v4768_v7, %v5762_v37  ;;  %v4935_v9 = vmul.f32 %v4734_v27, %v1626_v24  ;;  %v2193_v39 = vadd.f32 %v4838_v53, %v5763_v59  ;;  %v5767_v37 = vld [vmem:[#allocation64_spill] sm:$0xff]  ;;  %v5768_v28 = vld [vmem:[#allocation62_spill] sm:$0xff] }
 0x44d   : > { %5758 = vst [vmem:[#allocation43_spill] sm:$0xff] %v4921_v17  ;;  %5761 = vst [vmem:[#allocation46_spill] sm:$0xff] %v4928_v45  ;;  %v2194_v29 = vadd.f32 %v4838_v53, %v5764_v18  ;;  %v1745_v13 = vadd.f32 %v4772_v40, %v5765_v19  ;;  %v1815_v17 = vpop.permute.xlu0 %1814  ;;  %v4944_v60 = vmul.f32 %v4798_v51, %v2115_v6  ;;  %v2156_v59 = vand.u32 2147483647, %v2152_v61  ;;  %v5770_v53 = vld [vmem:[#allocation37_spill] sm:$0xff] }
 0x44e   : > { %v4932_v15 = vpop.permute.xlu1 %1687  ;;  %v4947_v47 = vmul.f32 %v4798_v51, %v2117_v46  ;;  %v2234_v24 = vadd.f32 %v4848_v63, %v5767_v37  ;;  %v2029_v45 = vadd.f32 %v5726_v11, %v5768_v28  ;;  %v2157_v32 = vand.u32 2147483647, %v2153_v25  ;;  %v5772_v51 = vld [vmem:[#allocation72_spill] sm:$0xff] }
 0x44f   : > { %v2235_v18 = vadd.f32 %v4848_v63, %v5769_v0  ;;  %v1512_v19 = vadd.f32 %v4483_v48, %v5770_v53  ;;  %v4958_v6 = vmul.f32 %v4737_v8, %v1665_v12  ;;  %v4961_v46 = vmul.f32 %v4737_v8, %v1667_v55 }
 0x450   : > { %5766 = vst [vmem:[#allocation47_spill] sm:$0xff] %v4947_v47  ;;  %v1708_v47 = vand.u32 2147483647, %v1704_v57  ;;  %v1784_v37 = vadd.f32 %v4776_v16, %v5772_v51  ;;  %v2197_v31 = vand.u32 2147483647, %v2193_v39  ;;  %v1785_v25 = vadd.f32 %v4776_v16, %v4596_v58 }
 0x451   : > { %5771 = vst [vmem:[#allocation48_spill] sm:$0xff] %v4958_v6  ;;  %v2198_v28 = vand.u32 2147483647, %v2194_v29  ;;  %v1749_v61 = vand.u32 2147483647, %v1745_v13  ;;  %v1786_v53 = vadd.f32 %v4776_v16, %v4622_v52  ;;  %v1787_v55 = vadd.f32 %v4776_v16, %v4660_v14  ;;  %v1819_v29 = vpop.permute.xlu0 %1818  ;;  %v5773_v6 = vld [vmem:[#allocation40_spill] sm:$0xff] }
 0x452   : > { %v2238_v11 = vand.u32 2147483647, %v2234_v24  ;;  %v2033_v12 = vand.u32 2147483647, %v2029_v45  ;;  %v4974_v57 = vmul.f32 %v4801_v44, %v2156_v59  ;;  %v4977_v51 = vmul.f32 %v4801_v44, %v2157_v32 }
 0x453   : > { %v4967_v0 = vpop.permute.xlu1 %2144  ;;  %v2239_v39 = vand.u32 2147483647, %v2235_v18  ;;  %v1516_v13 = vmul.f32 0.6, %v1512_v19  ;;  %v4980_v58 = vmul.f32 %v4745_v20, %v1708_v47  ;;  %v1788_v24 = vand.u32 2147483647, %v1784_v37 }
 0x454   : > { %v2275_v52 = vadd.f32 %v4856_v1, %v4759_v10  ;;  %v2001_v14 = vadd.f32 %v5735_v4, %v5773_v6  ;;  %v4987_v16 = vmul.f32 %v4804_v22, %v2197_v31  ;;  %v4990_v45 = vmul.f32 %v4804_v22, %v2198_v28  ;;  %v5789_v22 = vld [vmem:[#allocation65_spill] sm:$0xff] }
 0x455   : > { %v4993_v32 = vmul.f32 %v4748_v33, %v1749_v61  ;;  %v1789_v59 = vand.u32 2147483647, %v1785_v25  ;;  %v4996_v47 = vmul.f32 %v4806_v62, %v2238_v11  ;;  %v1790_v18 = vand.u32 2147483647, %v1786_v53  ;;  %v5777_v61 = vld [vmem:[#allocation66_spill] sm:$0xff]  ;;  %v5778_v11 = vld [vmem:[#allocation19_spill] sm:$0xff] }
 0x456   : > { %5774 = vst [vmem:[#allocation49_spill] sm:$0xff] %v4990_v45  ;;  %v1791_v19 = vand.u32 2147483647, %v1787_v55  ;;  %v2042_v10 = vmul.f32 %v4788_v2, %v2033_v12  ;;  %v5002_v6 = vmul.f32 %v4806_v62, %v2239_v39  ;;  %v5006_v31 = vadd.f32 %v4856_v1, %v4699_v41 }
 0x457   : > { %v1557_v28 = vadd.f32 %v4892_v34, %v1516_v13  ;;  %v1580_v25 = vadd.f32 %v4718_v36, %v5777_v61  ;;  %v5013_v53 = vadd.f32 %v4848_v63, %v5778_v11  ;;  %v5016_v55 = vmul.f32 %v4751_v35, %v1788_v24  ;;  %v2301_v13 = vpop.permute.xlu0 %2300 }
 0x458   : > { %v4999_v37 = vpop.permute.xlu1 %1695  ;;  %5775 = vst [vmem:[#allocation51_spill] sm:$0xff] %v5002_v6  ;;  %5776 = vst [vmem:[#allocation55_spill] sm:$0xff] %v5006_v31  ;;  %v2279_v12 = vand.u32 2147483647, %v2275_v52  ;;  %v2005_v45 = vmul.f32 0.6, %v2001_v14  ;;  %v5019_v39 = vmul.f32 %v4751_v35, %v1789_v59  ;;  %v1826_v41 = vadd.f32 %v4780_v30, %v4895_v49 }
 0x459   : > { %5779 = vst [vmem:[#allocation56_spill] sm:$0xff] %v5013_v53  ;;  %5780 = vst [vmem:[#allocation58_spill] sm:$0xff] %v5016_v55  ;;  %v1827_v34 = vadd.f32 %v4780_v30, %v1815_v17  ;;  %v5781_v6 = vld [vmem:[#allocation10_spill] sm:$0xff]  ;;  %v5027_v11 = vmul.f32 %v4751_v35, %v1790_v18  ;;  %v5030_v24 = vmul.f32 %v4751_v35, %v1791_v19  ;;  %v1584_v49 = vand.u32 2147483647, %v1580_v25  ;;  %v5782_v35 = vld [vmem:[#allocation39_spill] sm:$0xff] }
 0x45a   : > { %v1621_v61 = vadd.f32 %v4757_v21, %v5781_v6  ;;  %v1828_v52 = vadd.f32 %v4780_v30, %v1819_v29  ;;  %v2046_v14 = vadd.f32 %v2042_v10, %v2005_v45  ;;  %v1598_v53 = vadd.f32 %v4907_v43, %v1557_v28  ;;  %v5783_v29 = vld [vmem:[#allocation60_spill] sm:$0xff]  ;;  %v5784_v45 = vld [vmem:[#allocation69_spill] sm:$0xff] }
 0x45b   : > { %v1662_v17 = vadd.f32 %v4763_v50, %v4671_v56  ;;  %v5040_v6 = vmul.f32 %v4815_v23, %v2279_v12  ;;  %v2316_v18 = vadd.f32 %v4879_v5, %v2301_v13  ;;  %v2000_v19 = vadd.f32 %v5735_v4, %v5782_v35  ;;  %v5785_v56 = vld [vmem:[#allocation42_spill] sm:$0xff]  ;;  %v5787_v23 = vld [vmem:[#allocation57_spill] sm:$0xff] }
 0x45c   : > { %v1541_v10 = vadd.f32 %v5784_v45, %v5783_v29  ;;  %v1830_v59 = vand.u32 2147483647, %v1826_v41  ;;  %v1831_v31 = vand.u32 2147483647, %v1827_v34  ;;  %v1625_v43 = vand.u32 2147483647, %v1621_v61 }
 0x45d   : > { %v5037_v55 = vpop.permute.xlu1 %2173  ;;  %v1703_v28 = vadd.f32 %v4768_v7, %v4932_v15  ;;  %v5051_v25 = vadd.f32 %v4856_v1, %v5785_v56  ;;  %v1832_v12 = vand.u32 2147483647, %v1828_v52  ;;  %v1538_v13 = vadd.f32 %v5784_v45, %v5787_v23  ;;  %v5788_v35 = vld [vmem:[#allocation33_spill] sm:$0xff] }
 0x45e   : > { %v2087_v5 = vadd.f32 %v4916_v42, %v2046_v14  ;;  %v1510_v62 = vadd.f32 %v4483_v48, %v5788_v35  ;;  %v1639_v41 = vadd.f32 %v4935_v9, %v1598_v53  ;;  %v1593_v34 = vmul.f32 %v4731_v54, %v1584_v49  ;;  %v5790_v1 = vld [vmem:[#allocation41_spill] sm:$0xff]  ;;  %v5795_v35 = vld [vmem:[#allocation70_spill] sm:$0xff] }
 0x45f   : > { %5786 = vst [vmem:[#allocation59_spill] sm:$0xff] %v5051_v25  ;;  %v1666_v61 = vand.u32 2147483647, %v1662_v17  ;;  %v2320_v29 = vand.u32 2147483647, %v2316_v18  ;;  %v1579_v56 = vadd.f32 %v4718_v36, %v5789_v22  ;;  %v1839_v25 = vmul.f32 %v5790_v1, %v1830_v59  ;;  %v5791_v49 = vld [vmem:[#allocation73_spill] sm:$0xff] }
 0x460   : > { %v2004_v15 = vmul.f32 0.6, %v2000_v19  ;;  %v1545_v30 = vand.u32 2147483647, %v1541_v10  ;;  %v5064_v23 = vmul.f32 %v5790_v1, %v1831_v31  ;;  %v1634_v42 = vmul.f32 %v4734_v27, %v1625_v43  ;;  %v5792_v59 = vld [vmem:[#allocation76_spill] sm:$0xff] }
 0x461   : > { %v1707_v48 = vand.u32 2147483647, %v1703_v28  ;;  %v5068_v9 = vmul.f32 %v5790_v1, %v1832_v12  ;;  %v1542_v53 = vand.u32 2147483647, %v1538_v13  ;;  %v2128_v14 = vadd.f32 %v4944_v60, %v2087_v5  ;;  %v5793_v60 = vld [vmem:[#allocation77_spill] sm:$0xff]  ;;  %v5794_v13 = vld [vmem:[#allocation11_spill] sm:$0xff] }
 0x462   : > { %v1725_v52 = vpop.permute.xlu1 %1724  ;;  %v1623_v17 = vadd.f32 %v4757_v21, %v5791_v49  ;;  %v1514_v18 = vmul.f32 0.6, %v1510_v62  ;;  %v1680_v36 = vadd.f32 %v4961_v46, %v1639_v41  ;;  %v1597_v22 = vadd.f32 %v1593_v34, %v4889_v38 }
 0x463   : > { %v1675_v31 = vmul.f32 %v4737_v8, %v1666_v61  ;;  %v5077_v19 = vmul.f32 %v5792_v59, %v2320_v29  ;;  %v2045_v45 = vadd.f32 %v4898_v26, %v2004_v15  ;;  %v1554_v10 = vmul.f32 %v4725_v3, %v1545_v30 }
 0x464   : > { %v1583_v43 = vand.u32 2147483647, %v1579_v56  ;;  %v1638_v5 = vadd.f32 %v1634_v42, %v1597_v22  ;;  %v1664_v21 = vadd.f32 %v4763_v50, %v5793_v60  ;;  %v1716_v62 = vmul.f32 %v4745_v20, %v1707_v48  ;;  %v5796_v50 = vld [vmem:[#allocation35_spill] sm:$0xff]  ;;  %v5798_v48 = vld [vmem:[#allocation14_spill] sm:$0xff] }
 0x465   : > { %v1551_v38 = vmul.f32 %v4725_v3, %v1542_v53  ;;  %v2169_v12 = vadd.f32 %v4974_v57, %v2128_v14  ;;  %v2031_v41 = vadd.f32 %v5795_v35, %v5794_v13  ;;  %v1627_v26 = vand.u32 2147483647, %v1623_v17  ;;  %v5797_v56 = vld [vmem:[#allocation71_spill] sm:$0xff]  ;;  %v5799_v57 = vld [vmem:[#allocation26_spill] sm:$0xff]  ;;  %v5800_v14 = vld [vmem:[#allocation45_spill] sm:$0xff] }
 0x466   : > { %v1729_v28 = vpop.permute.xlu1 %1728  ;;  %v1679_v34 = vadd.f32 %v1675_v31, %v1638_v5  ;;  %v1705_v30 = vadd.f32 %v4768_v7, %v4999_v37  ;;  %v1721_v29 = vadd.f32 %v4980_v58, %v1680_v36  ;;  %v5093_v15 = vadd.f32 %v5796_v50, %v2045_v45 }
 0x467   : > { %v1744_v46 = vadd.f32 %v4772_v40, %v1729_v28  ;;  %v1558_v42 = vadd.f32 %v1554_v10, %v5797_v56  ;;  %v1592_v3 = vmul.f32 %v4731_v54, %v1583_v43  ;;  %v2112_v53 = vadd.f32 %v5799_v57, %v5798_v48  ;;  %v5801_v10 = vld [vmem:[#allocation32_spill] sm:$0xff] }
 0x468   : > { %v2003_v49 = vadd.f32 %v5735_v4, %v5800_v14  ;;  %v1668_v17 = vand.u32 2147483647, %v1664_v21  ;;  %v1720_v22 = vadd.f32 %v1716_v62, %v1679_v34  ;;  %v1555_v28 = vadd.f32 %v1551_v38, %v1514_v18  ;;  %v5802_v4 = vld [vmem:[#allocation34_spill] sm:$0xff] }
 0x469   : > { %v1748_v61 = vand.u32 2147483647, %v1744_v46  ;;  %v2035_v58 = vand.u32 2147483647, %v2031_v41  ;;  %v1636_v36 = vmul.f32 %v4734_v27, %v1627_v26  ;;  %v2210_v45 = vadd.f32 %v4987_v16, %v2169_v12  ;;  %v5803_v62 = vld [vmem:[#allocation74_spill] sm:$0xff]  ;;  %v5804_v41 = vld [vmem:[#allocation28_spill] sm:$0xff] }
 0x46a   : > { %v1702_v54 = vadd.f32 %v4768_v7, %v5801_v10  ;;  %v1709_v43 = vand.u32 2147483647, %v1705_v30  ;;  %v1762_v60 = vadd.f32 %v4993_v32, %v1721_v29  ;;  %v1596_v46 = vadd.f32 %v1592_v3, %v1555_v28  ;;  %v5805_v26 = vld [vmem:[#allocation29_spill] sm:$0xff] }
 0x46b   : > { %v1757_v37 = vmul.f32 %v4748_v33, %v1748_v61  ;;  %v2186_v31 = vpop.permute.xlu1 %2185  ;;  %v1599_v21 = vadd.f32 %v5802_v4, %v1558_v42  ;;  %v2110_v13 = vadd.f32 %v5799_v57, %v5803_v62  ;;  %v2116_v35 = vand.u32 2147483647, %v2112_v53  ;;  %v5807_v3 = vld [vmem:[#allocation5_spill] sm:$0xff]  ;;  %v5811_v4 = vld [vmem:[#allocation48_spill] sm:$0xff] }
 0x46c   : > { %v2007_v18 = vmul.f32 0.6, %v2003_v49  ;;  %v1677_v38 = vmul.f32 %v4737_v8, %v1668_v17  ;;  %v1743_v27 = vadd.f32 %v4772_v40, %v1725_v52  ;;  %v2044_v7 = vmul.f32 %v4788_v2, %v2035_v58  ;;  %v5806_v8 = vld [vmem:[#allocation46_spill] sm:$0xff]  ;;  %v5808_v2 = vld [vmem:[#allocation27_spill] sm:$0xff] }
 0x46d   : > { %v1761_v5 = vadd.f32 %v1757_v37, %v1720_v22  ;;  %v1640_v12 = vadd.f32 %v1636_v36, %v1599_v21  ;;  %v2151_v32 = vadd.f32 %v5805_v26, %v5804_v41  ;;  %v2251_v30 = vadd.f32 %v4996_v47, %v2210_v45  ;;  %v876_v37 = vpop.xlane.xlu0 %875 }
 0x46e   : > { %v1706_v61 = vand.u32 2147483647, %v1702_v54  ;;  %v1718_v29 = vmul.f32 %v4745_v20, %v1709_v43  ;;  %v1637_v42 = vadd.f32 %v5806_v8, %v1596_v46  ;;  %v2114_v52 = vand.u32 2147483647, %v2110_v13  ;;  %v5810_v54 = vld [vmem:[#allocation38_spill] sm:$0xff]  ;;  %v5816_v8 = vld [vmem:[#allocation9_spill] sm:$0xff] }
 0x46f   : > { %v1802_v16 = vadd.f32 %v5019_v39, %v1761_v5  ;;  %v2125_v39 = vmul.f32 %v5807_v3, %v2116_v35  ;;  %v2192_v48 = vadd.f32 %v5808_v2, %v5037_v55  ;;  %v1681_v57 = vadd.f32 %v1677_v38, %v1640_v12  ;;  %v5813_v12 = vld [vmem:[#allocation43_spill] sm:$0xff] }
 0x470   : > { %v1737_v34 = vpop.permute.xlu1 %1736  ;;  %v1747_v53 = vand.u32 2147483647, %v1743_v27  ;;  %v2048_v17 = vadd.f32 %v2044_v7, %v2007_v18  ;;  %v2155_v22 = vand.u32 2147483647, %v2151_v32  ;;  %v1715_v28 = vmul.f32 %v4745_v20, %v1706_v61 }
 0x471   : > { %v1746_v50 = vadd.f32 %v4772_v40, %v1737_v34  ;;  %v1843_v56 = vadd.f32 %v1839_v25, %v1802_v16  ;;  %v2292_v25 = vadd.f32 %v5040_v6, %v2251_v30  ;;  %v2154_v55 = vadd.f32 %v5805_v26, %v4967_v0  ;;  %v5812_v0 = vld [vmem:[#allocation25_spill] sm:$0xff]  ;;  %v5814_v26 = vld [vmem:[#allocation8_spill] sm:$0xff] }
 0x472   : > { %v1722_v58 = vadd.f32 %v1718_v29, %v1681_v57  ;;  %v2123_v10 = vmul.f32 %v5807_v3, %v2114_v52  ;;  %v2129_v43 = vadd.f32 %v2125_v39, %v5810_v54  ;;  %v2196_v5 = vand.u32 2147483647, %v2192_v48  ;;  %v5815_v29 = vld [vmem:[#allocation30_spill] sm:$0xff]  ;;  %v5819_v48 = vld [vmem:[#allocation47_spill] sm:$0xff] }
 0x473   : > { %v1750_v14 = vand.u32 2147483647, %v1746_v50  ;;  %v5125_v47 = vsel %vm4625_vm11, %v1843_v56, -1e+30  ;;  %v1678_v6 = vadd.f32 %v5811_v4, %v1637_v42  ;;  %v1756_v21 = vmul.f32 %v4748_v33, %v1747_v53 }
 0x474   : > { %v1853_v40 = vsel %vm324_vm1, %v5125_v47, -inf  ;;  %v2195_v20 = vadd.f32 %v5808_v2, %v2186_v31  ;;  %v886_v13 = vsub.f32 %v5812_v0, %v876_v37  ;;  %v2164_v35 = vmul.f32 %v4801_v44, %v2155_v22  ;;  %v5818_v2 = vld [vmem:[#allocation49_spill] sm:$0xff] }
 0x475   : > { %v1759_v36 = vmul.f32 %v4748_v33, %v1750_v14  ;;  %v2215_v45 = vpop.permute.xlu1 %2214  ;;  %1854 = vmax.xlane.f32.xlu0 %v1853_v40  ;;  %v1803_v38 = vadd.f32 %v5027_v11, %v1762_v60  ;;  %v1719_v27 = vadd.f32 %v1715_v28, %v1678_v6  ;;  %v2158_v16 = vand.u32 2147483647, %v2154_v55  ;;  %v5822_v28 = vld [vmem:[#allocation56_spill] sm:$0xff]  ;;  %v5828_v6 = vld [vmem:[#allocation23_spill] sm:$0xff] }
 0x476   : > { %v2233_v46 = vadd.f32 %v4848_v63, %v2215_v45  ;;  %v2333_v63 = vadd.f32 %v5077_v19, %v2292_v25  ;;  %v2089_v41 = vadd.f32 %v5813_v12, %v2048_v17  ;;  %v2127_v33 = vadd.f32 %v2123_v10, %v5093_v15  ;;  %v5821_v25 = vld [vmem:[#allocation58_spill] sm:$0xff]  ;;  %v5825_v45 = vld [vmem:[#allocation75_spill] sm:$0xff] }
 0x477   : > { %v1763_v62 = vadd.f32 %v1759_v36, %v1722_v58  ;;  %v2170_v31 = vadd.f32 %v4977_v51, %v2129_v43  ;;  %v2205_v32 = vmul.f32 %v5814_v26, %v2196_v5  ;;  %v1760_v30 = vadd.f32 %v1756_v21, %v1719_v27  ;;  %v5823_v58 = vld [vmem:[#allocation55_spill] sm:$0xff]  ;;  %v5829_v21 = vld [vmem:[#allocation36_spill] sm:$0xff] }
 0x478   : > { %v2237_v18 = vand.u32 2147483647, %v2233_v46  ;;  %v2199_v61 = vand.u32 2147483647, %v2195_v20  ;;  %v890_v60 = vmul.f32 1.442695, %v886_v13  ;;  %v2168_v56 = vadd.f32 %v2164_v35, %v2127_v33 }
 0x479   : > { %v1804_v7 = vadd.f32 %v5030_v24, %v1763_v62  ;;  %v882_v24 = vpop.xlane.xlu0 %881  ;;  %v1844_v42 = vadd.f32 %v5064_v23, %v1803_v38  ;;  %v2167_v15 = vmul.f32 %v4801_v44, %v2158_v16  ;;  %v5160_v39 = vsel %vm4625_vm11, %v2333_v63, -1e+30  ;;  %v5820_v44 = vld [vmem:[#allocation52_spill] sm:$0xff]  ;;  %v5826_v43 = vld [vmem:[#allocation31_spill] sm:$0xff] }
 0x47a   : > { %v1807_v34 = vpop.permute.xlu1 %1806  ;;  %v2246_v19 = vmul.f32 %v5816_v8, %v2237_v18  ;;  %v2130_v57 = vadd.f32 %v5819_v48, %v2089_v41  ;;  %v2209_v53 = vadd.f32 %v2205_v32, %v2168_v56  ;;  %v2208_v23 = vmul.f32 %v5814_v26, %v2199_v61  ;;  %v5827_v46 = vld [vmem:[#allocation59_spill] sm:$0xff] }
 0x47b   : > { %v1825_v50 = vadd.f32 %v5815_v29, %v1807_v34  ;;  %v1845_v11 = vadd.f32 %v5068_v9, %v1804_v7  ;;  %v2211_v9 = vadd.f32 %v5818_v2, %v2170_v31  ;;  %v888_v17 = vsub.f32 %v5820_v44, %v882_v24  ;;  %v5832_v12 = vld [vmem:[#allocation51_spill] sm:$0xff] }
 0x47c   : > { %v1801_v37 = vadd.f32 %v5821_v25, %v1760_v30  ;;  %v2240_v55 = vand.u32 2147483647, %v5822_v28  ;;  %v5824_v36 = vand.u32 2147483647, %v5823_v58  ;;  %v2250_v54 = vadd.f32 %v2246_v19, %v2209_v53  ;;  %v5833_v58 = vld [vmem:[#allocation54_spill] sm:$0xff]  ;;  %v5840_v35 = vld [vmem:[#allocation7_spill] sm:$0xff] }
 0x47d   : > { %v1829_v52 = vand.u32 2147483647, %v1825_v50  ;;  %v5156_v3 = vsel %vm4400_vm9, %v1845_v11, -1e+30  ;;  %v2280_v4 = vand.u32 2147483647, %v5827_v46  ;;  %v2277_v20 = vadd.f32 %v5829_v21, %v5828_v6 }
 0x47e   : > { %v1859_v14 = vsel %vm324_vm1, %v5156_v3, -inf  ;;  %v2287_v10 = vmul.f32 %v5825_v45, %v5824_v36  ;;  %v2171_v62 = vadd.f32 %v2167_v15, %v2130_v57  ;;  %3391 = vpow2.f32 %v890_v60 }
 0x47f   : > { %v1838_v22 = vmul.f32 %v5790_v1, %v1829_v52  ;;  %v2297_v40 = vpop.permute.xlu1 %2296  ;;  %1860 = vmax.xlane.f32.xlu0 %v1859_v14  ;;  %v2343_v13 = vsel %vm324_vm1, %v5160_v39, -inf  ;;  %v5182_v18 = vsel %vm4383_vm8, %v1844_v42, -1e+30  ;;  %v894_v27 = vmul.f32 1.442695, %v888_v17 }
 0x480   : > { %v2315_v5 = vadd.f32 %v5826_v43, %v2297_v40  ;;  %v2212_v38 = vadd.f32 %v2208_v23, %v2171_v62  ;;  %v2252_v41 = vadd.f32 %v5832_v12, %v2211_v9  ;;  %v2291_v32 = vadd.f32 %v2287_v10, %v2250_v54  ;;  %v5834_v54 = vld [vmem:[#allocation18_spill] sm:$0xff]  ;;  %v5836_v62 = vld [vmem:[#allocation13_spill] sm:$0xff] }
 0x481   : > { %v1842_v1 = vadd.f32 %v1838_v22, %v1801_v37  ;;  %v2289_v34 = vmul.f32 %v5825_v45, %v2280_v4  ;;  %v2249_v30 = vmul.f32 %v5816_v8, %v2240_v55  ;;  %v2281_v61 = vand.u32 2147483647, %v2277_v20  ;;  %v885_v55 = vpop.xlane.xlu0 %884  ;;  %v5835_v4 = vld [vmem:[#allocation44_spill] sm:$0xff] }
 0x482   : > { %v2319_v0 = vand.u32 2147483647, %v2315_v5  ;;  %v1856_v60 = vsel %vm324_vm1, %v5182_v18, -inf  ;;  %3393 = vpow2.f32 %v894_v27  ;;  %v889_v36 = vsub.f32 %v5833_v58, %v885_v55 }
 0x483   : > { %v2305_v16 = vpop.permute.xlu1 %2304  ;;  %2344 = vmax.xlane.f32.xlu0 %v2343_v13  ;;  %v5186_v63 = vsel %vm4219_vm5, %v1842_v1, -1e+30  ;;  %v2293_v56 = vadd.f32 %v2289_v34, %v2252_v41  ;;  %v2253_v24 = vadd.f32 %v2249_v30, %v2212_v38  ;;  %v2290_v8 = vmul.f32 %v5825_v45, %v2281_v61  ;;  %v5837_v30 = vld [vmem:[#allocation78_spill] sm:$0xff] }
 0x484   : > { %v2328_v33 = vmul.f32 %v5792_v59, %v2319_v0  ;;  %v2317_v31 = vadd.f32 %v5826_v43, %v2305_v16  ;;  %v1850_v26 = vsel %vm324_vm1, %v5186_v63, -inf  ;;  %v896_v45 = vmul.f32 1.442695, %v889_v36 }
 0x485   : > { %1851 = vmax.xlane.f32.xlu1 %v1850_v26  ;;  %v2294_v53 = vadd.f32 %v2290_v8, %v2253_v24 }
 0x486   : > { %v2321_v29 = vand.u32 2147483647, %v2317_v31  ;;  %v2332_v50 = vadd.f32 %v2328_v33, %v2291_v32  ;;  %3395 = vpow2.f32 %v896_v45 }
 0x487   : > { %v2309_v11 = vpop.permute.xlu1 %2308 }
 0x488   : > { %v2330_v19 = vmul.f32 %v5792_v59, %v2321_v29  ;;  %v2318_v42 = vadd.f32 %v5826_v43, %v2309_v11  ;;  %v5201_v15 = vsel %vm4219_vm5, %v2332_v50, -1e+30  ;;  %v3392_v9 = vpop.eup %3391 }
 0x489   : > { %1857 = vmax.xlane.f32.xlu1 %v1856_v60  ;;  %v2340_v57 = vsel %vm324_vm1, %v5201_v15, -inf  ;;  %v5221_v22 = vsel %vm4219_vm5, %v3392_v9, 0.0 }
 0x48a   : > { %v2322_v52 = vand.u32 2147483647, %v2318_v42  ;;  %v2334_v2 = vadd.f32 %v2330_v19, %v2293_v56  ;;  %v902_v25 = vsel %vm324_vm1, %v5221_v22, 0.0  ;;  %v5838_v56 = vld [vmem:[#allocation67_spill] sm:$0xff] }
 0x48c   : > { %v2331_v48 = vmul.f32 %v5792_v59, %v2322_v52  ;;  %v5209_v14 = vsel %vm4383_vm8, %v2334_v2, -1e+30  ;;  %v3394_v40 = vpop.eup %3393 }
 0x48d   : > { %2341 = vmax.xlane.f32.xlu1 %v2340_v57  ;;  %v2346_v44 = vsel %vm324_vm1, %v5209_v14, -inf  ;;  %v5227_v37 = vsel %vm4383_vm8, %v3394_v40, 0.0 }
 0x48e   : > { %v2335_v23 = vadd.f32 %v2331_v48, %v2294_v53  ;;  %v908_v28 = vsel %vm324_vm1, %v5227_v37, 0.0 }
 0x490   : > { %v5215_v17 = vsel %vm4400_vm9, %v2335_v23, -1e+30  ;;  %v3396_v13 = vpop.eup %3395 }
 0x491   : > { %2347 = vmax.xlane.f32.xlu1 %v2346_v44  ;;  %v2349_v59 = vsel %vm324_vm1, %v5215_v17, -inf  ;;  %v5243_v12 = vsel %vm4400_vm9, %v3396_v13, 0.0 }
 0x492   : > { %2350 = vmax.xlane.f32.xlu0 %v2349_v59  ;;  %v911_v26 = vsel %vm324_vm1, %v5243_v12, 0.0 }
 0x495   : > { %903 = vadd.xlane.f32.xlu1 %v902_v25 }
 0x499   : > { %909 = vadd.xlane.f32.xlu1 %v908_v28 }
 0x4b9   : > { %v879_v10 = vpop.xlane.xlu1 %878 }
 0x4ba   : > { %v887_v43 = vsub.f32 %v5834_v54, %v879_v10 }
 0x4bc   : > { %v892_v5 = vmul.f32 1.442695, %v887_v43 }
 0x4bd   : > { %v1360_v46 = vpop.xlane.xlu1 %1359 }
 0x4be   : > { %3397 = vpow2.f32 %v892_v5  ;;  %v1370_v6 = vsub.f32 %v5835_v4, %v1360_v46 }
 0x4c0   : > { %v1374_v21 = vmul.f32 1.442695, %v1370_v6  ;;  %v1363_v20 = vpop.xlane.xlu0 %1362 }
 0x4c1   : > { %v1371_v1 = vsub.f32 %v5836_v62, %v1363_v20 }
 0x4c2   : > { %3399 = vpow2.f32 %v1374_v21 }
 0x4c3   : > { %v1376_v0 = vmul.f32 1.442695, %v1371_v1 }
 0x4c5   : > { %3401 = vpow2.f32 %v1376_v0 }
 0x4c8   : > { %v3398_v38 = vpop.eup %3397 }
 0x4c9   : > { %v5237_v27 = vsel %vm4625_vm11, %v3398_v38, 0.0 }
 0x4ca   : > { %v905_v16 = vsel %vm324_vm1, %v5237_v27, 0.0 }
 0x4cb   : > { %906 = vadd.xlane.f32.xlu0 %v905_v16 }
 0x4cc   : > { %v3400_v41 = vpop.eup %3399 }
 0x4cd   : > { %v5247_v33 = vsel %vm4219_vm5, %v3400_v41, 0.0 }
 0x4ce   : > { %v1386_v31 = vsel %vm324_vm1, %v5247_v33, 0.0 }
 0x4cf   : > { %v3402_v32 = vpop.eup %3401  ;;  %v1366_v34 = vpop.xlane.xlu1 %1365  ;;  %1387 = vadd.xlane.f32.xlu1 %v1386_v31  ;;  %912 = vadd.xlane.f32.xlu0 %v911_v26 }
 0x4d0   : > { %v1372_v61 = vsub.f32 %v5837_v30, %v1366_v34  ;;  %v5256_v29 = vsel %vm4625_vm11, %v3402_v32, 0.0 }
 0x4d1   : > { %v1389_v50 = vsel %vm324_vm1, %v5256_v29, 0.0 }
 0x4d2   : > { %v1378_v11 = vmul.f32 1.442695, %v1372_v61 }
 0x4d3   : > { %1390 = vadd.xlane.f32.xlu0 %v1389_v50  ;;  %v1369_v60 = vpop.xlane.xlu0 %1368 }
 0x4d4   : > { %3403 = vpow2.f32 %v1378_v11  ;;  %v1373_v24 = vsub.f32 %v5838_v56, %v1369_v60 }
 0x4d6   : > { %v1380_v19 = vmul.f32 1.442695, %v1373_v24  ;;  %v5839_v24 = vld [vmem:[#allocation6_spill] sm:$0xff] }
 0x4d8   : > { %3405 = vpow2.f32 %v1380_v19 }
 0x4de   : > { %v3404_v42 = vpop.eup %3403 }
 0x4df   : > { %v5263_v8 = vsel %vm4383_vm8, %v3404_v42, 0.0 }
 0x4e0   : > { %v1392_v52 = vsel %vm324_vm1, %v5263_v8, 0.0 }
 0x4e1   : > { %1393 = vadd.xlane.f32.xlu1 %v1392_v52 }
 0x4e2   : > { %v3406_v2 = vpop.eup %3405 }
 0x4e3   : > { %v5269_v9 = vsel %vm4400_vm9, %v3406_v2, 0.0 }
 0x4e4   : > { %v1395_v48 = vsel %vm324_vm1, %v5269_v9, 0.0 }
 0x4e5   : > { %1396 = vadd.xlane.f32.xlu0 %v1395_v48 }
 0x502   : > { %v1855_v57 = vpop.xlane.xlu0 %1854 }
 0x503   : > { %v1863_v53 = vsub.f32 %v5125_v47, %v1855_v57 }
 0x505   : > { %v1868_v23 = vmul.f32 1.442695, %v1863_v53 }
 0x507   : > { %3407 = vpow2.f32 %v1868_v23 }
 0x50c   : > { %v1861_v44 = vpop.xlane.xlu0 %1860 }
 0x50d   : > { %v1865_v59 = vsub.f32 %v5156_v3, %v1861_v44 }
 0x50f   : > { %v1872_v40 = vmul.f32 1.442695, %v1865_v59 }
 0x510   : > { %v2345_v25 = vpop.xlane.xlu0 %2344 }
 0x511   : > { %v3408_v28 = vpop.eup %3407  ;;  %3409 = vpow2.f32 %v1872_v40  ;;  %v2353_v55 = vsub.f32 %v5160_v39, %v2345_v25 }
 0x512   : > { %v1852_v58 = vpop.xlane.xlu1 %1851  ;;  %v5278_v36 = vsel %vm4625_vm11, %v3408_v28, 0.0 }
 0x513   : > { %v2358_v45 = vmul.f32 1.442695, %v2353_v55  ;;  %v1862_v10 = vsub.f32 %v5186_v63, %v1852_v58  ;;  %v1881_v47 = vsel %vm324_vm1, %v5278_v36, 0.0 }
 0x514   : > { %1882 = vadd.xlane.f32.xlu0 %v1881_v47 }
 0x515   : > { %3411 = vpow2.f32 %v2358_v45  ;;  %v1866_v3 = vmul.f32 1.442695, %v1862_v10 }
 0x516   : > { %v1858_v54 = vpop.xlane.xlu1 %1857 }
 0x517   : > { %3413 = vpow2.f32 %v1866_v3  ;;  %v1864_v43 = vsub.f32 %v5182_v18, %v1858_v54 }
 0x519   : > { %v1870_v5 = vmul.f32 1.442695, %v1864_v43 }
 0x51a   : > { %v2342_v39 = vpop.xlane.xlu1 %2341 }
 0x51b   : > { %v3410_v46 = vpop.eup %3409  ;;  %3415 = vpow2.f32 %v1870_v5  ;;  %v2352_v4 = vsub.f32 %v5201_v15, %v2342_v39 }
 0x51c   : > { %v5287_v6 = vsel %vm4400_vm9, %v3410_v46, 0.0 }
 0x51d   : > { %v2356_v63 = vmul.f32 1.442695, %v2352_v4  ;;  %v1887_v21 = vsel %vm324_vm1, %v5287_v6, 0.0 }
 0x51e   : > { %v2348_v20 = vpop.xlane.xlu1 %2347  ;;  %1888 = vadd.xlane.f32.xlu0 %v1887_v21 }
 0x51f   : > { %v3412_v62 = vpop.eup %3411  ;;  %3417 = vpow2.f32 %v2356_v63  ;;  %v2354_v18 = vsub.f32 %v5209_v14, %v2348_v20  ;;  %v2351_v1 = vpop.xlane.xlu0 %2350 }
 0x520   : > { %v2355_v0 = vsub.f32 %v5215_v17, %v2351_v1  ;;  %v5295_v15 = vsel %vm4625_vm11, %v3412_v62, 0.0 }
 0x521   : > { %v3414_v13 = vpop.eup %3413  ;;  %v2360_v38 = vmul.f32 1.442695, %v2354_v18  ;;  %v2371_v16 = vsel %vm324_vm1, %v5295_v15, 0.0 }
 0x522   : > { %v2362_v41 = vmul.f32 1.442695, %v2355_v0  ;;  %2372 = vadd.xlane.f32.xlu0 %v2371_v16  ;;  %v5301_v31 = vsel %vm4219_vm5, %v3414_v13, 0.0  ;;  %v904_v51 = vpop.xlane.xlu1 %903 }
 0x523   : > { %3419 = vpow2.f32 %v2360_v38  ;;  %v1878_v14 = vsel %vm324_vm1, %v5301_v31, 0.0  ;;  %vm914_vm12 = vcmp.gt.f32.partialorder %v904_v51, 0.0 }
 0x524   : > { %3421 = vpow2.f32 %v2362_v41  ;;  %1879 = vadd.xlane.f32.xlu1 %v1878_v14  ;;  %v918_v42 = vsel %vm914_vm12, %v904_v51, 1.0 }
 0x525   : > { %v3416_v49 = vpop.eup %3415  ;;  %3423 = vrcp.f32 %v918_v42 }
 0x526   : > { %v5307_v17 = vsel %vm4383_vm8, %v3416_v49, 0.0  ;;  %v910_v19 = vpop.xlane.xlu1 %909 }
 0x527   : > { %v1884_v26 = vsel %vm324_vm1, %v5307_v17, 0.0  ;;  %vm916_vm13 = vcmp.gt.f32.partialorder %v910_v19, 0.0 }
 0x528   : > { %1885 = vadd.xlane.f32.xlu1 %v1884_v26  ;;  %v920_v48 = vsel %vm916_vm13, %v910_v19, 1.0 }
 0x529   : > { %v3418_v32 = vpop.eup %3417 }
 0x52a   : > { %v5313_v34 = vsel %vm4219_vm5, %v3418_v32, 0.0 }
 0x52b   : > { %v2368_v30 = vsel %vm324_vm1, %v5313_v34, 0.0 }
 0x52c   : > { %2369 = vadd.xlane.f32.xlu1 %v2368_v30 }
 0x52d   : > { %v3420_v61 = vpop.eup %3419 }
 0x52e   : > { %v3422_v50 = vpop.eup %3421  ;;  %v5319_v11 = vsel %vm4383_vm8, %v3420_v61, 0.0 }
 0x52f   : > { %v2374_v60 = vsel %vm324_vm1, %v5319_v11, 0.0  ;;  %v5325_v56 = vsel %vm4400_vm9, %v3422_v50, 0.0  ;;  %v3424_v25 = vpop.eup %3423 }
 0x530   : > { %2375 = vadd.xlane.f32.xlu1 %v2374_v60  ;;  %v2377_v7 = vsel %vm324_vm1, %v5325_v56, 0.0  ;;  %v926_v55 = vmul.f32 %v3424_v25, %v5221_v22 }
 0x531   : > { %2378 = vadd.xlane.f32.xlu0 %v2377_v7 }
 0x541   : > { %1418 = vrot.lane.b32.xlu1 %v5839_v24, %s3546_s26 }
 0x545   : > { %1908 = vrot.lane.b32.xlu1 %v5839_v24, %s3550_s30 }
 0x547   : > { %1420 = vrot.lane.b32.xlu0 %v5840_v35, %s3546_s26  ;;  %s3611_s26 = smov 24  }
 0x549   : > { %2398 = vrot.lane.b32.xlu1 %v5839_v24, %s3554_s11 }
 0x54b   : > { %1910 = vrot.lane.b32.xlu0 %v5840_v35, %s3550_s30  ;;  %s3612_s30 = smov 8  }
 0x54d   : > { %2400 = vrot.lane.b32.xlu1 %v5840_v35, %s3554_s11  ;;  %s3613_s11 = smov 16  }
 0x558   : > { %v907_v52 = vpop.xlane.xlu0 %906 }
 0x559   : > { %vm915_vm14 = vcmp.gt.f32.partialorder %v907_v52, 0.0 }
 0x55a   : > { %v919_v2 = vsel %vm915_vm14, %v907_v52, 1.0  ;;  %vm2516_vm14 = vcmask 195584  }
 0x55b   : > { %3425 = vrcp.f32 %v919_v2 }
 0x55c   : > { %v1388_v57 = vpop.xlane.xlu1 %1387  ;;  %v913_v53 = vpop.xlane.xlu0 %912  ;;  %3427 = vrcp.f32 %v920_v48 }
 0x55d   : > { %vm1398_vm15 = vcmp.gt.f32.partialorder %v1388_v57, 0.0  ;;  %vm917_vm0 = vcmp.gt.f32.partialorder %v913_v53, 0.0 }
 0x55e   : > { %v1402_v23 = vsel %vm1398_vm15, %v1388_v57, 1.0  ;;  %v921_v44 = vsel %vm917_vm0, %v913_v53, 1.0  ;;  %vm2511_vm15 = vcmask 130048  }
 0x55f   : > { %3429 = vrcp.f32 %v921_v44 }
 0x560   : > { %v1391_v59 = vpop.xlane.xlu0 %1390  ;;  %3431 = vrcp.f32 %v1402_v23 }
 0x561   : > { %vm1399_vm3 = vcmp.gt.f32.partialorder %v1391_v59, 0.0 }
 0x562   : > { %v1403_v40 = vsel %vm1399_vm3, %v1391_v59, 1.0 }
 0x563   : > { %3433 = vrcp.f32 %v1403_v40 }
 0x565   : > { %v3426_v28 = vpop.eup %3425 }
 0x566   : > { %v927_v58 = vmul.f32 %v3426_v28, %v5237_v27  ;;  %v3428_v45 = vpop.eup %3427 }
 0x567   : > { %v928_v54 = vmul.f32 %v3428_v45, %v5227_v37 }
 0x568   : > { %v930_v10 = vpack.c.bf16 %v927_v58, %v926_v55 }
 0x569   : > { %v3430_v47 = vpop.eup %3429 }
 0x56a   : > { %3083 = vmatprep.mubr.msk.bf16.mxu1 %vm324_vm1, %v930_v10  ;;  %v3432_v3 = vpop.eup %3431  ;;  %v929_v43 = vmul.f32 %v3430_v47, %v5243_v12 }
 0x56b   : > { %v1410_v46 = vmul.f32 %v3432_v3, %v5247_v33 }
 0x56c   : > { %v931_v39 = vpack.c.bf16 %v929_v43, %v928_v54 }
 0x56d   : > { %v3434_v5 = vpop.eup %3433 }
 0x56e   : > { %v1411_v4 = vmul.f32 %v3434_v5, %v5256_v29  ;;  %3084 = vmatmul.mubr.msk.bf16.vlgmr.msra.gmra.mrb[4].mxu1 %vm324_vm1, %v931_v39  ;;  %v1394_v20 = vpop.xlane.xlu1 %1393 }
 0x56f   : > { %vm1400_vm4 = vcmp.gt.f32.partialorder %v1394_v20, 0.0 }
 0x570   : > { %v1414_v22 = vpack.c.bf16 %v1411_v4, %v1410_v46  ;;  %v1404_v12 = vsel %vm1400_vm4, %v1394_v20, 1.0 }
 0x571   : > { %3435 = vrcp.f32 %v1404_v12 }
 0x572   : > { %3091 = vmatprep.mubr.msk.bf16.mxu1 %vm324_vm1, %v1414_v22  ;;  %v1397_v27 = vpop.xlane.xlu0 %1396 }
 0x573   : > { %vm1401_vm5 = vcmp.gt.f32.partialorder %v1397_v27, 0.0 }
 0x574   : > { %v1405_v18 = vsel %vm1401_vm5, %v1397_v27, 1.0 }
 0x575   : > { %3437 = vrcp.f32 %v1405_v18 }
 0x57b   : > { %v3436_v32 = vpop.eup %3435 }
 0x57c   : > { %v1412_v2 = vmul.f32 %v3436_v32, %v5263_v8 }
 0x57f   : > { %v3438_v61 = vpop.eup %3437 }
 0x580   : > { %v1413_v51 = vmul.f32 %v3438_v61, %v5269_v9 }
 0x582   : > { %v1415_v44 = vpack.c.bf16 %v1413_v51, %v1412_v2 }
 0x5a1   : > { %v1883_v63 = vpop.xlane.xlu0 %1882 }
 0x5a2   : > { %vm1891_vm7 = vcmp.gt.f32.partialorder %v1883_v63, 0.0 }
 0x5a3   : > { %v1895_v1 = vsel %vm1891_vm7, %v1883_v63, 1.0 }
 0x5ab   : > { %v1889_v21 = vpop.xlane.xlu0 %1888 }
 0x5ac   : > { %vm1893_vm9 = vcmp.gt.f32.partialorder %v1889_v21, 0.0 }
 0x5ad   : > { %v1897_v38 = vsel %vm1893_vm9, %v1889_v21, 1.0 }
 0x5af   : > { %v2373_v37 = vpop.xlane.xlu0 %2372 }
 0x5b0   : > { %vm2381_vm8 = vcmp.gt.f32.partialorder %v2373_v37, 0.0 }
 0x5b1   : > { %v1880_v62 = vpop.xlane.xlu1 %1879  ;;  %v2385_v0 = vsel %vm2381_vm8, %v2373_v37, 1.0 }
 0x5b2   : > { %vm1890_vm6 = vcmp.gt.f32.partialorder %v1880_v62, 0.0 }
 0x5b3   : > { %v1894_v33 = vsel %vm1890_vm6, %v1880_v62, 1.0 }
 0x5b4   : > { %3439 = vrcp.f32 %v1894_v33 }
 0x5b5   : > { %v1886_v29 = vpop.xlane.xlu1 %1885  ;;  %3441 = vrcp.f32 %v1895_v1 }
 0x5b6   : > { %vm1892_vm10 = vcmp.gt.f32.partialorder %v1886_v29, 0.0  ;;  %3443 = vrcp.f32 %v2385_v0  ;;  %v5370_v0 = vld [vmem:[%s3692_s13] sm:$0xff] }
 0x5b7   : > { %v1896_v41 = vsel %vm1892_vm10, %v1886_v29, 1.0 }
 0x5b9   : > { %v2370_v13 = vpop.xlane.xlu1 %2369 }
 0x5ba   : > { %vm2380_vm11 = vcmp.gt.f32.partialorder %v2370_v13, 0.0 }
 0x5bb   : > { %v2384_v16 = vsel %vm2380_vm11, %v2370_v13, 1.0  ;;  %v5841_v13 = vld [vmem:[#allocation15_spill] sm:$0xff] }
 0x5bc   : > { %3445 = vrcp.f32 %v2384_v16 }
 0x5bd   : > { %v2376_v14 = vpop.xlane.xlu1 %2375  ;;  %3447 = vrcp.f32 %v1897_v38  ;;  %v2524_v38 = vrot.slane %v5370_v0, %v5841_v13 }
 0x5be   : > { %vm2382_vm12 = vcmp.gt.f32.partialorder %v2376_v14, 0.0  ;;  %v2379_v49 = vpop.xlane.xlu0 %2378  ;;  %3449 = vrcp.f32 %v1896_v41  ;;  %v3440_v60 = vpop.eup %3439 }
 0x5bf   : > { %v2386_v26 = vsel %vm2382_vm12, %v2376_v14, 1.0  ;;  %vm2383_vm13 = vcmp.gt.f32.partialorder %v2379_v49, 0.0  ;;  %v3442_v24 = vpop.eup %3441  ;;  %v1902_v42 = vmul.f32 %v3440_v60, %v5301_v31 }
 0x5c0   : > { %3451 = vrcp.f32 %v2386_v26  ;;  %v2387_v30 = vsel %vm2383_vm13, %v2379_v49, 1.0  ;;  %v3444_v35 = vpop.eup %3443  ;;  %v1903_v48 = vmul.f32 %v3442_v24, %v5278_v36 }
 0x5c1   : > { %3453 = vrcp.f32 %v2387_v30  ;;  %v1419_v50 = vpop.permute.xlu1 %1418  ;;  %v2393_v53 = vmul.f32 %v3444_v35, %v5295_v15 }
 0x5c2   : > { %v1421_v7 = vpop.permute.xlu0 %1420  ;;  %3087 = vmatprep.subr.bf16.mxu1 %v1419_v50  ;;  %v1906_v9 = vpack.c.bf16 %v1903_v48, %v1902_v42 }
 0x5c3   : > { %3088 = vmatpush3.bf16.msra.mxu1 %v1419_v50 }
 0x5c4   : > { %3089 = vmatprep.subr.bf16.mxu1 %v1421_v7 }
 0x5c5   : > { %v1909_v19 = vpop.permute.xlu1 %1908 }
 0x5c6   : > { %v3446_v52 = vpop.eup %3445  ;;  %v1911_v36 = vpop.permute.xlu0 %1910 }
 0x5c7   : > { %3090 = vmatpush3.bf16.msra.mxu1 %v1421_v7  ;;  %v2392_v57 = vmul.f32 %v3446_v52, %v5313_v34  ;;  %v3448_v23 = vpop.eup %3447 }
 0x5c8   : > { %3095 = vmatprep.subr.bf16.mxu1 %v1909_v19  ;;  %v3450_v59 = vpop.eup %3449  ;;  %v1905_v58 = vmul.f32 %v3448_v23, %v5287_v6 }
 0x5c9   : > { %v2399_v40 = vpop.permute.xlu1 %2398  ;;  %v2396_v25 = vpack.c.bf16 %v2393_v53, %v2392_v57  ;;  %v1904_v8 = vmul.f32 %v3450_v59, %v5307_v17 }
 0x5ca   : > { %v3452_v28 = vpop.eup %3451  ;;  %3092 = vmatmul.mubr.msk.bf16.vlgmr.msra.gmra.mrb[8].mxu1 %vm324_vm1, %v1415_v44  ;;  %3103 = vmatprep.subr.bf16.mxu0 %v2399_v40 }
 0x5cb   : > { %v3454_v31 = vpop.eup %3453  ;;  %3096 = vmatpush3.bf16.msra.mxu1 %v1909_v19  ;;  %3099 = vmatprep.mubr.msk.bf16.mxu1 %vm324_vm1, %v1906_v9  ;;  %v2394_v34 = vmul.f32 %v3452_v28, %v5319_v11  ;;  %v1907_v45 = vpack.c.bf16 %v1905_v58, %v1904_v8 }
 0x5cc   : > { %3104 = vmatpush3.bf16.msra.mxu0 %v2399_v40  ;;  %3107 = vmatprep.mubr.msk.bf16.mxu0 %vm324_vm1, %v2396_v25  ;;  %v2395_v55 = vmul.f32 %v3454_v31, %v5325_v56 }
 0x5cd   : > { %3097 = vmatprep.subr.bf16.mxu1 %v1911_v36  ;;  %v2401_v15 = vpop.permute.xlu1 %2400 }
 0x5ce   : > { %3105 = vmatprep.subr.bf16.mxu0 %v2401_v15  ;;  %v2397_v10 = vpack.c.bf16 %v2395_v55, %v2394_v34 }
 0x5cf   : > { %3098 = vmatpush3.bf16.msra.mxu1 %v1911_v36 }
 0x5d0   : > { %3106 = vmatpush3.bf16.msra.mxu0 %v2401_v15 }
 0x5d2   : > { %3100 = vmatmul.mubr.msk.bf16.vlgmr.msra.gmra.mrb[12].mxu1 %vm324_vm1, %v1907_v45 }
 0x5d3   : > { %3108 = vmatmul.mubr.msk.bf16.vlgmr.msra.gmra.mrb[0].mxu0 %vm324_vm1, %v2397_v10 }
 0x641   : > { %v3085_v17 = vpop.f32.mrb[4].mxu1 }
 0x642   : > { %v972_v47 = vpop.f32.mrb[5].mxu1 }
 0x643   : > { %v3086_v3 = vpop.f32.mrb[6].mxu1 }
 0x644   : > { %v975_v54 = vpop.f32.mrb[7].mxu1 }
 0x69d   : > { %v3093_v43 = vpop.f32.mrb[8].mxu1 }
 0x69e   : > { %v1464_v5 = vpop.f32.mrb[9].mxu1 }
 0x69f   : > { %v3094_v11 = vpop.f32.mrb[10].mxu1 }
 0x6a0   : > { %v1467_v39 = vpop.f32.mrb[11].mxu1 }
 0x6a5   : > { %v3101_v56 = vpop.f32.mrb[12].mxu1 }
 0x6a6   : > { %v3109_v46 = vpop.f32.mrb[0].mxu0  ;;  %v1954_v6 = vpop.f32.mrb[13].mxu1 }
 0x6a7   : > { %v2444_v4 = vpop.f32.mrb[1].mxu0  ;;  %v3102_v22 = vpop.f32.mrb[14].mxu1 }
 0x6a8   : > { %2495 = vrot.lane.b32.xlu0 %v2444_v4, %s3611_s26  ;;  %v3110_v27 = vpop.f32.mrb[2].mxu0  ;;  %v1957_v63 = vpop.f32.mrb[15].mxu1 }
 0x6a9   : > { %v2447_v21 = vpop.f32.mrb[3].mxu0 }
 0x6aa   : > { %2497 = vrot.lane.b32.xlu1 %v2447_v21, %s3611_s26 }
 0x6ac   : > { %2467 = vrot.lane.b32.xlu0 %v3093_v43, %s3612_s30 }
 0x6ae   : > { %2469 = vrot.lane.b32.xlu1 %v3094_v11, %s3612_s30 }
 0x6b0   : > { %2463 = vrot.lane.b32.xlu0 %v1464_v5, %s3612_s30 }
 0x6b2   : > { %2465 = vrot.lane.b32.xlu1 %v1467_v39, %s3612_s30  ;;  %v3381_v39 = vld [vmem:[%s2601_s16] sm:$0xff]  }
 0x6b3   : > { %3111 = vmatprep.subr.bf16.mxu1 %v3381_v39 }
 0x6b4   : > { %2483 = vrot.lane.b32.xlu0 %v3101_v56, %s3613_s11  ;;  %3112 = vmatpush3.bf16.msra.mxu1 %v3381_v39  ;;  %v3382_v56 = vld [vmem:[%s2601_s16 + $0x8] sm:$0xff]  }
 0x6b5   : > { %3113 = vmatprep.subr.bf16.mxu1 %v3382_v56 }
 0x6b6   : > { %2485 = vrot.lane.b32.xlu1 %v3102_v22, %s3613_s11 }
 0x6b8   : > { %2479 = vrot.lane.b32.xlu0 %v1954_v6, %s3613_s11  ;;  %3114 = vmatpush3.bf16.msra.mxu1 %v3382_v56 }
 0x6ba   : > { %2481 = vrot.lane.b32.xlu1 %v1957_v63, %s3613_s11 }
 0x6bc   : > { %2499 = vrot.lane.b32.xlu0 %v3109_v46, %s3611_s26 }
 0x6be   : > { %2501 = vrot.lane.b32.xlu1 %v3110_v27, %s3611_s26 }
 0x71a   : > { %v2496_v20 = vpop.permute.xlu0 %2495 }
 0x71c   : > { %v2498_v37 = vpop.permute.xlu1 %2497 }
 0x71e   : > { %v2468_v62 = vpop.permute.xlu0 %2467 }
 0x71f   : > { %v2509_v30 = vsel %vm481_vm2, %v3085_v17, %v2468_v62 }
 0x720   : > { %v2470_v12 = vpop.permute.xlu1 %2469 }
 0x721   : > { %v2510_v35 = vsel %vm481_vm2, %v3086_v3, %v2470_v12 }
 0x722   : > { %v2464_v18 = vpop.permute.xlu0 %2463 }
 0x723   : > { %v2507_v16 = vsel %vm481_vm2, %v972_v47, %v2464_v18 }
 0x724   : > { %v2466_v33 = vpop.permute.xlu1 %2465 }
 0x725   : > { %v2508_v49 = vsel %vm481_vm2, %v975_v54, %v2466_v33  ;;  %v5842_v33 = vld [vmem:[#allocation16_spill] sm:$0xff] }
 0x726   : > { %v2484_v29 = vpop.permute.xlu0 %2483 }
 0x727   : > { %v2514_v60 = vsel %vm2511_vm15, %v2509_v30, %v2484_v29  ;;  %v2585_v29 = vrot.slane %v5370_v0, %v5842_v33 }
 0x728   : > { %v2486_v1 = vpop.permute.xlu1 %2485 }
 0x729   : > { %v2515_v52 = vsel %vm2511_vm15, %v2510_v35, %v2486_v1 }
 0x72a   : > { %v2480_v41 = vpop.permute.xlu0 %2479 }
 0x72b   : > { %v2512_v14 = vsel %vm2511_vm15, %v2507_v16, %v2480_v41 }
 0x72c   : > { %v2517_v26 = vsel %vm2516_vm14, %v2512_v14, %v2496_v20  ;;  %v2482_v32 = vpop.permute.xlu1 %2481  ;;  %v5843_v14 = vld [vmem:[#allocation17_spill] sm:$0xff] }
 0x72d   : > { %v5379_v61 = vadd.f32 %v2524_v38, %v2517_v26  ;;  %v2513_v50 = vsel %vm2511_vm15, %v2508_v49, %v2482_v32  ;;  %v2593_v49 = vrot.slane %v5370_v0, %v5843_v14 }
 0x72e   : > { %v2518_v7 = vsel %vm2516_vm14, %v2513_v50, %v2498_v37  ;;  %v2500_v24 = vpop.permute.xlu0 %2499 }
 0x72f   : > { %v5385_v51 = vadd.f32 %v2524_v38, %v2518_v7  ;;  %v2519_v19 = vsel %vm2516_vm14, %v2514_v60, %v2500_v24  ;;  %v2529_v42 = vsel %vm324_vm1, %v5379_v61, 0.0 }
 0x730   : > { %v5391_v2 = vadd.f32 %v2524_v38, %v2519_v19  ;;  %2530 = vadd.xlane.f32.xlu0 %v2529_v42  ;;  %v2502_v48 = vpop.permute.xlu1 %2501 }
 0x731   : > { %v2520_v57 = vsel %vm2516_vm14, %v2515_v52, %v2502_v48  ;;  %v2532_v53 = vsel %vm324_vm1, %v5385_v51, 0.0 }
 0x732   : > { %2533 = vadd.xlane.f32.xlu1 %v2532_v53  ;;  %v2535_v23 = vsel %vm324_vm1, %v5391_v2, 0.0  ;;  %v5398_v44 = vadd.f32 %v2524_v38, %v2520_v57  ;;  %v3383_v53 = vld [vmem:[%s2708_s19] sm:$0xff]  }
 0x733   : > { %3119 = vmatprep.subr.bf16.mxu0 %v3383_v53 }
 0x734   : > { %2536 = vadd.xlane.f32.xlu0 %v2535_v23  ;;  %v2538_v59 = vsel %vm324_vm1, %v5398_v44, 0.0  ;;  %3120 = vmatpush3.bf16.msra.mxu0 %v3383_v53  ;;  %v3384_v23 = vld [vmem:[%s2708_s19 + $0x8] sm:$0xff]  }
 0x735   : > { %3121 = vmatprep.subr.bf16.mxu0 %v3384_v23 }
 0x738   : > { %2539 = vadd.xlane.f32.xlu0 %v2538_v59  ;;  %3122 = vmatpush3.bf16.msra.mxu0 %v3384_v23  ;;  %v3385_v59 = vld [vmem:[%s2708_s19 + $0x10] sm:$0xff]  }
 0x739   : > { %3123 = vmatprep.subr.bf16.mxu0 %v3385_v59 }
 0x73c   : > { %3124 = vmatpush3.bf16.msra.mxu0 %v3385_v59 }
 0x7bd   : > { %v2531_v40 = vpop.xlane.xlu0 %2530 }
 0x7be   : > { %v2542_v9 = vmul.f32 0.03125, %v2531_v40  ;;  %v3386_v40 = vld [vmem:[%s2708_s19 + $0x18] sm:$0xff]  }
 0x7bf   : > { %v2534_v25 = vpop.xlane.xlu1 %2533  ;;  %3125 = vmatprep.subr.bf16.mxu0 %v3386_v40 }
 0x7c0   : > { %v2546_v28 = vsub.f32 %v5379_v61, %v2542_v9  ;;  %v2543_v31 = vmul.f32 0.03125, %v2534_v25  ;;  %3126 = vmatpush3.bf16.msra.mxu0 %v3386_v40  ;;  %v3387_v9 = vld [vmem:[%s2708_s19 + $0x20] sm:$0xff]   ;;  %v3388_v25 = vld [vmem:[%s2708_s19 + $0x28] sm:$0xff]  }
 0x7c1   : > { %v2537_v8 = vpop.xlane.xlu0 %2536  ;;  %3127 = vmatprep.subr.bf16.mxu0 %v3387_v9 }
 0x7c2   : > { %v2547_v36 = vsub.f32 %v5385_v51, %v2543_v31  ;;  %v2544_v15 = vmul.f32 0.03125, %v2537_v8  ;;  %v2550_v34 = vmul.f32 %v2546_v28, %v2546_v28  ;;  %v3390_v31 = vld [vmem:[%s2708_s19 + $0x38] sm:$0xff]   ;;  %v5844_v8 = vld [vmem:[#allocation22_spill] sm:$0xff] }
 0x7c4   : > { %v2548_v55 = vsub.f32 %v5391_v2, %v2544_v15  ;;  %v2554_v58 = vsel %vm324_vm1, %v2550_v34, 0.0  ;;  %v2551_v45 = vmul.f32 %v2547_v36, %v2547_v36  ;;  %3128 = vmatpush3.bf16.msra.mxu0 %v3387_v9 }
 0x7c5   : > { %2555 = vadd.xlane.f32.xlu1 %v2554_v58  ;;  %v2540_v10 = vpop.xlane.xlu0 %2539  ;;  %3129 = vmatprep.subr.bf16.mxu0 %v3388_v25 }
 0x7c6   : > { %v2545_v17 = vmul.f32 0.03125, %v2540_v10  ;;  %v2557_v47 = vsel %vm324_vm1, %v2551_v45, 0.0  ;;  %v2552_v3 = vmul.f32 %v2548_v55, %v2548_v55 }
 0x7c7   : > { %2558 = vadd.xlane.f32.xlu0 %v2557_v47 }
 0x7c8   : > { %v2549_v54 = vsub.f32 %v5398_v44, %v2545_v17  ;;  %v2560_v43 = vsel %vm324_vm1, %v2552_v3, 0.0  ;;  %3130 = vmatpush3.bf16.msra.mxu0 %v3388_v25 }
 0x7c9   : > { %2561 = vadd.xlane.f32.xlu1 %v2560_v43 }
 0x7ca   : > { %v2553_v5 = vmul.f32 %v2549_v54, %v2549_v54 }
 0x7cc   : > { %v2563_v11 = vsel %vm324_vm1, %v2553_v5, 0.0 }
 0x7cd   : > { %2564 = vadd.xlane.f32.xlu0 %v2563_v11 }
 0x852   : > { %v2556_v46 = vpop.xlane.xlu1 %2555 }
 0x853   : > { %v2566_v6 = vmul.f32 0.03125, %v2556_v46 }
 0x854   : > { %v2559_v4 = vpop.xlane.xlu0 %2558 }
 0x855   : > { %v2570_v22 = vadd.f32 1e-05, %v2566_v6  ;;  %v2567_v27 = vmul.f32 0.03125, %v2559_v4 }
 0x856   : > { %v2562_v63 = vpop.xlane.xlu1 %2561 }
 0x857   : > { %3455 = vrsqrt.f32 %v2570_v22  ;;  %v2571_v21 = vadd.f32 1e-05, %v2567_v27  ;;  %v2568_v20 = vmul.f32 0.03125, %v2562_v63 }
 0x859   : > { %3457 = vrsqrt.f32 %v2571_v21  ;;  %v2572_v37 = vadd.f32 1e-05, %v2568_v20 }
 0x85a   : > { %v2565_v62 = vpop.xlane.xlu0 %2564 }
 0x85b   : > { %3459 = vrsqrt.f32 %v2572_v37  ;;  %v2569_v12 = vmul.f32 0.03125, %v2565_v62 }
 0x85d   : > { %v2573_v18 = vadd.f32 1e-05, %v2569_v12 }
 0x85f   : > { %3461 = vrsqrt.f32 %v2573_v18 }
 0x861   : > { %v3456_v1 = vpop.eup %3455 }
 0x862   : > { %v2578_v13 = vmul.f32 %v3456_v1, %v2546_v28  ;;  %v3389_v28 = vld [vmem:[%s2708_s19 + $0x30] sm:$0xff]  }
 0x863   : > { %v3458_v38 = vpop.eup %3457  ;;  %3131 = vmatprep.subr.bf16.mxu0 %v3389_v28 }
 0x864   : > { %v2579_v16 = vmul.f32 %v3458_v38, %v2547_v36  ;;  %v2586_v41 = vmul.f32 %v2585_v29, %v2578_v13  ;;  %3132 = vmatpush3.bf16.msra.mxu0 %v3389_v28  ;;  %v2609_v36 = vrot.slane %v5370_v0, %v5844_v8  ;;  %v5845_v13 = vld [vmem:[#allocation20_spill] sm:$0xff] }
 0x865   : > { %v3460_v26 = vpop.eup %3459  ;;  %3133 = vmatprep.subr.bf16.mxu0 %v3390_v31  ;;  %v2728_v38 = vrot.slane %v5370_v0, %v5845_v13 }
 0x866   : > { %v2580_v32 = vmul.f32 %v3460_v26, %v2548_v55  ;;  %v2587_v30 = vmul.f32 %v2585_v29, %v2579_v16  ;;  %v2594_v50 = vadd.f32 %v2593_v49, %v2586_v41 }
 0x868   : > { %v2595_v60 = vadd.f32 %v2593_v49, %v2587_v30  ;;  %v2588_v24 = vmul.f32 %v2585_v29, %v2580_v32  ;;  %3134 = vmatpush3.bf16.msra.mxu0 %v3390_v31 }
 0x869   : > { %v3462_v7 = vpop.eup %3461 }
 0x86a   : > { %v2581_v35 = vmul.f32 %v3462_v7, %v2549_v54  ;;  %v2598_v19 = vpack.c.bf16 %v2595_v60, %v2594_v50  ;;  %v2596_v52 = vadd.f32 %v2593_v49, %v2588_v24 }
 0x86c   : > { %v2589_v42 = vmul.f32 %v2585_v29, %v2581_v35  ;;  %3115 = vmatprep.mubr.msk.bf16.mxu1 %vm324_vm1, %v2598_v19 }
 0x86e   : > { %v2597_v48 = vadd.f32 %v2593_v49, %v2589_v42 }
 0x870   : > { %v2599_v57 = vpack.c.bf16 %v2597_v48, %v2596_v52 }
 0x872   : > { %3116 = vmatmul.mubr.msk.bf16.vlgmr.msra.gmra.mrb[16].mxu1 %vm324_vm1, %v2599_v57 }
 0x945   : > { %v3117_v15 = vpop.f32.mrb[16].mxu1 }
 0x946   : > { %v2671_v34 = vadd.f32 %v3117_v15, %v2609_v36  ;;  %v2662_v55 = vpop.f32.mrb[17].mxu1 }
 0x947   : > { %v2663_v58 = vadd.f32 %v2662_v55, %v2609_v36  ;;  %v3118_v45 = vpop.f32.mrb[18].mxu1 }
 0x948   : > { %v3018_v10 = vmul.f32 -1.442695, %v2671_v34  ;;  %v2674_v17 = vadd.f32 %v3118_v45, %v2609_v36  ;;  %v2665_v47 = vpop.f32.mrb[19].mxu1 }
 0x949   : > { %v3016_v3 = vmul.f32 -1.442695, %v2663_v58  ;;  %v2666_v54 = vadd.f32 %v2665_v47, %v2609_v36 }
 0x94a   : > { %3463 = vpow2.f32 %v3018_v10  ;;  %v3019_v43 = vmul.f32 -1.442695, %v2674_v17 }
 0x94b   : > { %3465 = vpow2.f32 %v3016_v3  ;;  %v3017_v5 = vmul.f32 -1.442695, %v2666_v54 }
 0x94c   : > { %3467 = vpow2.f32 %v3019_v43 }
 0x94d   : > { %3469 = vpow2.f32 %v3017_v5 }
 0x954   : > { %v3464_v11 = vpop.eup %3463 }
 0x955   : > { %v3466_v39 = vpop.eup %3465  ;;  %v2691_v56 = vadd.f32 1.0, %v3464_v11 }
 0x956   : > { %v3468_v46 = vpop.eup %3467  ;;  %v2689_v6 = vadd.f32 1.0, %v3466_v39 }
 0x957   : > { %v3470_v4 = vpop.eup %3469  ;;  %3471 = vrcp.f32 %v2691_v56  ;;  %v2692_v22 = vadd.f32 1.0, %v3468_v46 }
 0x958   : > { %3473 = vrcp.f32 %v2689_v6  ;;  %v2690_v27 = vadd.f32 1.0, %v3470_v4  ;;  %v5846_v4 = vld [vmem:[#allocation21_spill] sm:$0xff] }
 0x959   : > { %3475 = vrcp.f32 %v2692_v22  ;;  %v2885_v22 = vrot.slane %v5370_v0, %v5846_v4 }
 0x95a   : > { %3477 = vrcp.f32 %v2690_v27 }
 0x961   : > { %v3472_v63 = vpop.eup %3471 }
 0x962   : > { %v3474_v21 = vpop.eup %3473  ;;  %v2703_v62 = vmul.f32 %v3472_v63, %v2671_v34 }
 0x963   : > { %v3476_v20 = vpop.eup %3475  ;;  %v2701_v18 = vmul.f32 %v3474_v21, %v2663_v58 }
 0x964   : > { %v3478_v37 = vpop.eup %3477  ;;  %v2704_v12 = vmul.f32 %v3476_v20, %v2674_v17  ;;  %v3029_v20 = vld [vmem:[%s3692_s13 + $0x8] ss:$0 sm:$0xff] }
 0x965   : > { %v2702_v33 = vmul.f32 %v3478_v37, %v2666_v54 }
 0x966   : > { %v2706_v29 = vpack.c.bf16 %v2704_v12, %v2703_v62 }
 0x967   : > { %v2705_v1 = vpack.c.bf16 %v2702_v33, %v2701_v18 }
 0x969   : > { %3135 = vmatprep.mubr.bf16.mxu0 %v2705_v1 }
 0x96a   : > { %3136 = vmatmul.mubr.bf16.vlgmr.msra.gmra.mrb[4].mxu0 %v2706_v29 }
 0xa3d   : > { %v3137_v16 = vpop.f32.mrb[4].mxu0 }
 0xa3e   : > { %v2811_v41 = vpop.f32.mrb[5].mxu0  ;;  %v2820_v14 = vadd.f32 %v3137_v16, %v2728_v38 }
 0xa3f   : > { %v2812_v49 = vadd.f32 %v2811_v41, %v2728_v38  ;;  %v3138_v26 = vpop.f32.mrb[6].mxu0 }
 0xa40   : > { %v2814_v32 = vpop.f32.mrb[7].mxu0  ;;  %v2823_v50 = vadd.f32 %v3138_v26, %v2728_v38  ;;  %v2828_v7 = vadd.f32 %v2820_v14, %v5391_v2 }
 0xa41   : > { %v2826_v30 = vadd.f32 %v2812_v49, %v5379_v61  ;;  %v2815_v60 = vadd.f32 %v2814_v32, %v2728_v38 }
 0xa42   : > { %v2829_v19 = vadd.f32 %v2823_v50, %v5398_v44  ;;  %v2836_v52 = vsel %vm324_vm1, %v2828_v7, 0.0 }
 0xa43   : > { %v2827_v24 = vadd.f32 %v2815_v60, %v5385_v51  ;;  %v2830_v35 = vsel %vm324_vm1, %v2826_v30, 0.0 }
 0xa44   : > { %2831 = vadd.xlane.f32.xlu1 %v2830_v35  ;;  %v2839_v48 = vsel %vm324_vm1, %v2829_v19, 0.0 }
 0xa45   : > { %v2833_v42 = vsel %vm324_vm1, %v2827_v24, 0.0 }
 0xa46   : > { %2834 = vadd.xlane.f32.xlu0 %v2833_v42 }
 0xa48   : > { %2837 = vadd.xlane.f32.xlu1 %v2836_v52 }
 0xa4a   : > { %2840 = vadd.xlane.f32.xlu0 %v2839_v48 }
 0xad1   : > { %v2832_v61 = vpop.xlane.xlu1 %2831 }
 0xad2   : > { %v2842_v57 = vmul.f32 0.03125, %v2832_v61 }
 0xad3   : > { %v2835_v53 = vpop.xlane.xlu0 %2834 }
 0xad4   : > { %v2846_v2 = vsub.f32 %v2826_v30, %v2842_v57  ;;  %v2843_v23 = vmul.f32 0.03125, %v2835_v53 }
 0xad5   : > { %v2838_v51 = vpop.xlane.xlu1 %2837 }
 0xad6   : > { %v2847_v59 = vsub.f32 %v2827_v24, %v2843_v23  ;;  %v2844_v40 = vmul.f32 0.03125, %v2838_v51  ;;  %v2850_v9 = vmul.f32 %v2846_v2, %v2846_v2 }
 0xad7   : > { %v2841_v25 = vpop.xlane.xlu0 %2840 }
 0xad8   : > { %v2848_v44 = vsub.f32 %v2828_v7, %v2844_v40  ;;  %v2845_v28 = vmul.f32 0.03125, %v2841_v25  ;;  %v2854_v31 = vsel %vm324_vm1, %v2850_v9, 0.0  ;;  %v2851_v8 = vmul.f32 %v2847_v59, %v2847_v59 }
 0xad9   : > { %2855 = vadd.xlane.f32.xlu1 %v2854_v31 }
 0xada   : > { %v2849_v36 = vsub.f32 %v2829_v19, %v2845_v28  ;;  %v2857_v15 = vsel %vm324_vm1, %v2851_v8, 0.0  ;;  %v2852_v34 = vmul.f32 %v2848_v44, %v2848_v44 }
 0xadb   : > { %2858 = vadd.xlane.f32.xlu0 %v2857_v15 }
 0xadc   : > { %v2860_v55 = vsel %vm324_vm1, %v2852_v34, 0.0  ;;  %v2853_v58 = vmul.f32 %v2849_v36, %v2849_v36 }
 0xadd   : > { %2861 = vadd.xlane.f32.xlu1 %v2860_v55 }
 0xade   : > { %v2863_v45 = vsel %vm324_vm1, %v2853_v58, 0.0 }
 0xadf   : > { %2864 = vadd.xlane.f32.xlu0 %v2863_v45 }
 0xb66   : > { %v2856_v10 = vpop.xlane.xlu1 %2855 }
 0xb67   : > { %v2866_v17 = vmul.f32 0.03125, %v2856_v10 }
 0xb68   : > { %v2859_v47 = vpop.xlane.xlu0 %2858 }
 0xb69   : > { %v2870_v3 = vadd.f32 1e-05, %v2866_v17  ;;  %v2867_v54 = vmul.f32 0.03125, %v2859_v47 }
 0xb6a   : > { %v2862_v43 = vpop.xlane.xlu1 %2861 }
 0xb6b   : > { %3479 = vrsqrt.f32 %v2870_v3  ;;  %v2871_v5 = vadd.f32 1e-05, %v2867_v54  ;;  %v2868_v11 = vmul.f32 0.03125, %v2862_v43 }
 0xb6c   : > { %v2865_v39 = vpop.xlane.xlu0 %2864 }
 0xb6d   : > { %3481 = vrsqrt.f32 %v2871_v5  ;;  %v2872_v56 = vadd.f32 1e-05, %v2868_v11  ;;  %v2869_v46 = vmul.f32 0.03125, %v2865_v39 }
 0xb6f   : > { %3483 = vrsqrt.f32 %v2872_v56  ;;  %v2873_v6 = vadd.f32 1e-05, %v2869_v46 }
 0xb71   : > { %3485 = vrsqrt.f32 %v2873_v6 }
 0xb75   : > { %v3480_v27 = vpop.eup %3479 }
 0xb76   : > { %v2878_v63 = vmul.f32 %v3480_v27, %v2846_v2 }
 0xb77   : > { %v3482_v21 = vpop.eup %3481 }
 0xb78   : > { %v2886_v37 = vmul.f32 %v2885_v22, %v2878_v63  ;;  %v2879_v62 = vmul.f32 %v3482_v21, %v2847_v59 }
 0xb79   : > { %v3484_v12 = vpop.eup %3483 }
 0xb7a   : > { %v2894_v18 = vadd.f32 %v3029_v20, %v2886_v37  ;;  %v2887_v33 = vmul.f32 %v2885_v22, %v2879_v62  ;;  %v2880_v29 = vmul.f32 %v3484_v12, %v2848_v44 }
 0xb7b   : > { %v3486_v1 = vpop.eup %3485 }
 0xb7c   : > { %2898 = vst.msk [vmem:[#allocation2] sm:$0xff] %vm324_vm1, %v2894_v18  ;;  %v2895_v13 = vadd.f32 %v3029_v20, %v2887_v33  ;;  %v2888_v38 = vmul.f32 %v2885_v22, %v2880_v29  ;;  %v2881_v16 = vmul.f32 %v3486_v1, %v2849_v36 }
 0xb7e   : > { %2899 = vst.msk [vmem:[#allocation2 + $0x8] sm:$0xff] %vm324_vm1, %v2895_v13  ;;  %v2896_v0 = vadd.f32 %v3029_v20, %v2888_v38  ;;  %v2889_v41 = vmul.f32 %v2885_v22, %v2881_v16 }
 0xb80   : > { %2900 = vst.msk [vmem:[#allocation2 + $0x10] sm:$0xff] %vm324_vm1, %v2896_v0  ;;  %v2897_v14 = vadd.f32 %v3029_v20, %v2889_v41 }
 0xb82   : > { %2901 = vst.msk [vmem:[#allocation2 + $0x18] sm:$0xff] %vm324_vm1, %v2897_v14 }
 0xb83   : > { %3501 = shalt.err (!%p3498_p12)
}
 0xb84   : > { %s3502_s29 = scalar_lea.hbm %s5491_s6, 512 }
 0xb85   : > { %p3503_p13 = scmp.ne.s32.totalorder %s5491_s6, %s3502_s29  ;;  %p3508_p2 = scmp.lt.u32.totalorder %s3502_s29, %s5491_s6 }
 0xb87   : > { %p3504_p0 = pnand %p3503_p13, %p5447_p5 }
 0xb89   : > { %p3505_p1 = pneg %p3504_p0 }
 0xb8b   : > { %p3510_p3 = pnand %p3508_p2, %p3505_p1 }
 0xb8d   : > { %3513 = shalt.err (!%p3510_p3)
}
 0xb8e   : > { %s3615_s26 = smov 128  }
 0xb8f   : > { %3204 = dma.vmem_to_hbm [thread:$0]  (%p5447_p5), %s2912_s20, 512, %s5491_s6, [#allocation3], %s3615_s26, %s3615_s26, %s3612_s30  }
 0xb90   : > { %3527 = dma.done.wait (%p5447_p5), [#allocation3], 512  }
 0xb91   : > { %3529 = vsyncadd (%p5447_p5), [#allocation3], 4294966784 }
 0xb92 PF: > { %s17_s23 = sadd.s32 1, %s3540_s23   ;;  %s5848_s21 = smov %s3536_s22 }
 0xb93   : > { %p14_p4 = scmp.ge.s32.totalorder %s17_s23, 4   ;;  %s5849_s22 = smov %s5851_s25 }
 0xb95   :  { %16 = sbr.rel (!%p14_p4) target bundleno = 2 (0x2), region = 83 }
 0xb9c   :  { %2927 = vsyncpa [#allocation3], 1 }
 0xb9d   :  { %2929 = vsyncpa [#allocation3 + $0x1], 1 }

</bundles_post_ra>
